<compile_context>
chip_gen: v6e
topology: v6e:2x2x1
jax: 0.10.0
libtpu: 0.0.40
codegen_flags: <defaults>
</compile_context>

<pallas_src>
import functools

import jax
import jax.numpy as jnp
from jax import lax
from jax.experimental import pallas as pl
from jax.experimental.pallas import tpu as pltpu


def _sigmoid(x):
    # One EUP op per element (exact sigmoid identity).
    return 0.5 * (jnp.tanh(0.5 * x) + 1.0)


def decoder_kernel(obs_ref, w1t_ref, b1_ref,
                   wihft_ref, bihf_ref, wihbt_ref, bihb_ref,
                   whhft_ref, whhbt_ref,
                   woutft_ref, woutbt_ref, bout_ref,
                   out_ref, ginf_ref, ginb_ref):
    T, F, Nt = obs_ref.shape
    Tm1 = T - 1
    H = w1t_ref.shape[0]

    # Hoist the (tiny) weights once.
    w1t = w1t_ref[...]            # (H, F)
    b1 = b1_ref[...]              # (H, 1)
    wihft = wihft_ref[...]        # (4H, H)   rows = [i f g o] blocks
    bihf = bihf_ref[...]          # (4H, 1)
    wihbt = wihbt_ref[...]        # (4H, H)
    bihb = bihb_ref[...]          # (4H, 1)
    whhft = whhft_ref[...]        # (4H, H)
    whhbt = whhbt_ref[...]        # (4H, H)

    # ---- Phase 1: diff -> fc_1 -> LSTM input projection, written straight ---
    # into the gin scratches.  Backward timesteps are pre-reversed at write
    # time so the recurrence reads ginf_ref[s] / ginb_ref[s] only.
    for s in range(Tm1):
        d = obs_ref[s + 1] - obs_ref[s]                          # (F, Nt)
        x1 = jnp.maximum(
            jnp.dot(w1t, d, preferred_element_type=jnp.float32) + b1, 0.0)
        pf = jnp.dot(wihft, x1, preferred_element_type=jnp.float32) + bihf
        pb = jnp.dot(wihbt, x1, preferred_element_type=jnp.float32) + bihb
        ginf_ref[s] = pf                                         # fwd time s
        ginb_ref[Tm1 - 1 - s] = pb                               # bwd reversed

    # ---- Phase 2: bidirectional LSTM recurrence (PyTorch gate order) --------
    # State per direction is (H, tile_n): lane-dense, sublane-sliced gates.
    hf = jnp.zeros((H, Nt), jnp.float32)
    cf = jnp.zeros((H, Nt), jnp.float32)
    hb = jnp.zeros((H, Nt), jnp.float32)
    cb = jnp.zeros((H, Nt), jnp.float32)
    sf = jnp.zeros((H, Nt), jnp.float32)
    sb = jnp.zeros((H, Nt), jnp.float32)

    for s in range(Tm1):   # static trip count (T-1 = 7) -> fully unrolled
        gf = ginf_ref[s] + jnp.dot(whhft, hf,
                                   preferred_element_type=jnp.float32)
        gb = ginb_ref[s] + jnp.dot(whhbt, hb,
                                   preferred_element_type=jnp.float32)

        i_f = _sigmoid(gf[0 * H:1 * H])
        f_f = _sigmoid(gf[1 * H:2 * H])
        g_f = jnp.tanh(gf[2 * H:3 * H])
        o_f = _sigmoid(gf[3 * H:4 * H])
        cf = f_f * cf + i_f * g_f
        hf = o_f * jnp.tanh(cf)
        sf = sf + hf

        i_b = _sigmoid(gb[0 * H:1 * H])
        f_b = _sigmoid(gb[1 * H:2 * H])
        g_b = jnp.tanh(gb[2 * H:3 * H])
        o_b = _sigmoid(gb[3 * H:4 * H])
        cb = f_b * cb + i_b * g_b
        hb = o_b * jnp.tanh(cb)
        sb = sb + hb

    # ---- Phase 3: output Linear (1/Tm1 mean folded into wout host-side) -----
    out_ref[...] = (jnp.dot(woutft_ref[...], sf,
                            preferred_element_type=jnp.float32)
                    + jnp.dot(woutbt_ref[...], sb,
                              preferred_element_type=jnp.float32)
                    + bout_ref[...])


def decoder_forward(obs_sequences, params, skill_interval, input_shape,
                    tile_n=128):
    """obs_sequences: (bs, n_agents, skill_interval, S, input_shape) float32."""
    T = skill_interval
    F = input_shape
    Tm1 = T - 1
    H = params["w1"].shape[1]
    K = params["wout"].shape[1]

    # Glue equivalent to permute(2,0,1,3,4).reshape(T,-1,F), but with N on the
    # lane (last) dimension: (T, F, N).
    x = jnp.transpose(obs_sequences, (2, 4, 0, 1, 3)).reshape(T, F, -1)
    N = x.shape[2]

    # tile_n multiple of 128 (lane width); pad N to a tile multiple.
    tile_n = max(128, (tile_n // 128) * 128)
    n_pad = ((N + tile_n - 1) // tile_n) * tile_n
    if n_pad != N:
        x = jnp.pad(x, ((0, 0), (0, 0), (0, n_pad - N)))
    grid = (n_pad // tile_n,)

    # ---- Host-side weight repack (transposed; mean folded into wout) --------
    w1t = params["w1"].T                                   # (H, F)
    b1c = params["b1"].T                                   # (H, 1)
    wih_ft = params["wih_f"].T                             # (4H, H)
    wih_bt = params["wih_b"].T                             # (4H, H)
    bih_f = params["b_f"].T                                # (4H, 1)
    bih_b = params["b_b"].T                                # (4H, 1)
    whh_ft = params["whh_f"].T                             # (4H, H)
    whh_bt = params["whh_b"].T                             # (4H, H)
    wout_s = params["wout"] * (1.0 / Tm1)                  # fold time mean
    wout_ft = wout_s[:H].T                                 # (K, H)
    wout_bt = wout_s[H:].T                                 # (K, H)
    bout_c = params["bout"].T                              # (K, 1)

    def const_spec(shape):
        nd = len(shape)
        return pl.BlockSpec(shape, lambda n, _nd=nd: (0,) * _nd)

    flops = n_pad * (Tm1 * (2 * H * F + 32 * H * H) + 4 * K * H)
    transc = Tm1 * n_pad * 10 * H
    bytes_accessed = 4 * (T * F * n_pad + H * F + 4 * (4 * H * H)
                          + 2 * H * K + 10 * H + K + K * n_pad)
    cost = pl.CostEstimate(flops=flops, transcendentals=transc,
                           bytes_accessed=bytes_accessed)

    out = pl.pallas_call(
        decoder_kernel,
        out_shape=jax.ShapeDtypeStruct((K, n_pad), jnp.float32),
        grid_spec=pltpu.PrefetchScalarGridSpec(
            num_scalar_prefetch=0,
            grid=grid,
            in_specs=[pl.BlockSpec((T, F, tile_n), lambda n: (0, 0, n)),
                      const_spec(w1t.shape),
                      const_spec(b1c.shape),
                      const_spec(wih_ft.shape),
                      const_spec(bih_f.shape),
                      const_spec(wih_bt.shape),
                      const_spec(bih_b.shape),
                      const_spec(whh_ft.shape),
                      const_spec(whh_bt.shape),
                      const_spec(wout_ft.shape),
                      const_spec(wout_bt.shape),
                      const_spec(bout_c.shape)],
            out_specs=pl.BlockSpec((K, tile_n), lambda n: (0, n)),
            scratch_shapes=[pltpu.VMEM((Tm1, 4 * H, tile_n), jnp.float32),
                            pltpu.VMEM((Tm1, 4 * H, tile_n), jnp.float32)]),
        compiler_params=pltpu.CompilerParams(
            dimension_semantics=("parallel",)),
        cost_estimate=cost,
    )(x, w1t, b1c, wih_ft, bih_f, wih_bt, bih_b, whh_ft, whh_bt,
      wout_ft, wout_bt, bout_c)
    return out[:, :N].T


def decoder_reference(obs_sequences, params, skill_interval, input_shape):
    """Pure-JAX reference mirroring the PyTorch Decoder.forward semantics."""
    T = skill_interval
    x = jnp.transpose(obs_sequences, (2, 0, 1, 3, 4)).reshape(T, -1, input_shape)
    d = x[1:] - x[:-1]
    H = params["w1"].shape[1]
    Tm1, N, _ = d.shape
    x1 = jax.nn.relu(d @ params["w1"] + params["b1"])

    def run_dir(wih, whh, b, reverse):
        seq = x1[::-1] if reverse else x1

        def step(carry, xt):
            h, c = carry
            gates = xt @ wih + h @ whh + b
            i = jax.nn.sigmoid(gates[:, :H])
            f = jax.nn.sigmoid(gates[:, H:2 * H])
            g = jnp.tanh(gates[:, 2 * H:3 * H])
            o = jax.nn.sigmoid(gates[:, 3 * H:])
            c = f * c + i * g
            h = o * jnp.tanh(c)
            return (h, c), h

        zero = jnp.zeros((N, H), jnp.float32)
        _, hs = lax.scan(step, (zero, zero), seq)
        return hs[::-1] if reverse else hs

    hf = run_dir(params["wih_f"], params["whh_f"], params["b_f"], False)
    hb = run_dir(params["wih_b"], params["whh_b"], params["b_b"], True)
    x2 = jnp.concatenate([hf, hb], axis=-1)           # (Tm1, N, 2H)
    avg = jnp.mean(x2, axis=0)                        # (N, 2H)
    return avg @ params["wout"] + params["bout"]


def make_params(key, input_shape, rnn_hidden_dim, n_skills):
    H = rnn_hidden_dim // 2
    ks = jax.random.split(key, 12)
    s = 0.1

    def rnd(k, shape):
        return jax.random.normal(k, shape, dtype=jnp.float32) * s

    return {
        "w1": rnd(ks[0], (input_shape, H)),
        "b1": rnd(ks[1], (1, H)),
        # forward LSTM direction (PyTorch weight_ih_l0 (4H,H) -> transposed)
        "wih_f": rnd(ks[2], (H, 4 * H)),
        "whh_f": rnd(ks[3], (H, 4 * H)),
        "b_f": rnd(ks[4], (1, 4 * H)),      # = b_ih_l0 + b_hh_l0 folded
        # reverse LSTM direction
        "wih_b": rnd(ks[5], (H, 4 * H)),
        "whh_b": rnd(ks[6], (H, 4 * H)),
        "b_b": rnd(ks[7], (1, 4 * H)),
        # output Linear(rnn_hidden_dim, n_skills)
        "wout": rnd(ks[8], (2 * H, n_skills)),
        "bout": rnd(ks[9], (1, n_skills)),
    }


if __name__ == "__main__":
    # Small shapes, but large enough that the N-grid actually has 2 tiles.
    bs, n_agents, skill_interval, S = 4, 4, 8, 16   # N = 4*4*16 = 256
    input_shape = 32
    rnn_hidden_dim = 32          # -> LSTM hidden = 16 per direction
    n_skills = 4

    key = jax.random.PRNGKey(0)
    k_params, k_obs = jax.random.split(key)
    params = make_params(k_params, input_shape, rnn_hidden_dim, n_skills)
    obs = jax.random.normal(
        k_obs, (bs, n_agents, skill_interval, S, input_shape), dtype=jnp.float32)

    run = jax.jit(functools.partial(decoder_forward,
                                    skill_interval=skill_interval,
                                    input_shape=input_shape,
                                    tile_n=128))
    out = jax.block_until_ready(run(obs, params))

    ref = jax.block_until_ready(
        decoder_reference(obs, params, skill_interval, input_shape))

    assert out.shape == (bs * n_agents * S, n_skills), out.shape
    assert jnp.allclose(out, ref, rtol=1e-3, atol=1e-3), (
        float(jnp.max(jnp.abs(out - ref))))
    print("KERNEL_OK")
</pallas_src>

<mosaic_0001>
module attributes {stable_mosaic.version = 11 : i64} {
  func.func @decoder_kernel(%arg0: i32, %arg1: memref<8x32x128xf32, #tpu.memory_space<vmem>>, %arg2: memref<16x32xf32, #tpu.memory_space<vmem>>, %arg3: memref<16x1xf32, #tpu.memory_space<vmem>>, %arg4: memref<64x16xf32, #tpu.memory_space<vmem>>, %arg5: memref<64x1xf32, #tpu.memory_space<vmem>>, %arg6: memref<64x16xf32, #tpu.memory_space<vmem>>, %arg7: memref<64x1xf32, #tpu.memory_space<vmem>>, %arg8: memref<64x16xf32, #tpu.memory_space<vmem>>, %arg9: memref<64x16xf32, #tpu.memory_space<vmem>>, %arg10: memref<4x16xf32, #tpu.memory_space<vmem>>, %arg11: memref<4x16xf32, #tpu.memory_space<vmem>>, %arg12: memref<4x1xf32, #tpu.memory_space<vmem>>, %arg13: memref<4x128xf32, #tpu.memory_space<vmem>>, %arg14: memref<7x64x128xf32, #tpu.memory_space<vmem>>, %arg15: memref<7x64x128xf32, #tpu.memory_space<vmem>>) attributes {dimension_semantics = [#tpu.dimension_semantics<parallel>], iteration_bounds = array<i64: 2>, scalar_prefetch = 0 : i64, scratch_operands = 2 : i64, tpu.core_type = #tpu.core_type<tc>, window_params = [{transform_indices = @transform_0, window_bounds = array<i64: 8, 32, 128>}, {pipeline_mode = #tpu.pipeline_mode<synchronous>, transform_indices = @transform_1, window_bounds = array<i64: 16, 32>}, {pipeline_mode = #tpu.pipeline_mode<synchronous>, transform_indices = @transform_2, window_bounds = array<i64: 16, 1>}, {pipeline_mode = #tpu.pipeline_mode<synchronous>, transform_indices = @transform_3, window_bounds = array<i64: 64, 16>}, {pipeline_mode = #tpu.pipeline_mode<synchronous>, transform_indices = @transform_4, window_bounds = array<i64: 64, 1>}, {pipeline_mode = #tpu.pipeline_mode<synchronous>, transform_indices = @transform_5, window_bounds = array<i64: 64, 16>}, {pipeline_mode = #tpu.pipeline_mode<synchronous>, transform_indices = @transform_6, window_bounds = array<i64: 64, 1>}, {pipeline_mode = #tpu.pipeline_mode<synchronous>, transform_indices = @transform_7, window_bounds = array<i64: 64, 16>}, {pipeline_mode = #tpu.pipeline_mode<synchronous>, transform_indices = @transform_8, window_bounds = array<i64: 64, 16>}, {pipeline_mode = #tpu.pipeline_mode<synchronous>, transform_indices = @transform_9, window_bounds = array<i64: 4, 16>}, {pipeline_mode = #tpu.pipeline_mode<synchronous>, transform_indices = @transform_10, window_bounds = array<i64: 4, 16>}, {pipeline_mode = #tpu.pipeline_mode<synchronous>, transform_indices = @transform_11, window_bounds = array<i64: 4, 1>}, {transform_indices = @transform_12, window_bounds = array<i64: 4, 128>}]} {
    %c0 = arith.constant 0 : index
    %c0_0 = arith.constant 0 : index
    %0 = vector.load %arg2[%c0, %c0_0] : memref<16x32xf32, #tpu.memory_space<vmem>>, vector<16x32xf32>
    %c0_1 = arith.constant 0 : index
    %c0_2 = arith.constant 0 : index
    %1 = vector.load %arg3[%c0_1, %c0_2] : memref<16x1xf32, #tpu.memory_space<vmem>>, vector<16x1xf32>
    %c0_3 = arith.constant 0 : index
    %c0_4 = arith.constant 0 : index
    %2 = vector.load %arg4[%c0_3, %c0_4] : memref<64x16xf32, #tpu.memory_space<vmem>>, vector<64x16xf32>
    %c0_5 = arith.constant 0 : index
    %c0_6 = arith.constant 0 : index
    %3 = vector.load %arg5[%c0_5, %c0_6] : memref<64x1xf32, #tpu.memory_space<vmem>>, vector<64x1xf32>
    %c0_7 = arith.constant 0 : index
    %c0_8 = arith.constant 0 : index
    %4 = vector.load %arg6[%c0_7, %c0_8] : memref<64x16xf32, #tpu.memory_space<vmem>>, vector<64x16xf32>
    %c0_9 = arith.constant 0 : index
    %c0_10 = arith.constant 0 : index
    %5 = vector.load %arg7[%c0_9, %c0_10] : memref<64x1xf32, #tpu.memory_space<vmem>>, vector<64x1xf32>
    %c0_11 = arith.constant 0 : index
    %c0_12 = arith.constant 0 : index
    %6 = vector.load %arg8[%c0_11, %c0_12] : memref<64x16xf32, #tpu.memory_space<vmem>>, vector<64x16xf32>
    %c0_13 = arith.constant 0 : index
    %c0_14 = arith.constant 0 : index
    %7 = vector.load %arg9[%c0_13, %c0_14] : memref<64x16xf32, #tpu.memory_space<vmem>>, vector<64x16xf32>
    %c1 = arith.constant 1 : index
    %c0_15 = arith.constant 0 : index
    %c0_16 = arith.constant 0 : index
    %8 = vector.load %arg1[%c1, %c0_15, %c0_16] : memref<8x32x128xf32, #tpu.memory_space<vmem>>, vector<1x32x128xf32>
    %9 = vector.shape_cast %8 : vector<1x32x128xf32> to vector<32x128xf32>
    %c0_17 = arith.constant 0 : index
    %c0_18 = arith.constant 0 : index
    %c0_19 = arith.constant 0 : index
    %10 = vector.load %arg1[%c0_17, %c0_18, %c0_19] : memref<8x32x128xf32, #tpu.memory_space<vmem>>, vector<1x32x128xf32>
    %11 = vector.shape_cast %10 : vector<1x32x128xf32> to vector<32x128xf32>
    %12 = arith.subf %9, %11 : vector<32x128xf32>
    %cst = arith.constant dense<0.000000e+00> : vector<16x128xf32>
    %13 = tpu.matmul %0, %12, %cst {dimension_numbers = #tpu.dot_dimension_numbers<[1], [0], [0], [1], [0, 0, 1, 1], [], []>} : vector<16x32xf32>, vector<32x128xf32>, vector<16x128xf32> -> vector<16x128xf32>
    %14 = vector.broadcast %1 : vector<16x1xf32> to vector<16x128xf32>
    %15 = arith.addf %13, %14 : vector<16x128xf32>
    %cst_20 = arith.constant 0.000000e+00 : f32
    %16 = vector.broadcast %cst_20 : f32 to vector<16x128xf32>
    %17 = arith.maximumf %15, %16 : vector<16x128xf32>
    %cst_21 = arith.constant dense<0.000000e+00> : vector<64x128xf32>
    %18 = tpu.matmul %2, %17, %cst_21 {dimension_numbers = #tpu.dot_dimension_numbers<[1], [0], [0], [1], [0, 0, 1, 1], [], []>} : vector<64x16xf32>, vector<16x128xf32>, vector<64x128xf32> -> vector<64x128xf32>
    %19 = vector.broadcast %3 : vector<64x1xf32> to vector<64x128xf32>
    %20 = arith.addf %18, %19 : vector<64x128xf32>
    %cst_22 = arith.constant dense<0.000000e+00> : vector<64x128xf32>
    %21 = tpu.matmul %4, %17, %cst_22 {dimension_numbers = #tpu.dot_dimension_numbers<[1], [0], [0], [1], [0, 0, 1, 1], [], []>} : vector<64x16xf32>, vector<16x128xf32>, vector<64x128xf32> -> vector<64x128xf32>
    %22 = vector.broadcast %5 : vector<64x1xf32> to vector<64x128xf32>
    %23 = arith.addf %21, %22 : vector<64x128xf32>
    %c0_23 = arith.constant 0 : index
    %c0_24 = arith.constant 0 : index
    %c0_25 = arith.constant 0 : index
    %24 = vector.load %arg14[%c0_23, %c0_24, %c0_25] : memref<7x64x128xf32, #tpu.memory_space<vmem>>, vector<1x64x128xf32>
    %25 = vector.shape_cast %24 : vector<1x64x128xf32> to vector<64x128xf32>
    %26 = vector.shape_cast %20 : vector<64x128xf32> to vector<1x64x128xf32>
    tpu.vector_store %arg14[%c0_23, %c0_24, %c0_25], %26 {strides = array<i32>} : memref<7x64x128xf32, #tpu.memory_space<vmem>>, vector<1x64x128xf32>,
    %c6 = arith.constant 6 : index
    %c0_26 = arith.constant 0 : index
    %c0_27 = arith.constant 0 : index
    %27 = vector.load %arg15[%c6, %c0_26, %c0_27] : memref<7x64x128xf32, #tpu.memory_space<vmem>>, vector<1x64x128xf32>
    %28 = vector.shape_cast %27 : vector<1x64x128xf32> to vector<64x128xf32>
    %29 = vector.shape_cast %23 : vector<64x128xf32> to vector<1x64x128xf32>
    tpu.vector_store %arg15[%c6, %c0_26, %c0_27], %29 {strides = array<i32>} : memref<7x64x128xf32, #tpu.memory_space<vmem>>, vector<1x64x128xf32>,
    %c2 = arith.constant 2 : index
    %c0_28 = arith.constant 0 : index
    %c0_29 = arith.constant 0 : index
    %30 = vector.load %arg1[%c2, %c0_28, %c0_29] : memref<8x32x128xf32, #tpu.memory_space<vmem>>, vector<1x32x128xf32>
    %31 = vector.shape_cast %30 : vector<1x32x128xf32> to vector<32x128xf32>
    %c1_30 = arith.constant 1 : index
    %c0_31 = arith.constant 0 : index
    %c0_32 = arith.constant 0 : index
    %32 = vector.load %arg1[%c1_30, %c0_31, %c0_32] : memref<8x32x128xf32, #tpu.memory_space<vmem>>, vector<1x32x128xf32>
    %33 = vector.shape_cast %32 : vector<1x32x128xf32> to vector<32x128xf32>
    %34 = arith.subf %31, %33 : vector<32x128xf32>
    %cst_33 = arith.constant dense<0.000000e+00> : vector<16x128xf32>
    %35 = tpu.matmul %0, %34, %cst_33 {dimension_numbers = #tpu.dot_dimension_numbers<[1], [0], [0], [1], [0, 0, 1, 1], [], []>} : vector<16x32xf32>, vector<32x128xf32>, vector<16x128xf32> -> vector<16x128xf32>
    %36 = vector.broadcast %1 : vector<16x1xf32> to vector<16x128xf32>
    %37 = arith.addf %35, %36 : vector<16x128xf32>
    %cst_34 = arith.constant 0.000000e+00 : f32
    %38 = vector.broadcast %cst_34 : f32 to vector<16x128xf32>
    %39 = arith.maximumf %37, %38 : vector<16x128xf32>
    %cst_35 = arith.constant dense<0.000000e+00> : vector<64x128xf32>
    %40 = tpu.matmul %2, %39, %cst_35 {dimension_numbers = #tpu.dot_dimension_numbers<[1], [0], [0], [1], [0, 0, 1, 1], [], []>} : vector<64x16xf32>, vector<16x128xf32>, vector<64x128xf32> -> vector<64x128xf32>
    %41 = vector.broadcast %3 : vector<64x1xf32> to vector<64x128xf32>
    %42 = arith.addf %40, %41 : vector<64x128xf32>
    %cst_36 = arith.constant dense<0.000000e+00> : vector<64x128xf32>
    %43 = tpu.matmul %4, %39, %cst_36 {dimension_numbers = #tpu.dot_dimension_numbers<[1], [0], [0], [1], [0, 0, 1, 1], [], []>} : vector<64x16xf32>, vector<16x128xf32>, vector<64x128xf32> -> vector<64x128xf32>
    %44 = vector.broadcast %5 : vector<64x1xf32> to vector<64x128xf32>
    %45 = arith.addf %43, %44 : vector<64x128xf32>
    %c1_37 = arith.constant 1 : index
    %c0_38 = arith.constant 0 : index
    %c0_39 = arith.constant 0 : index
    %46 = vector.load %arg14[%c1_37, %c0_38, %c0_39] : memref<7x64x128xf32, #tpu.memory_space<vmem>>, vector<1x64x128xf32>
    %47 = vector.shape_cast %46 : vector<1x64x128xf32> to vector<64x128xf32>
    %48 = vector.shape_cast %42 : vector<64x128xf32> to vector<1x64x128xf32>
    tpu.vector_store %arg14[%c1_37, %c0_38, %c0_39], %48 {strides = array<i32>} : memref<7x64x128xf32, #tpu.memory_space<vmem>>, vector<1x64x128xf32>,
    %c5 = arith.constant 5 : index
    %c0_40 = arith.constant 0 : index
    %c0_41 = arith.constant 0 : index
    %49 = vector.load %arg15[%c5, %c0_40, %c0_41] : memref<7x64x128xf32, #tpu.memory_space<vmem>>, vector<1x64x128xf32>
    %50 = vector.shape_cast %49 : vector<1x64x128xf32> to vector<64x128xf32>
    %51 = vector.shape_cast %45 : vector<64x128xf32> to vector<1x64x128xf32>
    tpu.vector_store %arg15[%c5, %c0_40, %c0_41], %51 {strides = array<i32>} : memref<7x64x128xf32, #tpu.memory_space<vmem>>, vector<1x64x128xf32>,
    %c3 = arith.constant 3 : index
    %c0_42 = arith.constant 0 : index
    %c0_43 = arith.constant 0 : index
    %52 = vector.load %arg1[%c3, %c0_42, %c0_43] : memref<8x32x128xf32, #tpu.memory_space<vmem>>, vector<1x32x128xf32>
    %53 = vector.shape_cast %52 : vector<1x32x128xf32> to vector<32x128xf32>
    %c2_44 = arith.constant 2 : index
    %c0_45 = arith.constant 0 : index
    %c0_46 = arith.constant 0 : index
    %54 = vector.load %arg1[%c2_44, %c0_45, %c0_46] : memref<8x32x128xf32, #tpu.memory_space<vmem>>, vector<1x32x128xf32>
    %55 = vector.shape_cast %54 : vector<1x32x128xf32> to vector<32x128xf32>
    %56 = arith.subf %53, %55 : vector<32x128xf32>
    %cst_47 = arith.constant dense<0.000000e+00> : vector<16x128xf32>
    %57 = tpu.matmul %0, %56, %cst_47 {dimension_numbers = #tpu.dot_dimension_numbers<[1], [0], [0], [1], [0, 0, 1, 1], [], []>} : vector<16x32xf32>, vector<32x128xf32>, vector<16x128xf32> -> vector<16x128xf32>
    %58 = vector.broadcast %1 : vector<16x1xf32> to vector<16x128xf32>
    %59 = arith.addf %57, %58 : vector<16x128xf32>
    %cst_48 = arith.constant 0.000000e+00 : f32
    %60 = vector.broadcast %cst_48 : f32 to vector<16x128xf32>
    %61 = arith.maximumf %59, %60 : vector<16x128xf32>
    %cst_49 = arith.constant dense<0.000000e+00> : vector<64x128xf32>
    %62 = tpu.matmul %2, %61, %cst_49 {dimension_numbers = #tpu.dot_dimension_numbers<[1], [0], [0], [1], [0, 0, 1, 1], [], []>} : vector<64x16xf32>, vector<16x128xf32>, vector<64x128xf32> -> vector<64x128xf32>
    %63 = vector.broadcast %3 : vector<64x1xf32> to vector<64x128xf32>
    %64 = arith.addf %62, %63 : vector<64x128xf32>
    %cst_50 = arith.constant dense<0.000000e+00> : vector<64x128xf32>
    %65 = tpu.matmul %4, %61, %cst_50 {dimension_numbers = #tpu.dot_dimension_numbers<[1], [0], [0], [1], [0, 0, 1, 1], [], []>} : vector<64x16xf32>, vector<16x128xf32>, vector<64x128xf32> -> vector<64x128xf32>
    %66 = vector.broadcast %5 : vector<64x1xf32> to vector<64x128xf32>
    %67 = arith.addf %65, %66 : vector<64x128xf32>
    %c2_51 = arith.constant 2 : index
    %c0_52 = arith.constant 0 : index
    %c0_53 = arith.constant 0 : index
    %68 = vector.load %arg14[%c2_51, %c0_52, %c0_53] : memref<7x64x128xf32, #tpu.memory_space<vmem>>, vector<1x64x128xf32>
    %69 = vector.shape_cast %68 : vector<1x64x128xf32> to vector<64x128xf32>
    %70 = vector.shape_cast %64 : vector<64x128xf32> to vector<1x64x128xf32>
    tpu.vector_store %arg14[%c2_51, %c0_52, %c0_53], %70 {strides = array<i32>} : memref<7x64x128xf32, #tpu.memory_space<vmem>>, vector<1x64x128xf32>,
    %c4 = arith.constant 4 : index
    %c0_54 = arith.constant 0 : index
    %c0_55 = arith.constant 0 : index
    %71 = vector.load %arg15[%c4, %c0_54, %c0_55] : memref<7x64x128xf32, #tpu.memory_space<vmem>>, vector<1x64x128xf32>
    %72 = vector.shape_cast %71 : vector<1x64x128xf32> to vector<64x128xf32>
    %73 = vector.shape_cast %67 : vector<64x128xf32> to vector<1x64x128xf32>
    tpu.vector_store %arg15[%c4, %c0_54, %c0_55], %73 {strides = array<i32>} : memref<7x64x128xf32, #tpu.memory_space<vmem>>, vector<1x64x128xf32>,
    %c4_56 = arith.constant 4 : index
    %c0_57 = arith.constant 0 : index
    %c0_58 = arith.constant 0 : index
    %74 = vector.load %arg1[%c4_56, %c0_57, %c0_58] : memref<8x32x128xf32, #tpu.memory_space<vmem>>, vector<1x32x128xf32>
    %75 = vector.shape_cast %74 : vector<1x32x128xf32> to vector<32x128xf32>
    %c3_59 = arith.constant 3 : index
    %c0_60 = arith.constant 0 : index
    %c0_61 = arith.constant 0 : index
    %76 = vector.load %arg1[%c3_59, %c0_60, %c0_61] : memref<8x32x128xf32, #tpu.memory_space<vmem>>, vector<1x32x128xf32>
    %77 = vector.shape_cast %76 : vector<1x32x128xf32> to vector<32x128xf32>
    %78 = arith.subf %75, %77 : vector<32x128xf32>
    %cst_62 = arith.constant dense<0.000000e+00> : vector<16x128xf32>
    %79 = tpu.matmul %0, %78, %cst_62 {dimension_numbers = #tpu.dot_dimension_numbers<[1], [0], [0], [1], [0, 0, 1, 1], [], []>} : vector<16x32xf32>, vector<32x128xf32>, vector<16x128xf32> -> vector<16x128xf32>
    %80 = vector.broadcast %1 : vector<16x1xf32> to vector<16x128xf32>
    %81 = arith.addf %79, %80 : vector<16x128xf32>
    %cst_63 = arith.constant 0.000000e+00 : f32
    %82 = vector.broadcast %cst_63 : f32 to vector<16x128xf32>
    %83 = arith.maximumf %81, %82 : vector<16x128xf32>
    %cst_64 = arith.constant dense<0.000000e+00> : vector<64x128xf32>
    %84 = tpu.matmul %2, %83, %cst_64 {dimension_numbers = #tpu.dot_dimension_numbers<[1], [0], [0], [1], [0, 0, 1, 1], [], []>} : vector<64x16xf32>, vector<16x128xf32>, vector<64x128xf32> -> vector<64x128xf32>
    %85 = vector.broadcast %3 : vector<64x1xf32> to vector<64x128xf32>
    %86 = arith.addf %84, %85 : vector<64x128xf32>
    %cst_65 = arith.constant dense<0.000000e+00> : vector<64x128xf32>
    %87 = tpu.matmul %4, %83, %cst_65 {dimension_numbers = #tpu.dot_dimension_numbers<[1], [0], [0], [1], [0, 0, 1, 1], [], []>} : vector<64x16xf32>, vector<16x128xf32>, vector<64x128xf32> -> vector<64x128xf32>
    %88 = vector.broadcast %5 : vector<64x1xf32> to vector<64x128xf32>
    %89 = arith.addf %87, %88 : vector<64x128xf32>
    %c3_66 = arith.constant 3 : index
    %c0_67 = arith.constant 0 : index
    %c0_68 = arith.constant 0 : index
    %90 = vector.load %arg14[%c3_66, %c0_67, %c0_68] : memref<7x64x128xf32, #tpu.memory_space<vmem>>, vector<1x64x128xf32>
    %91 = vector.shape_cast %90 : vector<1x64x128xf32> to vector<64x128xf32>
    %92 = vector.shape_cast %86 : vector<64x128xf32> to vector<1x64x128xf32>
    tpu.vector_store %arg14[%c3_66, %c0_67, %c0_68], %92 {strides = array<i32>} : memref<7x64x128xf32, #tpu.memory_space<vmem>>, vector<1x64x128xf32>,
    %c3_69 = arith.constant 3 : index
    %c0_70 = arith.constant 0 : index
    %c0_71 = arith.constant 0 : index
    %93 = vector.load %arg15[%c3_69, %c0_70, %c0_71] : memref<7x64x128xf32, #tpu.memory_space<vmem>>, vector<1x64x128xf32>
    %94 = vector.shape_cast %93 : vector<1x64x128xf32> to vector<64x128xf32>
    %95 = vector.shape_cast %89 : vector<64x128xf32> to vector<1x64x128xf32>
    tpu.vector_store %arg15[%c3_69, %c0_70, %c0_71], %95 {strides = array<i32>} : memref<7x64x128xf32, #tpu.memory_space<vmem>>, vector<1x64x128xf32>,
    %c5_72 = arith.constant 5 : index
    %c0_73 = arith.constant 0 : index
    %c0_74 = arith.constant 0 : index
    %96 = vector.load %arg1[%c5_72, %c0_73, %c0_74] : memref<8x32x128xf32, #tpu.memory_space<vmem>>, vector<1x32x128xf32>
    %97 = vector.shape_cast %96 : vector<1x32x128xf32> to vector<32x128xf32>
    %c4_75 = arith.constant 4 : index
    %c0_76 = arith.constant 0 : index
    %c0_77 = arith.constant 0 : index
    %98 = vector.load %arg1[%c4_75, %c0_76, %c0_77] : memref<8x32x128xf32, #tpu.memory_space<vmem>>, vector<1x32x128xf32>
    %99 = vector.shape_cast %98 : vector<1x32x128xf32> to vector<32x128xf32>
    %100 = arith.subf %97, %99 : vector<32x128xf32>
    %cst_78 = arith.constant dense<0.000000e+00> : vector<16x128xf32>
    %101 = tpu.matmul %0, %100, %cst_78 {dimension_numbers = #tpu.dot_dimension_numbers<[1], [0], [0], [1], [0, 0, 1, 1], [], []>} : vector<16x32xf32>, vector<32x128xf32>, vector<16x128xf32> -> vector<16x128xf32>
    %102 = vector.broadcast %1 : vector<16x1xf32> to vector<16x128xf32>
    %103 = arith.addf %101, %102 : vector<16x128xf32>
    %cst_79 = arith.constant 0.000000e+00 : f32
    %104 = vector.broadcast %cst_79 : f32 to vector<16x128xf32>
    %105 = arith.maximumf %103, %104 : vector<16x128xf32>
    %cst_80 = arith.constant dense<0.000000e+00> : vector<64x128xf32>
    %106 = tpu.matmul %2, %105, %cst_80 {dimension_numbers = #tpu.dot_dimension_numbers<[1], [0], [0], [1], [0, 0, 1, 1], [], []>} : vector<64x16xf32>, vector<16x128xf32>, vector<64x128xf32> -> vector<64x128xf32>
    %107 = vector.broadcast %3 : vector<64x1xf32> to vector<64x128xf32>
    %108 = arith.addf %106, %107 : vector<64x128xf32>
    %cst_81 = arith.constant dense<0.000000e+00> : vector<64x128xf32>
    %109 = tpu.matmul %4, %105, %cst_81 {dimension_numbers = #tpu.dot_dimension_numbers<[1], [0], [0], [1], [0, 0, 1, 1], [], []>} : vector<64x16xf32>, vector<16x128xf32>, vector<64x128xf32> -> vector<64x128xf32>
    %110 = vector.broadcast %5 : vector<64x1xf32> to vector<64x128xf32>
    %111 = arith.addf %109, %110 : vector<64x128xf32>
    %c4_82 = arith.constant 4 : index
    %c0_83 = arith.constant 0 : index
    %c0_84 = arith.constant 0 : index
    %112 = vector.load %arg14[%c4_82, %c0_83, %c0_84] : memref<7x64x128xf32, #tpu.memory_space<vmem>>, vector<1x64x128xf32>
    %113 = vector.shape_cast %112 : vector<1x64x128xf32> to vector<64x128xf32>
    %114 = vector.shape_cast %108 : vector<64x128xf32> to vector<1x64x128xf32>
    tpu.vector_store %arg14[%c4_82, %c0_83, %c0_84], %114 {strides = array<i32>} : memref<7x64x128xf32, #tpu.memory_space<vmem>>, vector<1x64x128xf32>,
    %c2_85 = arith.constant 2 : index
    %c0_86 = arith.constant 0 : index
    %c0_87 = arith.constant 0 : index
    %115 = vector.load %arg15[%c2_85, %c0_86, %c0_87] : memref<7x64x128xf32, #tpu.memory_space<vmem>>, vector<1x64x128xf32>
    %116 = vector.shape_cast %115 : vector<1x64x128xf32> to vector<64x128xf32>
    %117 = vector.shape_cast %111 : vector<64x128xf32> to vector<1x64x128xf32>
    tpu.vector_store %arg15[%c2_85, %c0_86, %c0_87], %117 {strides = array<i32>} : memref<7x64x128xf32, #tpu.memory_space<vmem>>, vector<1x64x128xf32>,
    %c6_88 = arith.constant 6 : index
    %c0_89 = arith.constant 0 : index
    %c0_90 = arith.constant 0 : index
    %118 = vector.load %arg1[%c6_88, %c0_89, %c0_90] : memref<8x32x128xf32, #tpu.memory_space<vmem>>, vector<1x32x128xf32>
    %119 = vector.shape_cast %118 : vector<1x32x128xf32> to vector<32x128xf32>
    %c5_91 = arith.constant 5 : index
    %c0_92 = arith.constant 0 : index
    %c0_93 = arith.constant 0 : index
    %120 = vector.load %arg1[%c5_91, %c0_92, %c0_93] : memref<8x32x128xf32, #tpu.memory_space<vmem>>, vector<1x32x128xf32>
    %121 = vector.shape_cast %120 : vector<1x32x128xf32> to vector<32x128xf32>
    %122 = arith.subf %119, %121 : vector<32x128xf32>
    %cst_94 = arith.constant dense<0.000000e+00> : vector<16x128xf32>
    %123 = tpu.matmul %0, %122, %cst_94 {dimension_numbers = #tpu.dot_dimension_numbers<[1], [0], [0], [1], [0, 0, 1, 1], [], []>} : vector<16x32xf32>, vector<32x128xf32>, vector<16x128xf32> -> vector<16x128xf32>
    %124 = vector.broadcast %1 : vector<16x1xf32> to vector<16x128xf32>
    %125 = arith.addf %123, %124 : vector<16x128xf32>
    %cst_95 = arith.constant 0.000000e+00 : f32
    %126 = vector.broadcast %cst_95 : f32 to vector<16x128xf32>
    %127 = arith.maximumf %125, %126 : vector<16x128xf32>
    %cst_96 = arith.constant dense<0.000000e+00> : vector<64x128xf32>
    %128 = tpu.matmul %2, %127, %cst_96 {dimension_numbers = #tpu.dot_dimension_numbers<[1], [0], [0], [1], [0, 0, 1, 1], [], []>} : vector<64x16xf32>, vector<16x128xf32>, vector<64x128xf32> -> vector<64x128xf32>
    %129 = vector.broadcast %3 : vector<64x1xf32> to vector<64x128xf32>
    %130 = arith.addf %128, %129 : vector<64x128xf32>
    %cst_97 = arith.constant dense<0.000000e+00> : vector<64x128xf32>
    %131 = tpu.matmul %4, %127, %cst_97 {dimension_numbers = #tpu.dot_dimension_numbers<[1], [0], [0], [1], [0, 0, 1, 1], [], []>} : vector<64x16xf32>, vector<16x128xf32>, vector<64x128xf32> -> vector<64x128xf32>
    %132 = vector.broadcast %5 : vector<64x1xf32> to vector<64x128xf32>
    %133 = arith.addf %131, %132 : vector<64x128xf32>
    %c5_98 = arith.constant 5 : index
    %c0_99 = arith.constant 0 : index
    %c0_100 = arith.constant 0 : index
    %134 = vector.load %arg14[%c5_98, %c0_99, %c0_100] : memref<7x64x128xf32, #tpu.memory_space<vmem>>, vector<1x64x128xf32>
    %135 = vector.shape_cast %134 : vector<1x64x128xf32> to vector<64x128xf32>
    %136 = vector.shape_cast %130 : vector<64x128xf32> to vector<1x64x128xf32>
    tpu.vector_store %arg14[%c5_98, %c0_99, %c0_100], %136 {strides = array<i32>} : memref<7x64x128xf32, #tpu.memory_space<vmem>>, vector<1x64x128xf32>,
    %c1_101 = arith.constant 1 : index
    %c0_102 = arith.constant 0 : index
    %c0_103 = arith.constant 0 : index
    %137 = vector.load %arg15[%c1_101, %c0_102, %c0_103] : memref<7x64x128xf32, #tpu.memory_space<vmem>>, vector<1x64x128xf32>
    %138 = vector.shape_cast %137 : vector<1x64x128xf32> to vector<64x128xf32>
    %139 = vector.shape_cast %133 : vector<64x128xf32> to vector<1x64x128xf32>
    tpu.vector_store %arg15[%c1_101, %c0_102, %c0_103], %139 {strides = array<i32>} : memref<7x64x128xf32, #tpu.memory_space<vmem>>, vector<1x64x128xf32>,
    %c7 = arith.constant 7 : index
    %c0_104 = arith.constant 0 : index
    %c0_105 = arith.constant 0 : index
    %140 = vector.load %arg1[%c7, %c0_104, %c0_105] : memref<8x32x128xf32, #tpu.memory_space<vmem>>, vector<1x32x128xf32>
    %141 = vector.shape_cast %140 : vector<1x32x128xf32> to vector<32x128xf32>
    %c6_106 = arith.constant 6 : index
    %c0_107 = arith.constant 0 : index
    %c0_108 = arith.constant 0 : index
    %142 = vector.load %arg1[%c6_106, %c0_107, %c0_108] : memref<8x32x128xf32, #tpu.memory_space<vmem>>, vector<1x32x128xf32>
    %143 = vector.shape_cast %142 : vector<1x32x128xf32> to vector<32x128xf32>
    %144 = arith.subf %141, %143 : vector<32x128xf32>
    %cst_109 = arith.constant dense<0.000000e+00> : vector<16x128xf32>
    %145 = tpu.matmul %0, %144, %cst_109 {dimension_numbers = #tpu.dot_dimension_numbers<[1], [0], [0], [1], [0, 0, 1, 1], [], []>} : vector<16x32xf32>, vector<32x128xf32>, vector<16x128xf32> -> vector<16x128xf32>
    %146 = vector.broadcast %1 : vector<16x1xf32> to vector<16x128xf32>
    %147 = arith.addf %145, %146 : vector<16x128xf32>
    %cst_110 = arith.constant 0.000000e+00 : f32
    %148 = vector.broadcast %cst_110 : f32 to vector<16x128xf32>
    %149 = arith.maximumf %147, %148 : vector<16x128xf32>
    %cst_111 = arith.constant dense<0.000000e+00> : vector<64x128xf32>
    %150 = tpu.matmul %2, %149, %cst_111 {dimension_numbers = #tpu.dot_dimension_numbers<[1], [0], [0], [1], [0, 0, 1, 1], [], []>} : vector<64x16xf32>, vector<16x128xf32>, vector<64x128xf32> -> vector<64x128xf32>
    %151 = vector.broadcast %3 : vector<64x1xf32> to vector<64x128xf32>
    %152 = arith.addf %150, %151 : vector<64x128xf32>
    %cst_112 = arith.constant dense<0.000000e+00> : vector<64x128xf32>
    %153 = tpu.matmul %4, %149, %cst_112 {dimension_numbers = #tpu.dot_dimension_numbers<[1], [0], [0], [1], [0, 0, 1, 1], [], []>} : vector<64x16xf32>, vector<16x128xf32>, vector<64x128xf32> -> vector<64x128xf32>
    %154 = vector.broadcast %5 : vector<64x1xf32> to vector<64x128xf32>
    %155 = arith.addf %153, %154 : vector<64x128xf32>
    %c6_113 = arith.constant 6 : index
    %c0_114 = arith.constant 0 : index
    %c0_115 = arith.constant 0 : index
    %156 = vector.load %arg14[%c6_113, %c0_114, %c0_115] : memref<7x64x128xf32, #tpu.memory_space<vmem>>, vector<1x64x128xf32>
    %157 = vector.shape_cast %156 : vector<1x64x128xf32> to vector<64x128xf32>
    %158 = vector.shape_cast %152 : vector<64x128xf32> to vector<1x64x128xf32>
    tpu.vector_store %arg14[%c6_113, %c0_114, %c0_115], %158 {strides = array<i32>} : memref<7x64x128xf32, #tpu.memory_space<vmem>>, vector<1x64x128xf32>,
    %c0_116 = arith.constant 0 : index
    %c0_117 = arith.constant 0 : index
    %c0_118 = arith.constant 0 : index
    %159 = vector.load %arg15[%c0_116, %c0_117, %c0_118] : memref<7x64x128xf32, #tpu.memory_space<vmem>>, vector<1x64x128xf32>
    %160 = vector.shape_cast %159 : vector<1x64x128xf32> to vector<64x128xf32>
    %161 = vector.shape_cast %155 : vector<64x128xf32> to vector<1x64x128xf32>
    tpu.vector_store %arg15[%c0_116, %c0_117, %c0_118], %161 {strides = array<i32>} : memref<7x64x128xf32, #tpu.memory_space<vmem>>, vector<1x64x128xf32>,
    %cst_119 = arith.constant 0.000000e+00 : f32
    %162 = vector.broadcast %cst_119 : f32 to vector<16x128xf32>
    %cst_120 = arith.constant 0.000000e+00 : f32
    %163 = vector.broadcast %cst_120 : f32 to vector<16x128xf32>
    %cst_121 = arith.constant 0.000000e+00 : f32
    %164 = vector.broadcast %cst_121 : f32 to vector<16x128xf32>
    %cst_122 = arith.constant 0.000000e+00 : f32
    %165 = vector.broadcast %cst_122 : f32 to vector<16x128xf32>
    %cst_123 = arith.constant 0.000000e+00 : f32
    %166 = vector.broadcast %cst_123 : f32 to vector<16x128xf32>
    %cst_124 = arith.constant 0.000000e+00 : f32
    %167 = vector.broadcast %cst_124 : f32 to vector<16x128xf32>
    %c0_125 = arith.constant 0 : index
    %c0_126 = arith.constant 0 : index
    %c0_127 = arith.constant 0 : index
    %168 = vector.load %arg14[%c0_125, %c0_126, %c0_127] : memref<7x64x128xf32, #tpu.memory_space<vmem>>, vector<1x64x128xf32>
    %169 = vector.shape_cast %168 : vector<1x64x128xf32> to vector<64x128xf32>
    %cst_128 = arith.constant dense<0.000000e+00> : vector<64x128xf32>
    %170 = tpu.matmul %6, %162, %cst_128 {dimension_numbers = #tpu.dot_dimension_numbers<[1], [0], [0], [1], [0, 0, 1, 1], [], []>} : vector<64x16xf32>, vector<16x128xf32>, vector<64x128xf32> -> vector<64x128xf32>
    %171 = arith.addf %169, %170 : vector<64x128xf32>
    %c0_129 = arith.constant 0 : index
    %c0_130 = arith.constant 0 : index
    %c0_131 = arith.constant 0 : index
    %172 = vector.load %arg15[%c0_129, %c0_130, %c0_131] : memref<7x64x128xf32, #tpu.memory_space<vmem>>, vector<1x64x128xf32>
    %173 = vector.shape_cast %172 : vector<1x64x128xf32> to vector<64x128xf32>
    %cst_132 = arith.constant dense<0.000000e+00> : vector<64x128xf32>
    %174 = tpu.matmul %7, %164, %cst_132 {dimension_numbers = #tpu.dot_dimension_numbers<[1], [0], [0], [1], [0, 0, 1, 1], [], []>} : vector<64x16xf32>, vector<16x128xf32>, vector<64x128xf32> -> vector<64x128xf32>
    %175 = arith.addf %173, %174 : vector<64x128xf32>
    %176 = vector.extract_strided_slice %171 {offsets = [0, 0], sizes = [16, 128], strides = [1, 1]} : vector<64x128xf32> to vector<16x128xf32>
    %cst_133 = arith.constant 5.000000e-01 : f32
    %177 = vector.broadcast %cst_133 : f32 to vector<16x128xf32>
    %178 = arith.mulf %177, %176 : vector<16x128xf32>
    %179 = math.tanh %178 : vector<16x128xf32>
    %cst_134 = arith.constant 1.000000e+00 : f32
    %180 = vector.broadcast %cst_134 : f32 to vector<16x128xf32>
    %181 = arith.addf %179, %180 : vector<16x128xf32>
    %cst_135 = arith.constant 5.000000e-01 : f32
    %182 = vector.broadcast %cst_135 : f32 to vector<16x128xf32>
    %183 = arith.mulf %182, %181 : vector<16x128xf32>
    %184 = vector.extract_strided_slice %171 {offsets = [16, 0], sizes = [16, 128], strides = [1, 1]} : vector<64x128xf32> to vector<16x128xf32>
    %cst_136 = arith.constant 5.000000e-01 : f32
    %185 = vector.broadcast %cst_136 : f32 to vector<16x128xf32>
    %186 = arith.mulf %185, %184 : vector<16x128xf32>
    %187 = math.tanh %186 : vector<16x128xf32>
    %cst_137 = arith.constant 1.000000e+00 : f32
    %188 = vector.broadcast %cst_137 : f32 to vector<16x128xf32>
    %189 = arith.addf %187, %188 : vector<16x128xf32>
    %cst_138 = arith.constant 5.000000e-01 : f32
    %190 = vector.broadcast %cst_138 : f32 to vector<16x128xf32>
    %191 = arith.mulf %190, %189 : vector<16x128xf32>
    %192 = vector.extract_strided_slice %171 {offsets = [32, 0], sizes = [16, 128], strides = [1, 1]} : vector<64x128xf32> to vector<16x128xf32>
    %193 = math.tanh %192 : vector<16x128xf32>
    %194 = vector.extract_strided_slice %171 {offsets = [48, 0], sizes = [16, 128], strides = [1, 1]} : vector<64x128xf32> to vector<16x128xf32>
    %cst_139 = arith.constant 5.000000e-01 : f32
    %195 = vector.broadcast %cst_139 : f32 to vector<16x128xf32>
    %196 = arith.mulf %195, %194 : vector<16x128xf32>
    %197 = math.tanh %196 : vector<16x128xf32>
    %cst_140 = arith.constant 1.000000e+00 : f32
    %198 = vector.broadcast %cst_140 : f32 to vector<16x128xf32>
    %199 = arith.addf %197, %198 : vector<16x128xf32>
    %cst_141 = arith.constant 5.000000e-01 : f32
    %200 = vector.broadcast %cst_141 : f32 to vector<16x128xf32>
    %201 = arith.mulf %200, %199 : vector<16x128xf32>
    %202 = arith.mulf %191, %163 : vector<16x128xf32>
    %203 = arith.mulf %183, %193 : vector<16x128xf32>
    %204 = arith.addf %202, %203 : vector<16x128xf32>
    %205 = math.tanh %204 : vector<16x128xf32>
    %206 = arith.mulf %201, %205 : vector<16x128xf32>
    %207 = arith.addf %166, %206 : vector<16x128xf32>
    %208 = vector.extract_strided_slice %175 {offsets = [0, 0], sizes = [16, 128], strides = [1, 1]} : vector<64x128xf32> to vector<16x128xf32>
    %cst_142 = arith.constant 5.000000e-01 : f32
    %209 = vector.broadcast %cst_142 : f32 to vector<16x128xf32>
    %210 = arith.mulf %209, %208 : vector<16x128xf32>
    %211 = math.tanh %210 : vector<16x128xf32>
    %cst_143 = arith.constant 1.000000e+00 : f32
    %212 = vector.broadcast %cst_143 : f32 to vector<16x128xf32>
    %213 = arith.addf %211, %212 : vector<16x128xf32>
    %cst_144 = arith.constant 5.000000e-01 : f32
    %214 = vector.broadcast %cst_144 : f32 to vector<16x128xf32>
    %215 = arith.mulf %214, %213 : vector<16x128xf32>
    %216 = vector.extract_strided_slice %175 {offsets = [16, 0], sizes = [16, 128], strides = [1, 1]} : vector<64x128xf32> to vector<16x128xf32>
    %cst_145 = arith.constant 5.000000e-01 : f32
    %217 = vector.broadcast %cst_145 : f32 to vector<16x128xf32>
    %218 = arith.mulf %217, %216 : vector<16x128xf32>
    %219 = math.tanh %218 : vector<16x128xf32>
    %cst_146 = arith.constant 1.000000e+00 : f32
    %220 = vector.broadcast %cst_146 : f32 to vector<16x128xf32>
    %221 = arith.addf %219, %220 : vector<16x128xf32>
    %cst_147 = arith.constant 5.000000e-01 : f32
    %222 = vector.broadcast %cst_147 : f32 to vector<16x128xf32>
    %223 = arith.mulf %222, %221 : vector<16x128xf32>
    %224 = vector.extract_strided_slice %175 {offsets = [32, 0], sizes = [16, 128], strides = [1, 1]} : vector<64x128xf32> to vector<16x128xf32>
    %225 = math.tanh %224 : vector<16x128xf32>
    %226 = vector.extract_strided_slice %175 {offsets = [48, 0], sizes = [16, 128], strides = [1, 1]} : vector<64x128xf32> to vector<16x128xf32>
    %cst_148 = arith.constant 5.000000e-01 : f32
    %227 = vector.broadcast %cst_148 : f32 to vector<16x128xf32>
    %228 = arith.mulf %227, %226 : vector<16x128xf32>
    %229 = math.tanh %228 : vector<16x128xf32>
    %cst_149 = arith.constant 1.000000e+00 : f32
    %230 = vector.broadcast %cst_149 : f32 to vector<16x128xf32>
    %231 = arith.addf %229, %230 : vector<16x128xf32>
    %cst_150 = arith.constant 5.000000e-01 : f32
    %232 = vector.broadcast %cst_150 : f32 to vector<16x128xf32>
    %233 = arith.mulf %232, %231 : vector<16x128xf32>
    %234 = arith.mulf %223, %165 : vector<16x128xf32>
    %235 = arith.mulf %215, %225 : vector<16x128xf32>
    %236 = arith.addf %234, %235 : vector<16x128xf32>
    %237 = math.tanh %236 : vector<16x128xf32>
    %238 = arith.mulf %233, %237 : vector<16x128xf32>
    %239 = arith.addf %167, %238 : vector<16x128xf32>
    %c1_151 = arith.constant 1 : index
    %c0_152 = arith.constant 0 : index
    %c0_153 = arith.constant 0 : index
    %240 = vector.load %arg14[%c1_151, %c0_152, %c0_153] : memref<7x64x128xf32, #tpu.memory_space<vmem>>, vector<1x64x128xf32>
    %241 = vector.shape_cast %240 : vector<1x64x128xf32> to vector<64x128xf32>
    %cst_154 = arith.constant dense<0.000000e+00> : vector<64x128xf32>
    %242 = tpu.matmul %6, %206, %cst_154 {dimension_numbers = #tpu.dot_dimension_numbers<[1], [0], [0], [1], [0, 0, 1, 1], [], []>} : vector<64x16xf32>, vector<16x128xf32>, vector<64x128xf32> -> vector<64x128xf32>
    %243 = arith.addf %241, %242 : vector<64x128xf32>
    %c1_155 = arith.constant 1 : index
    %c0_156 = arith.constant 0 : index
    %c0_157 = arith.constant 0 : index
    %244 = vector.load %arg15[%c1_155, %c0_156, %c0_157] : memref<7x64x128xf32, #tpu.memory_space<vmem>>, vector<1x64x128xf32>
    %245 = vector.shape_cast %244 : vector<1x64x128xf32> to vector<64x128xf32>
    %cst_158 = arith.constant dense<0.000000e+00> : vector<64x128xf32>
    %246 = tpu.matmul %7, %238, %cst_158 {dimension_numbers = #tpu.dot_dimension_numbers<[1], [0], [0], [1], [0, 0, 1, 1], [], []>} : vector<64x16xf32>, vector<16x128xf32>, vector<64x128xf32> -> vector<64x128xf32>
    %247 = arith.addf %245, %246 : vector<64x128xf32>
    %248 = vector.extract_strided_slice %243 {offsets = [0, 0], sizes = [16, 128], strides = [1, 1]} : vector<64x128xf32> to vector<16x128xf32>
    %cst_159 = arith.constant 5.000000e-01 : f32
    %249 = vector.broadcast %cst_159 : f32 to vector<16x128xf32>
    %250 = arith.mulf %249, %248 : vector<16x128xf32>
    %251 = math.tanh %250 : vector<16x128xf32>
    %cst_160 = arith.constant 1.000000e+00 : f32
    %252 = vector.broadcast %cst_160 : f32 to vector<16x128xf32>
    %253 = arith.addf %251, %252 : vector<16x128xf32>
    %cst_161 = arith.constant 5.000000e-01 : f32
    %254 = vector.broadcast %cst_161 : f32 to vector<16x128xf32>
    %255 = arith.mulf %254, %253 : vector<16x128xf32>
    %256 = vector.extract_strided_slice %243 {offsets = [16, 0], sizes = [16, 128], strides = [1, 1]} : vector<64x128xf32> to vector<16x128xf32>
    %cst_162 = arith.constant 5.000000e-01 : f32
    %257 = vector.broadcast %cst_162 : f32 to vector<16x128xf32>
    %258 = arith.mulf %257, %256 : vector<16x128xf32>
    %259 = math.tanh %258 : vector<16x128xf32>
    %cst_163 = arith.constant 1.000000e+00 : f32
    %260 = vector.broadcast %cst_163 : f32 to vector<16x128xf32>
    %261 = arith.addf %259, %260 : vector<16x128xf32>
    %cst_164 = arith.constant 5.000000e-01 : f32
    %262 = vector.broadcast %cst_164 : f32 to vector<16x128xf32>
    %263 = arith.mulf %262, %261 : vector<16x128xf32>
    %264 = vector.extract_strided_slice %243 {offsets = [32, 0], sizes = [16, 128], strides = [1, 1]} : vector<64x128xf32> to vector<16x128xf32>
    %265 = math.tanh %264 : vector<16x128xf32>
    %266 = vector.extract_strided_slice %243 {offsets = [48, 0], sizes = [16, 128], strides = [1, 1]} : vector<64x128xf32> to vector<16x128xf32>
    %cst_165 = arith.constant 5.000000e-01 : f32
    %267 = vector.broadcast %cst_165 : f32 to vector<16x128xf32>
    %268 = arith.mulf %267, %266 : vector<16x128xf32>
    %269 = math.tanh %268 : vector<16x128xf32>
    %cst_166 = arith.constant 1.000000e+00 : f32
    %270 = vector.broadcast %cst_166 : f32 to vector<16x128xf32>
    %271 = arith.addf %269, %270 : vector<16x128xf32>
    %cst_167 = arith.constant 5.000000e-01 : f32
    %272 = vector.broadcast %cst_167 : f32 to vector<16x128xf32>
    %273 = arith.mulf %272, %271 : vector<16x128xf32>
    %274 = arith.mulf %263, %204 : vector<16x128xf32>
    %275 = arith.mulf %255, %265 : vector<16x128xf32>
    %276 = arith.addf %274, %275 : vector<16x128xf32>
    %277 = math.tanh %276 : vector<16x128xf32>
    %278 = arith.mulf %273, %277 : vector<16x128xf32>
    %279 = arith.addf %207, %278 : vector<16x128xf32>
    %280 = vector.extract_strided_slice %247 {offsets = [0, 0], sizes = [16, 128], strides = [1, 1]} : vector<64x128xf32> to vector<16x128xf32>
    %cst_168 = arith.constant 5.000000e-01 : f32
    %281 = vector.broadcast %cst_168 : f32 to vector<16x128xf32>
    %282 = arith.mulf %281, %280 : vector<16x128xf32>
    %283 = math.tanh %282 : vector<16x128xf32>
    %cst_169 = arith.constant 1.000000e+00 : f32
    %284 = vector.broadcast %cst_169 : f32 to vector<16x128xf32>
    %285 = arith.addf %283, %284 : vector<16x128xf32>
    %cst_170 = arith.constant 5.000000e-01 : f32
    %286 = vector.broadcast %cst_170 : f32 to vector<16x128xf32>
    %287 = arith.mulf %286, %285 : vector<16x128xf32>
    %288 = vector.extract_strided_slice %247 {offsets = [16, 0], sizes = [16, 128], strides = [1, 1]} : vector<64x128xf32> to vector<16x128xf32>
    %cst_171 = arith.constant 5.000000e-01 : f32
    %289 = vector.broadcast %cst_171 : f32 to vector<16x128xf32>
    %290 = arith.mulf %289, %288 : vector<16x128xf32>
    %291 = math.tanh %290 : vector<16x128xf32>
    %cst_172 = arith.constant 1.000000e+00 : f32
    %292 = vector.broadcast %cst_172 : f32 to vector<16x128xf32>
    %293 = arith.addf %291, %292 : vector<16x128xf32>
    %cst_173 = arith.constant 5.000000e-01 : f32
    %294 = vector.broadcast %cst_173 : f32 to vector<16x128xf32>
    %295 = arith.mulf %294, %293 : vector<16x128xf32>
    %296 = vector.extract_strided_slice %247 {offsets = [32, 0], sizes = [16, 128], strides = [1, 1]} : vector<64x128xf32> to vector<16x128xf32>
    %297 = math.tanh %296 : vector<16x128xf32>
    %298 = vector.extract_strided_slice %247 {offsets = [48, 0], sizes = [16, 128], strides = [1, 1]} : vector<64x128xf32> to vector<16x128xf32>
    %cst_174 = arith.constant 5.000000e-01 : f32
    %299 = vector.broadcast %cst_174 : f32 to vector<16x128xf32>
    %300 = arith.mulf %299, %298 : vector<16x128xf32>
    %301 = math.tanh %300 : vector<16x128xf32>
    %cst_175 = arith.constant 1.000000e+00 : f32
    %302 = vector.broadcast %cst_175 : f32 to vector<16x128xf32>
    %303 = arith.addf %301, %302 : vector<16x128xf32>
    %cst_176 = arith.constant 5.000000e-01 : f32
    %304 = vector.broadcast %cst_176 : f32 to vector<16x128xf32>
    %305 = arith.mulf %304, %303 : vector<16x128xf32>
    %306 = arith.mulf %295, %236 : vector<16x128xf32>
    %307 = arith.mulf %287, %297 : vector<16x128xf32>
    %308 = arith.addf %306, %307 : vector<16x128xf32>
    %309 = math.tanh %308 : vector<16x128xf32>
    %310 = arith.mulf %305, %309 : vector<16x128xf32>
    %311 = arith.addf %239, %310 : vector<16x128xf32>
    %c2_177 = arith.constant 2 : index
    %c0_178 = arith.constant 0 : index
    %c0_179 = arith.constant 0 : index
    %312 = vector.load %arg14[%c2_177, %c0_178, %c0_179] : memref<7x64x128xf32, #tpu.memory_space<vmem>>, vector<1x64x128xf32>
    %313 = vector.shape_cast %312 : vector<1x64x128xf32> to vector<64x128xf32>
    %cst_180 = arith.constant dense<0.000000e+00> : vector<64x128xf32>
    %314 = tpu.matmul %6, %278, %cst_180 {dimension_numbers = #tpu.dot_dimension_numbers<[1], [0], [0], [1], [0, 0, 1, 1], [], []>} : vector<64x16xf32>, vector<16x128xf32>, vector<64x128xf32> -> vector<64x128xf32>
    %315 = arith.addf %313, %314 : vector<64x128xf32>
    %c2_181 = arith.constant 2 : index
    %c0_182 = arith.constant 0 : index
    %c0_183 = arith.constant 0 : index
    %316 = vector.load %arg15[%c2_181, %c0_182, %c0_183] : memref<7x64x128xf32, #tpu.memory_space<vmem>>, vector<1x64x128xf32>
    %317 = vector.shape_cast %316 : vector<1x64x128xf32> to vector<64x128xf32>
    %cst_184 = arith.constant dense<0.000000e+00> : vector<64x128xf32>
    %318 = tpu.matmul %7, %310, %cst_184 {dimension_numbers = #tpu.dot_dimension_numbers<[1], [0], [0], [1], [0, 0, 1, 1], [], []>} : vector<64x16xf32>, vector<16x128xf32>, vector<64x128xf32> -> vector<64x128xf32>
    %319 = arith.addf %317, %318 : vector<64x128xf32>
    %320 = vector.extract_strided_slice %315 {offsets = [0, 0], sizes = [16, 128], strides = [1, 1]} : vector<64x128xf32> to vector<16x128xf32>
    %cst_185 = arith.constant 5.000000e-01 : f32
    %321 = vector.broadcast %cst_185 : f32 to vector<16x128xf32>
    %322 = arith.mulf %321, %320 : vector<16x128xf32>
    %323 = math.tanh %322 : vector<16x128xf32>
    %cst_186 = arith.constant 1.000000e+00 : f32
    %324 = vector.broadcast %cst_186 : f32 to vector<16x128xf32>
    %325 = arith.addf %323, %324 : vector<16x128xf32>
    %cst_187 = arith.constant 5.000000e-01 : f32
    %326 = vector.broadcast %cst_187 : f32 to vector<16x128xf32>
    %327 = arith.mulf %326, %325 : vector<16x128xf32>
    %328 = vector.extract_strided_slice %315 {offsets = [16, 0], sizes = [16, 128], strides = [1, 1]} : vector<64x128xf32> to vector<16x128xf32>
    %cst_188 = arith.constant 5.000000e-01 : f32
    %329 = vector.broadcast %cst_188 : f32 to vector<16x128xf32>
    %330 = arith.mulf %329, %328 : vector<16x128xf32>
    %331 = math.tanh %330 : vector<16x128xf32>
    %cst_189 = arith.constant 1.000000e+00 : f32
    %332 = vector.broadcast %cst_189 : f32 to vector<16x128xf32>
    %333 = arith.addf %331, %332 : vector<16x128xf32>
    %cst_190 = arith.constant 5.000000e-01 : f32
    %334 = vector.broadcast %cst_190 : f32 to vector<16x128xf32>
    %335 = arith.mulf %334, %333 : vector<16x128xf32>
    %336 = vector.extract_strided_slice %315 {offsets = [32, 0], sizes = [16, 128], strides = [1, 1]} : vector<64x128xf32> to vector<16x128xf32>
    %337 = math.tanh %336 : vector<16x128xf32>
    %338 = vector.extract_strided_slice %315 {offsets = [48, 0], sizes = [16, 128], strides = [1, 1]} : vector<64x128xf32> to vector<16x128xf32>
    %cst_191 = arith.constant 5.000000e-01 : f32
    %339 = vector.broadcast %cst_191 : f32 to vector<16x128xf32>
    %340 = arith.mulf %339, %338 : vector<16x128xf32>
    %341 = math.tanh %340 : vector<16x128xf32>
    %cst_192 = arith.constant 1.000000e+00 : f32
    %342 = vector.broadcast %cst_192 : f32 to vector<16x128xf32>
    %343 = arith.addf %341, %342 : vector<16x128xf32>
    %cst_193 = arith.constant 5.000000e-01 : f32
    %344 = vector.broadcast %cst_193 : f32 to vector<16x128xf32>
    %345 = arith.mulf %344, %343 : vector<16x128xf32>
    %346 = arith.mulf %335, %276 : vector<16x128xf32>
    %347 = arith.mulf %327, %337 : vector<16x128xf32>
    %348 = arith.addf %346, %347 : vector<16x128xf32>
    %349 = math.tanh %348 : vector<16x128xf32>
    %350 = arith.mulf %345, %349 : vector<16x128xf32>
    %351 = arith.addf %279, %350 : vector<16x128xf32>
    %352 = vector.extract_strided_slice %319 {offsets = [0, 0], sizes = [16, 128], strides = [1, 1]} : vector<64x128xf32> to vector<16x128xf32>
    %cst_194 = arith.constant 5.000000e-01 : f32
    %353 = vector.broadcast %cst_194 : f32 to vector<16x128xf32>
    %354 = arith.mulf %353, %352 : vector<16x128xf32>
    %355 = math.tanh %354 : vector<16x128xf32>
    %cst_195 = arith.constant 1.000000e+00 : f32
    %356 = vector.broadcast %cst_195 : f32 to vector<16x128xf32>
    %357 = arith.addf %355, %356 : vector<16x128xf32>
    %cst_196 = arith.constant 5.000000e-01 : f32
    %358 = vector.broadcast %cst_196 : f32 to vector<16x128xf32>
    %359 = arith.mulf %358, %357 : vector<16x128xf32>
    %360 = vector.extract_strided_slice %319 {offsets = [16, 0], sizes = [16, 128], strides = [1, 1]} : vector<64x128xf32> to vector<16x128xf32>
    %cst_197 = arith.constant 5.000000e-01 : f32
    %361 = vector.broadcast %cst_197 : f32 to vector<16x128xf32>
    %362 = arith.mulf %361, %360 : vector<16x128xf32>
    %363 = math.tanh %362 : vector<16x128xf32>
    %cst_198 = arith.constant 1.000000e+00 : f32
    %364 = vector.broadcast %cst_198 : f32 to vector<16x128xf32>
    %365 = arith.addf %363, %364 : vector<16x128xf32>
    %cst_199 = arith.constant 5.000000e-01 : f32
    %366 = vector.broadcast %cst_199 : f32 to vector<16x128xf32>
    %367 = arith.mulf %366, %365 : vector<16x128xf32>
    %368 = vector.extract_strided_slice %319 {offsets = [32, 0], sizes = [16, 128], strides = [1, 1]} : vector<64x128xf32> to vector<16x128xf32>
    %369 = math.tanh %368 : vector<16x128xf32>
    %370 = vector.extract_strided_slice %319 {offsets = [48, 0], sizes = [16, 128], strides = [1, 1]} : vector<64x128xf32> to vector<16x128xf32>
    %cst_200 = arith.constant 5.000000e-01 : f32
    %371 = vector.broadcast %cst_200 : f32 to vector<16x128xf32>
    %372 = arith.mulf %371, %370 : vector<16x128xf32>
    %373 = math.tanh %372 : vector<16x128xf32>
    %cst_201 = arith.constant 1.000000e+00 : f32
    %374 = vector.broadcast %cst_201 : f32 to vector<16x128xf32>
    %375 = arith.addf %373, %374 : vector<16x128xf32>
    %cst_202 = arith.constant 5.000000e-01 : f32
    %376 = vector.broadcast %cst_202 : f32 to vector<16x128xf32>
    %377 = arith.mulf %376, %375 : vector<16x128xf32>
    %378 = arith.mulf %367, %308 : vector<16x128xf32>
    %379 = arith.mulf %359, %369 : vector<16x128xf32>
    %380 = arith.addf %378, %379 : vector<16x128xf32>
    %381 = math.tanh %380 : vector<16x128xf32>
    %382 = arith.mulf %377, %381 : vector<16x128xf32>
    %383 = arith.addf %311, %382 : vector<16x128xf32>
    %c3_203 = arith.constant 3 : index
    %c0_204 = arith.constant 0 : index
    %c0_205 = arith.constant 0 : index
    %384 = vector.load %arg14[%c3_203, %c0_204, %c0_205] : memref<7x64x128xf32, #tpu.memory_space<vmem>>, vector<1x64x128xf32>
    %385 = vector.shape_cast %384 : vector<1x64x128xf32> to vector<64x128xf32>
    %cst_206 = arith.constant dense<0.000000e+00> : vector<64x128xf32>
    %386 = tpu.matmul %6, %350, %cst_206 {dimension_numbers = #tpu.dot_dimension_numbers<[1], [0], [0], [1], [0, 0, 1, 1], [], []>} : vector<64x16xf32>, vector<16x128xf32>, vector<64x128xf32> -> vector<64x128xf32>
    %387 = arith.addf %385, %386 : vector<64x128xf32>
    %c3_207 = arith.constant 3 : index
    %c0_208 = arith.constant 0 : index
    %c0_209 = arith.constant 0 : index
    %388 = vector.load %arg15[%c3_207, %c0_208, %c0_209] : memref<7x64x128xf32, #tpu.memory_space<vmem>>, vector<1x64x128xf32>
    %389 = vector.shape_cast %388 : vector<1x64x128xf32> to vector<64x128xf32>
    %cst_210 = arith.constant dense<0.000000e+00> : vector<64x128xf32>
    %390 = tpu.matmul %7, %382, %cst_210 {dimension_numbers = #tpu.dot_dimension_numbers<[1], [0], [0], [1], [0, 0, 1, 1], [], []>} : vector<64x16xf32>, vector<16x128xf32>, vector<64x128xf32> -> vector<64x128xf32>
    %391 = arith.addf %389, %390 : vector<64x128xf32>
    %392 = vector.extract_strided_slice %387 {offsets = [0, 0], sizes = [16, 128], strides = [1, 1]} : vector<64x128xf32> to vector<16x128xf32>
    %cst_211 = arith.constant 5.000000e-01 : f32
    %393 = vector.broadcast %cst_211 : f32 to vector<16x128xf32>
    %394 = arith.mulf %393, %392 : vector<16x128xf32>
    %395 = math.tanh %394 : vector<16x128xf32>
    %cst_212 = arith.constant 1.000000e+00 : f32
    %396 = vector.broadcast %cst_212 : f32 to vector<16x128xf32>
    %397 = arith.addf %395, %396 : vector<16x128xf32>
    %cst_213 = arith.constant 5.000000e-01 : f32
    %398 = vector.broadcast %cst_213 : f32 to vector<16x128xf32>
    %399 = arith.mulf %398, %397 : vector<16x128xf32>
    %400 = vector.extract_strided_slice %387 {offsets = [16, 0], sizes = [16, 128], strides = [1, 1]} : vector<64x128xf32> to vector<16x128xf32>
    %cst_214 = arith.constant 5.000000e-01 : f32
    %401 = vector.broadcast %cst_214 : f32 to vector<16x128xf32>
    %402 = arith.mulf %401, %400 : vector<16x128xf32>
    %403 = math.tanh %402 : vector<16x128xf32>
    %cst_215 = arith.constant 1.000000e+00 : f32
    %404 = vector.broadcast %cst_215 : f32 to vector<16x128xf32>
    %405 = arith.addf %403, %404 : vector<16x128xf32>
    %cst_216 = arith.constant 5.000000e-01 : f32
    %406 = vector.broadcast %cst_216 : f32 to vector<16x128xf32>
    %407 = arith.mulf %406, %405 : vector<16x128xf32>
    %408 = vector.extract_strided_slice %387 {offsets = [32, 0], sizes = [16, 128], strides = [1, 1]} : vector<64x128xf32> to vector<16x128xf32>
    %409 = math.tanh %408 : vector<16x128xf32>
    %410 = vector.extract_strided_slice %387 {offsets = [48, 0], sizes = [16, 128], strides = [1, 1]} : vector<64x128xf32> to vector<16x128xf32>
    %cst_217 = arith.constant 5.000000e-01 : f32
    %411 = vector.broadcast %cst_217 : f32 to vector<16x128xf32>
    %412 = arith.mulf %411, %410 : vector<16x128xf32>
    %413 = math.tanh %412 : vector<16x128xf32>
    %cst_218 = arith.constant 1.000000e+00 : f32
    %414 = vector.broadcast %cst_218 : f32 to vector<16x128xf32>
    %415 = arith.addf %413, %414 : vector<16x128xf32>
    %cst_219 = arith.constant 5.000000e-01 : f32
    %416 = vector.broadcast %cst_219 : f32 to vector<16x128xf32>
    %417 = arith.mulf %416, %415 : vector<16x128xf32>
    %418 = arith.mulf %407, %348 : vector<16x128xf32>
    %419 = arith.mulf %399, %409 : vector<16x128xf32>
    %420 = arith.addf %418, %419 : vector<16x128xf32>
    %421 = math.tanh %420 : vector<16x128xf32>
    %422 = arith.mulf %417, %421 : vector<16x128xf32>
    %423 = arith.addf %351, %422 : vector<16x128xf32>
    %424 = vector.extract_strided_slice %391 {offsets = [0, 0], sizes = [16, 128], strides = [1, 1]} : vector<64x128xf32> to vector<16x128xf32>
    %cst_220 = arith.constant 5.000000e-01 : f32
    %425 = vector.broadcast %cst_220 : f32 to vector<16x128xf32>
    %426 = arith.mulf %425, %424 : vector<16x128xf32>
    %427 = math.tanh %426 : vector<16x128xf32>
    %cst_221 = arith.constant 1.000000e+00 : f32
    %428 = vector.broadcast %cst_221 : f32 to vector<16x128xf32>
    %429 = arith.addf %427, %428 : vector<16x128xf32>
    %cst_222 = arith.constant 5.000000e-01 : f32
    %430 = vector.broadcast %cst_222 : f32 to vector<16x128xf32>
    %431 = arith.mulf %430, %429 : vector<16x128xf32>
    %432 = vector.extract_strided_slice %391 {offsets = [16, 0], sizes = [16, 128], strides = [1, 1]} : vector<64x128xf32> to vector<16x128xf32>
    %cst_223 = arith.constant 5.000000e-01 : f32
    %433 = vector.broadcast %cst_223 : f32 to vector<16x128xf32>
    %434 = arith.mulf %433, %432 : vector<16x128xf32>
    %435 = math.tanh %434 : vector<16x128xf32>
    %cst_224 = arith.constant 1.000000e+00 : f32
    %436 = vector.broadcast %cst_224 : f32 to vector<16x128xf32>
    %437 = arith.addf %435, %436 : vector<16x128xf32>
    %cst_225 = arith.constant 5.000000e-01 : f32
    %438 = vector.broadcast %cst_225 : f32 to vector<16x128xf32>
    %439 = arith.mulf %438, %437 : vector<16x128xf32>
    %440 = vector.extract_strided_slice %391 {offsets = [32, 0], sizes = [16, 128], strides = [1, 1]} : vector<64x128xf32> to vector<16x128xf32>
    %441 = math.tanh %440 : vector<16x128xf32>
    %442 = vector.extract_strided_slice %391 {offsets = [48, 0], sizes = [16, 128], strides = [1, 1]} : vector<64x128xf32> to vector<16x128xf32>
    %cst_226 = arith.constant 5.000000e-01 : f32
    %443 = vector.broadcast %cst_226 : f32 to vector<16x128xf32>
    %444 = arith.mulf %443, %442 : vector<16x128xf32>
    %445 = math.tanh %444 : vector<16x128xf32>
    %cst_227 = arith.constant 1.000000e+00 : f32
    %446 = vector.broadcast %cst_227 : f32 to vector<16x128xf32>
    %447 = arith.addf %445, %446 : vector<16x128xf32>
    %cst_228 = arith.constant 5.000000e-01 : f32
    %448 = vector.broadcast %cst_228 : f32 to vector<16x128xf32>
    %449 = arith.mulf %448, %447 : vector<16x128xf32>
    %450 = arith.mulf %439, %380 : vector<16x128xf32>
    %451 = arith.mulf %431, %441 : vector<16x128xf32>
    %452 = arith.addf %450, %451 : vector<16x128xf32>
    %453 = math.tanh %452 : vector<16x128xf32>
    %454 = arith.mulf %449, %453 : vector<16x128xf32>
    %455 = arith.addf %383, %454 : vector<16x128xf32>
    %c4_229 = arith.constant 4 : index
    %c0_230 = arith.constant 0 : index
    %c0_231 = arith.constant 0 : index
    %456 = vector.load %arg14[%c4_229, %c0_230, %c0_231] : memref<7x64x128xf32, #tpu.memory_space<vmem>>, vector<1x64x128xf32>
    %457 = vector.shape_cast %456 : vector<1x64x128xf32> to vector<64x128xf32>
    %cst_232 = arith.constant dense<0.000000e+00> : vector<64x128xf32>
    %458 = tpu.matmul %6, %422, %cst_232 {dimension_numbers = #tpu.dot_dimension_numbers<[1], [0], [0], [1], [0, 0, 1, 1], [], []>} : vector<64x16xf32>, vector<16x128xf32>, vector<64x128xf32> -> vector<64x128xf32>
    %459 = arith.addf %457, %458 : vector<64x128xf32>
    %c4_233 = arith.constant 4 : index
    %c0_234 = arith.constant 0 : index
    %c0_235 = arith.constant 0 : index
    %460 = vector.load %arg15[%c4_233, %c0_234, %c0_235] : memref<7x64x128xf32, #tpu.memory_space<vmem>>, vector<1x64x128xf32>
    %461 = vector.shape_cast %460 : vector<1x64x128xf32> to vector<64x128xf32>
    %cst_236 = arith.constant dense<0.000000e+00> : vector<64x128xf32>
    %462 = tpu.matmul %7, %454, %cst_236 {dimension_numbers = #tpu.dot_dimension_numbers<[1], [0], [0], [1], [0, 0, 1, 1], [], []>} : vector<64x16xf32>, vector<16x128xf32>, vector<64x128xf32> -> vector<64x128xf32>
    %463 = arith.addf %461, %462 : vector<64x128xf32>
    %464 = vector.extract_strided_slice %459 {offsets = [0, 0], sizes = [16, 128], strides = [1, 1]} : vector<64x128xf32> to vector<16x128xf32>
    %cst_237 = arith.constant 5.000000e-01 : f32
    %465 = vector.broadcast %cst_237 : f32 to vector<16x128xf32>
    %466 = arith.mulf %465, %464 : vector<16x128xf32>
    %467 = math.tanh %466 : vector<16x128xf32>
    %cst_238 = arith.constant 1.000000e+00 : f32
    %468 = vector.broadcast %cst_238 : f32 to vector<16x128xf32>
    %469 = arith.addf %467, %468 : vector<16x128xf32>
    %cst_239 = arith.constant 5.000000e-01 : f32
    %470 = vector.broadcast %cst_239 : f32 to vector<16x128xf32>
    %471 = arith.mulf %470, %469 : vector<16x128xf32>
    %472 = vector.extract_strided_slice %459 {offsets = [16, 0], sizes = [16, 128], strides = [1, 1]} : vector<64x128xf32> to vector<16x128xf32>
    %cst_240 = arith.constant 5.000000e-01 : f32
    %473 = vector.broadcast %cst_240 : f32 to vector<16x128xf32>
    %474 = arith.mulf %473, %472 : vector<16x128xf32>
    %475 = math.tanh %474 : vector<16x128xf32>
    %cst_241 = arith.constant 1.000000e+00 : f32
    %476 = vector.broadcast %cst_241 : f32 to vector<16x128xf32>
    %477 = arith.addf %475, %476 : vector<16x128xf32>
    %cst_242 = arith.constant 5.000000e-01 : f32
    %478 = vector.broadcast %cst_242 : f32 to vector<16x128xf32>
    %479 = arith.mulf %478, %477 : vector<16x128xf32>
    %480 = vector.extract_strided_slice %459 {offsets = [32, 0], sizes = [16, 128], strides = [1, 1]} : vector<64x128xf32> to vector<16x128xf32>
    %481 = math.tanh %480 : vector<16x128xf32>
    %482 = vector.extract_strided_slice %459 {offsets = [48, 0], sizes = [16, 128], strides = [1, 1]} : vector<64x128xf32> to vector<16x128xf32>
    %cst_243 = arith.constant 5.000000e-01 : f32
    %483 = vector.broadcast %cst_243 : f32 to vector<16x128xf32>
    %484 = arith.mulf %483, %482 : vector<16x128xf32>
    %485 = math.tanh %484 : vector<16x128xf32>
    %cst_244 = arith.constant 1.000000e+00 : f32
    %486 = vector.broadcast %cst_244 : f32 to vector<16x128xf32>
    %487 = arith.addf %485, %486 : vector<16x128xf32>
    %cst_245 = arith.constant 5.000000e-01 : f32
    %488 = vector.broadcast %cst_245 : f32 to vector<16x128xf32>
    %489 = arith.mulf %488, %487 : vector<16x128xf32>
    %490 = arith.mulf %479, %420 : vector<16x128xf32>
    %491 = arith.mulf %471, %481 : vector<16x128xf32>
    %492 = arith.addf %490, %491 : vector<16x128xf32>
    %493 = math.tanh %492 : vector<16x128xf32>
    %494 = arith.mulf %489, %493 : vector<16x128xf32>
    %495 = arith.addf %423, %494 : vector<16x128xf32>
    %496 = vector.extract_strided_slice %463 {offsets = [0, 0], sizes = [16, 128], strides = [1, 1]} : vector<64x128xf32> to vector<16x128xf32>
    %cst_246 = arith.constant 5.000000e-01 : f32
    %497 = vector.broadcast %cst_246 : f32 to vector<16x128xf32>
    %498 = arith.mulf %497, %496 : vector<16x128xf32>
    %499 = math.tanh %498 : vector<16x128xf32>
    %cst_247 = arith.constant 1.000000e+00 : f32
    %500 = vector.broadcast %cst_247 : f32 to vector<16x128xf32>
    %501 = arith.addf %499, %500 : vector<16x128xf32>
    %cst_248 = arith.constant 5.000000e-01 : f32
    %502 = vector.broadcast %cst_248 : f32 to vector<16x128xf32>
    %503 = arith.mulf %502, %501 : vector<16x128xf32>
    %504 = vector.extract_strided_slice %463 {offsets = [16, 0], sizes = [16, 128], strides = [1, 1]} : vector<64x128xf32> to vector<16x128xf32>
    %cst_249 = arith.constant 5.000000e-01 : f32
    %505 = vector.broadcast %cst_249 : f32 to vector<16x128xf32>
    %506 = arith.mulf %505, %504 : vector<16x128xf32>
    %507 = math.tanh %506 : vector<16x128xf32>
    %cst_250 = arith.constant 1.000000e+00 : f32
    %508 = vector.broadcast %cst_250 : f32 to vector<16x128xf32>
    %509 = arith.addf %507, %508 : vector<16x128xf32>
    %cst_251 = arith.constant 5.000000e-01 : f32
    %510 = vector.broadcast %cst_251 : f32 to vector<16x128xf32>
    %511 = arith.mulf %510, %509 : vector<16x128xf32>
    %512 = vector.extract_strided_slice %463 {offsets = [32, 0], sizes = [16, 128], strides = [1, 1]} : vector<64x128xf32> to vector<16x128xf32>
    %513 = math.tanh %512 : vector<16x128xf32>
    %514 = vector.extract_strided_slice %463 {offsets = [48, 0], sizes = [16, 128], strides = [1, 1]} : vector<64x128xf32> to vector<16x128xf32>
    %cst_252 = arith.constant 5.000000e-01 : f32
    %515 = vector.broadcast %cst_252 : f32 to vector<16x128xf32>
    %516 = arith.mulf %515, %514 : vector<16x128xf32>
    %517 = math.tanh %516 : vector<16x128xf32>
    %cst_253 = arith.constant 1.000000e+00 : f32
    %518 = vector.broadcast %cst_253 : f32 to vector<16x128xf32>
    %519 = arith.addf %517, %518 : vector<16x128xf32>
    %cst_254 = arith.constant 5.000000e-01 : f32
    %520 = vector.broadcast %cst_254 : f32 to vector<16x128xf32>
    %521 = arith.mulf %520, %519 : vector<16x128xf32>
    %522 = arith.mulf %511, %452 : vector<16x128xf32>
    %523 = arith.mulf %503, %513 : vector<16x128xf32>
    %524 = arith.addf %522, %523 : vector<16x128xf32>
    %525 = math.tanh %524 : vector<16x128xf32>
    %526 = arith.mulf %521, %525 : vector<16x128xf32>
    %527 = arith.addf %455, %526 : vector<16x128xf32>
    %c5_255 = arith.constant 5 : index
    %c0_256 = arith.constant 0 : index
    %c0_257 = arith.constant 0 : index
    %528 = vector.load %arg14[%c5_255, %c0_256, %c0_257] : memref<7x64x128xf32, #tpu.memory_space<vmem>>, vector<1x64x128xf32>
    %529 = vector.shape_cast %528 : vector<1x64x128xf32> to vector<64x128xf32>
    %cst_258 = arith.constant dense<0.000000e+00> : vector<64x128xf32>
    %530 = tpu.matmul %6, %494, %cst_258 {dimension_numbers = #tpu.dot_dimension_numbers<[1], [0], [0], [1], [0, 0, 1, 1], [], []>} : vector<64x16xf32>, vector<16x128xf32>, vector<64x128xf32> -> vector<64x128xf32>
    %531 = arith.addf %529, %530 : vector<64x128xf32>
    %c5_259 = arith.constant 5 : index
    %c0_260 = arith.constant 0 : index
    %c0_261 = arith.constant 0 : index
    %532 = vector.load %arg15[%c5_259, %c0_260, %c0_261] : memref<7x64x128xf32, #tpu.memory_space<vmem>>, vector<1x64x128xf32>
    %533 = vector.shape_cast %532 : vector<1x64x128xf32> to vector<64x128xf32>
    %cst_262 = arith.constant dense<0.000000e+00> : vector<64x128xf32>
    %534 = tpu.matmul %7, %526, %cst_262 {dimension_numbers = #tpu.dot_dimension_numbers<[1], [0], [0], [1], [0, 0, 1, 1], [], []>} : vector<64x16xf32>, vector<16x128xf32>, vector<64x128xf32> -> vector<64x128xf32>
    %535 = arith.addf %533, %534 : vector<64x128xf32>
    %536 = vector.extract_strided_slice %531 {offsets = [0, 0], sizes = [16, 128], strides = [1, 1]} : vector<64x128xf32> to vector<16x128xf32>
    %cst_263 = arith.constant 5.000000e-01 : f32
    %537 = vector.broadcast %cst_263 : f32 to vector<16x128xf32>
    %538 = arith.mulf %537, %536 : vector<16x128xf32>
    %539 = math.tanh %538 : vector<16x128xf32>
    %cst_264 = arith.constant 1.000000e+00 : f32
    %540 = vector.broadcast %cst_264 : f32 to vector<16x128xf32>
    %541 = arith.addf %539, %540 : vector<16x128xf32>
    %cst_265 = arith.constant 5.000000e-01 : f32
    %542 = vector.broadcast %cst_265 : f32 to vector<16x128xf32>
    %543 = arith.mulf %542, %541 : vector<16x128xf32>
    %544 = vector.extract_strided_slice %531 {offsets = [16, 0], sizes = [16, 128], strides = [1, 1]} : vector<64x128xf32> to vector<16x128xf32>
    %cst_266 = arith.constant 5.000000e-01 : f32
    %545 = vector.broadcast %cst_266 : f32 to vector<16x128xf32>
    %546 = arith.mulf %545, %544 : vector<16x128xf32>
    %547 = math.tanh %546 : vector<16x128xf32>
    %cst_267 = arith.constant 1.000000e+00 : f32
    %548 = vector.broadcast %cst_267 : f32 to vector<16x128xf32>
    %549 = arith.addf %547, %548 : vector<16x128xf32>
    %cst_268 = arith.constant 5.000000e-01 : f32
    %550 = vector.broadcast %cst_268 : f32 to vector<16x128xf32>
    %551 = arith.mulf %550, %549 : vector<16x128xf32>
    %552 = vector.extract_strided_slice %531 {offsets = [32, 0], sizes = [16, 128], strides = [1, 1]} : vector<64x128xf32> to vector<16x128xf32>
    %553 = math.tanh %552 : vector<16x128xf32>
    %554 = vector.extract_strided_slice %531 {offsets = [48, 0], sizes = [16, 128], strides = [1, 1]} : vector<64x128xf32> to vector<16x128xf32>
    %cst_269 = arith.constant 5.000000e-01 : f32
    %555 = vector.broadcast %cst_269 : f32 to vector<16x128xf32>
    %556 = arith.mulf %555, %554 : vector<16x128xf32>
    %557 = math.tanh %556 : vector<16x128xf32>
    %cst_270 = arith.constant 1.000000e+00 : f32
    %558 = vector.broadcast %cst_270 : f32 to vector<16x128xf32>
    %559 = arith.addf %557, %558 : vector<16x128xf32>
    %cst_271 = arith.constant 5.000000e-01 : f32
    %560 = vector.broadcast %cst_271 : f32 to vector<16x128xf32>
    %561 = arith.mulf %560, %559 : vector<16x128xf32>
    %562 = arith.mulf %551, %492 : vector<16x128xf32>
    %563 = arith.mulf %543, %553 : vector<16x128xf32>
    %564 = arith.addf %562, %563 : vector<16x128xf32>
    %565 = math.tanh %564 : vector<16x128xf32>
    %566 = arith.mulf %561, %565 : vector<16x128xf32>
    %567 = arith.addf %495, %566 : vector<16x128xf32>
    %568 = vector.extract_strided_slice %535 {offsets = [0, 0], sizes = [16, 128], strides = [1, 1]} : vector<64x128xf32> to vector<16x128xf32>
    %cst_272 = arith.constant 5.000000e-01 : f32
    %569 = vector.broadcast %cst_272 : f32 to vector<16x128xf32>
    %570 = arith.mulf %569, %568 : vector<16x128xf32>
    %571 = math.tanh %570 : vector<16x128xf32>
    %cst_273 = arith.constant 1.000000e+00 : f32
    %572 = vector.broadcast %cst_273 : f32 to vector<16x128xf32>
    %573 = arith.addf %571, %572 : vector<16x128xf32>
    %cst_274 = arith.constant 5.000000e-01 : f32
    %574 = vector.broadcast %cst_274 : f32 to vector<16x128xf32>
    %575 = arith.mulf %574, %573 : vector<16x128xf32>
    %576 = vector.extract_strided_slice %535 {offsets = [16, 0], sizes = [16, 128], strides = [1, 1]} : vector<64x128xf32> to vector<16x128xf32>
    %cst_275 = arith.constant 5.000000e-01 : f32
    %577 = vector.broadcast %cst_275 : f32 to vector<16x128xf32>
    %578 = arith.mulf %577, %576 : vector<16x128xf32>
    %579 = math.tanh %578 : vector<16x128xf32>
    %cst_276 = arith.constant 1.000000e+00 : f32
    %580 = vector.broadcast %cst_276 : f32 to vector<16x128xf32>
    %581 = arith.addf %579, %580 : vector<16x128xf32>
    %cst_277 = arith.constant 5.000000e-01 : f32
    %582 = vector.broadcast %cst_277 : f32 to vector<16x128xf32>
    %583 = arith.mulf %582, %581 : vector<16x128xf32>
    %584 = vector.extract_strided_slice %535 {offsets = [32, 0], sizes = [16, 128], strides = [1, 1]} : vector<64x128xf32> to vector<16x128xf32>
    %585 = math.tanh %584 : vector<16x128xf32>
    %586 = vector.extract_strided_slice %535 {offsets = [48, 0], sizes = [16, 128], strides = [1, 1]} : vector<64x128xf32> to vector<16x128xf32>
    %cst_278 = arith.constant 5.000000e-01 : f32
    %587 = vector.broadcast %cst_278 : f32 to vector<16x128xf32>
    %588 = arith.mulf %587, %586 : vector<16x128xf32>
    %589 = math.tanh %588 : vector<16x128xf32>
    %cst_279 = arith.constant 1.000000e+00 : f32
    %590 = vector.broadcast %cst_279 : f32 to vector<16x128xf32>
    %591 = arith.addf %589, %590 : vector<16x128xf32>
    %cst_280 = arith.constant 5.000000e-01 : f32
    %592 = vector.broadcast %cst_280 : f32 to vector<16x128xf32>
    %593 = arith.mulf %592, %591 : vector<16x128xf32>
    %594 = arith.mulf %583, %524 : vector<16x128xf32>
    %595 = arith.mulf %575, %585 : vector<16x128xf32>
    %596 = arith.addf %594, %595 : vector<16x128xf32>
    %597 = math.tanh %596 : vector<16x128xf32>
    %598 = arith.mulf %593, %597 : vector<16x128xf32>
    %599 = arith.addf %527, %598 : vector<16x128xf32>
    %c6_281 = arith.constant 6 : index
    %c0_282 = arith.constant 0 : index
    %c0_283 = arith.constant 0 : index
    %600 = vector.load %arg14[%c6_281, %c0_282, %c0_283] : memref<7x64x128xf32, #tpu.memory_space<vmem>>, vector<1x64x128xf32>
    %601 = vector.shape_cast %600 : vector<1x64x128xf32> to vector<64x128xf32>
    %cst_284 = arith.constant dense<0.000000e+00> : vector<64x128xf32>
    %602 = tpu.matmul %6, %566, %cst_284 {dimension_numbers = #tpu.dot_dimension_numbers<[1], [0], [0], [1], [0, 0, 1, 1], [], []>} : vector<64x16xf32>, vector<16x128xf32>, vector<64x128xf32> -> vector<64x128xf32>
    %603 = arith.addf %601, %602 : vector<64x128xf32>
    %c6_285 = arith.constant 6 : index
    %c0_286 = arith.constant 0 : index
    %c0_287 = arith.constant 0 : index
    %604 = vector.load %arg15[%c6_285, %c0_286, %c0_287] : memref<7x64x128xf32, #tpu.memory_space<vmem>>, vector<1x64x128xf32>
    %605 = vector.shape_cast %604 : vector<1x64x128xf32> to vector<64x128xf32>
    %cst_288 = arith.constant dense<0.000000e+00> : vector<64x128xf32>
    %606 = tpu.matmul %7, %598, %cst_288 {dimension_numbers = #tpu.dot_dimension_numbers<[1], [0], [0], [1], [0, 0, 1, 1], [], []>} : vector<64x16xf32>, vector<16x128xf32>, vector<64x128xf32> -> vector<64x128xf32>
    %607 = arith.addf %605, %606 : vector<64x128xf32>
    %608 = vector.extract_strided_slice %603 {offsets = [0, 0], sizes = [16, 128], strides = [1, 1]} : vector<64x128xf32> to vector<16x128xf32>
    %cst_289 = arith.constant 5.000000e-01 : f32
    %609 = vector.broadcast %cst_289 : f32 to vector<16x128xf32>
    %610 = arith.mulf %609, %608 : vector<16x128xf32>
    %611 = math.tanh %610 : vector<16x128xf32>
    %cst_290 = arith.constant 1.000000e+00 : f32
    %612 = vector.broadcast %cst_290 : f32 to vector<16x128xf32>
    %613 = arith.addf %611, %612 : vector<16x128xf32>
    %cst_291 = arith.constant 5.000000e-01 : f32
    %614 = vector.broadcast %cst_291 : f32 to vector<16x128xf32>
    %615 = arith.mulf %614, %613 : vector<16x128xf32>
    %616 = vector.extract_strided_slice %603 {offsets = [16, 0], sizes = [16, 128], strides = [1, 1]} : vector<64x128xf32> to vector<16x128xf32>
    %cst_292 = arith.constant 5.000000e-01 : f32
    %617 = vector.broadcast %cst_292 : f32 to vector<16x128xf32>
    %618 = arith.mulf %617, %616 : vector<16x128xf32>
    %619 = math.tanh %618 : vector<16x128xf32>
    %cst_293 = arith.constant 1.000000e+00 : f32
    %620 = vector.broadcast %cst_293 : f32 to vector<16x128xf32>
    %621 = arith.addf %619, %620 : vector<16x128xf32>
    %cst_294 = arith.constant 5.000000e-01 : f32
    %622 = vector.broadcast %cst_294 : f32 to vector<16x128xf32>
    %623 = arith.mulf %622, %621 : vector<16x128xf32>
    %624 = vector.extract_strided_slice %603 {offsets = [32, 0], sizes = [16, 128], strides = [1, 1]} : vector<64x128xf32> to vector<16x128xf32>
    %625 = math.tanh %624 : vector<16x128xf32>
    %626 = vector.extract_strided_slice %603 {offsets = [48, 0], sizes = [16, 128], strides = [1, 1]} : vector<64x128xf32> to vector<16x128xf32>
    %cst_295 = arith.constant 5.000000e-01 : f32
    %627 = vector.broadcast %cst_295 : f32 to vector<16x128xf32>
    %628 = arith.mulf %627, %626 : vector<16x128xf32>
    %629 = math.tanh %628 : vector<16x128xf32>
    %cst_296 = arith.constant 1.000000e+00 : f32
    %630 = vector.broadcast %cst_296 : f32 to vector<16x128xf32>
    %631 = arith.addf %629, %630 : vector<16x128xf32>
    %cst_297 = arith.constant 5.000000e-01 : f32
    %632 = vector.broadcast %cst_297 : f32 to vector<16x128xf32>
    %633 = arith.mulf %632, %631 : vector<16x128xf32>
    %634 = arith.mulf %623, %564 : vector<16x128xf32>
    %635 = arith.mulf %615, %625 : vector<16x128xf32>
    %636 = arith.addf %634, %635 : vector<16x128xf32>
    %637 = math.tanh %636 : vector<16x128xf32>
    %638 = arith.mulf %633, %637 : vector<16x128xf32>
    %639 = arith.addf %567, %638 : vector<16x128xf32>
    %640 = vector.extract_strided_slice %607 {offsets = [0, 0], sizes = [16, 128], strides = [1, 1]} : vector<64x128xf32> to vector<16x128xf32>
    %cst_298 = arith.constant 5.000000e-01 : f32
    %641 = vector.broadcast %cst_298 : f32 to vector<16x128xf32>
    %642 = arith.mulf %641, %640 : vector<16x128xf32>
    %643 = math.tanh %642 : vector<16x128xf32>
    %cst_299 = arith.constant 1.000000e+00 : f32
    %644 = vector.broadcast %cst_299 : f32 to vector<16x128xf32>
    %645 = arith.addf %643, %644 : vector<16x128xf32>
    %cst_300 = arith.constant 5.000000e-01 : f32
    %646 = vector.broadcast %cst_300 : f32 to vector<16x128xf32>
    %647 = arith.mulf %646, %645 : vector<16x128xf32>
    %648 = vector.extract_strided_slice %607 {offsets = [16, 0], sizes = [16, 128], strides = [1, 1]} : vector<64x128xf32> to vector<16x128xf32>
    %cst_301 = arith.constant 5.000000e-01 : f32
    %649 = vector.broadcast %cst_301 : f32 to vector<16x128xf32>
    %650 = arith.mulf %649, %648 : vector<16x128xf32>
    %651 = math.tanh %650 : vector<16x128xf32>
    %cst_302 = arith.constant 1.000000e+00 : f32
    %652 = vector.broadcast %cst_302 : f32 to vector<16x128xf32>
    %653 = arith.addf %651, %652 : vector<16x128xf32>
    %cst_303 = arith.constant 5.000000e-01 : f32
    %654 = vector.broadcast %cst_303 : f32 to vector<16x128xf32>
    %655 = arith.mulf %654, %653 : vector<16x128xf32>
    %656 = vector.extract_strided_slice %607 {offsets = [32, 0], sizes = [16, 128], strides = [1, 1]} : vector<64x128xf32> to vector<16x128xf32>
    %657 = math.tanh %656 : vector<16x128xf32>
    %658 = vector.extract_strided_slice %607 {offsets = [48, 0], sizes = [16, 128], strides = [1, 1]} : vector<64x128xf32> to vector<16x128xf32>
    %cst_304 = arith.constant 5.000000e-01 : f32
    %659 = vector.broadcast %cst_304 : f32 to vector<16x128xf32>
    %660 = arith.mulf %659, %658 : vector<16x128xf32>
    %661 = math.tanh %660 : vector<16x128xf32>
    %cst_305 = arith.constant 1.000000e+00 : f32
    %662 = vector.broadcast %cst_305 : f32 to vector<16x128xf32>
    %663 = arith.addf %661, %662 : vector<16x128xf32>
    %cst_306 = arith.constant 5.000000e-01 : f32
    %664 = vector.broadcast %cst_306 : f32 to vector<16x128xf32>
    %665 = arith.mulf %664, %663 : vector<16x128xf32>
    %666 = arith.mulf %655, %596 : vector<16x128xf32>
    %667 = arith.mulf %647, %657 : vector<16x128xf32>
    %668 = arith.addf %666, %667 : vector<16x128xf32>
    %669 = math.tanh %668 : vector<16x128xf32>
    %670 = arith.mulf %665, %669 : vector<16x128xf32>
    %671 = arith.addf %599, %670 : vector<16x128xf32>
    %c0_307 = arith.constant 0 : index
    %c0_308 = arith.constant 0 : index
    %672 = vector.load %arg10[%c0_307, %c0_308] : memref<4x16xf32, #tpu.memory_space<vmem>>, vector<4x16xf32>
    %cst_309 = arith.constant dense<0.000000e+00> : vector<4x128xf32>
    %673 = tpu.matmul %672, %639, %cst_309 {dimension_numbers = #tpu.dot_dimension_numbers<[1], [0], [0], [1], [0, 0, 1, 1], [], []>} : vector<4x16xf32>, vector<16x128xf32>, vector<4x128xf32> -> vector<4x128xf32>
    %c0_310 = arith.constant 0 : index
    %c0_311 = arith.constant 0 : index
    %674 = vector.load %arg11[%c0_310, %c0_311] : memref<4x16xf32, #tpu.memory_space<vmem>>, vector<4x16xf32>
    %cst_312 = arith.constant dense<0.000000e+00> : vector<4x128xf32>
    %675 = tpu.matmul %674, %671, %cst_312 {dimension_numbers = #tpu.dot_dimension_numbers<[1], [0], [0], [1], [0, 0, 1, 1], [], []>} : vector<4x16xf32>, vector<16x128xf32>, vector<4x128xf32> -> vector<4x128xf32>
    %676 = arith.addf %673, %675 : vector<4x128xf32>
    %c0_313 = arith.constant 0 : index
    %c0_314 = arith.constant 0 : index
    %677 = vector.load %arg12[%c0_313, %c0_314] : memref<4x1xf32, #tpu.memory_space<vmem>>, vector<4x1xf32>
    %678 = vector.broadcast %677 : vector<4x1xf32> to vector<4x128xf32>
    %679 = arith.addf %676, %678 : vector<4x128xf32>
    %c0_315 = arith.constant 0 : index
    %c0_316 = arith.constant 0 : index
    %680 = vector.load %arg13[%c0_315, %c0_316] : memref<4x128xf32, #tpu.memory_space<vmem>>, vector<4x128xf32>
    tpu.vector_store %arg13[%c0_315, %c0_316], %679 {strides = array<i32>} : memref<4x128xf32, #tpu.memory_space<vmem>>, vector<4x128xf32>,
    return
  }
  func.func @transform_0(%arg0: i32) -> (i32, i32, i32) {
    %c0_i32 = arith.constant 0 : i32
    %c0_i32_0 = arith.constant 0 : i32
    %c0_i32_1 = arith.constant 0 : i32
    return %c0_i32, %c0_i32_0, %arg0 : i32, i32, i32
  }
  func.func @transform_1(%arg0: i32) -> (i32, i32) {
    %c0_i32 = arith.constant 0 : i32
    %c0_i32_0 = arith.constant 0 : i32
    %c0_i32_1 = arith.constant 0 : i32
    return %c0_i32, %c0_i32_0 : i32, i32
  }
  func.func @transform_2(%arg0: i32) -> (i32, i32) {
    %c0_i32 = arith.constant 0 : i32
    %c0_i32_0 = arith.constant 0 : i32
    %c0_i32_1 = arith.constant 0 : i32
    return %c0_i32, %c0_i32_0 : i32, i32
  }
  func.func @transform_3(%arg0: i32) -> (i32, i32) {
    %c0_i32 = arith.constant 0 : i32
    %c0_i32_0 = arith.constant 0 : i32
    %c0_i32_1 = arith.constant 0 : i32
    return %c0_i32, %c0_i32_0 : i32, i32
  }
  func.func @transform_4(%arg0: i32) -> (i32, i32) {
    %c0_i32 = arith.constant 0 : i32
    %c0_i32_0 = arith.constant 0 : i32
    %c0_i32_1 = arith.constant 0 : i32
    return %c0_i32, %c0_i32_0 : i32, i32
  }
  func.func @transform_5(%arg0: i32) -> (i32, i32) {
    %c0_i32 = arith.constant 0 : i32
    %c0_i32_0 = arith.constant 0 : i32
    %c0_i32_1 = arith.constant 0 : i32
    return %c0_i32, %c0_i32_0 : i32, i32
  }
  func.func @transform_6(%arg0: i32) -> (i32, i32) {
    %c0_i32 = arith.constant 0 : i32
    %c0_i32_0 = arith.constant 0 : i32
    %c0_i32_1 = arith.constant 0 : i32
    return %c0_i32, %c0_i32_0 : i32, i32
  }
  func.func @transform_7(%arg0: i32) -> (i32, i32) {
    %c0_i32 = arith.constant 0 : i32
    %c0_i32_0 = arith.constant 0 : i32
    %c0_i32_1 = arith.constant 0 : i32
    return %c0_i32, %c0_i32_0 : i32, i32
  }
  func.func @transform_8(%arg0: i32) -> (i32, i32) {
    %c0_i32 = arith.constant 0 : i32
    %c0_i32_0 = arith.constant 0 : i32
    %c0_i32_1 = arith.constant 0 : i32
    return %c0_i32, %c0_i32_0 : i32, i32
  }
  func.func @transform_9(%arg0: i32) -> (i32, i32) {
    %c0_i32 = arith.constant 0 : i32
    %c0_i32_0 = arith.constant 0 : i32
    %c0_i32_1 = arith.constant 0 : i32
    return %c0_i32, %c0_i32_0 : i32, i32
  }
  func.func @transform_10(%arg0: i32) -> (i32, i32) {
    %c0_i32 = arith.constant 0 : i32
    %c0_i32_0 = arith.constant 0 : i32
    %c0_i32_1 = arith.constant 0 : i32
    return %c0_i32, %c0_i32_0 : i32, i32
  }
  func.func @transform_11(%arg0: i32) -> (i32, i32) {
    %c0_i32 = arith.constant 0 : i32
    %c0_i32_0 = arith.constant 0 : i32
    %c0_i32_1 = arith.constant 0 : i32
    return %c0_i32, %c0_i32_0 : i32, i32
  }
  func.func @transform_12(%arg0: i32) -> (i32, i32) {
    %c0_i32 = arith.constant 0 : i32
    %c0_i32_0 = arith.constant 0 : i32
    return %c0_i32, %arg0 : i32, i32
  }
}

</mosaic_0001>

<bundles_post_ra>
// kernel: decoder_forward.1
= control target key start
LH: loop header
LB: loop body
LE: loop exit
PB: predicated region body
PF: predicated region fallthrough
CT: control target
= control target key end

     0   :  { %s8898_s0 = inlined_call_operand.vmem [shape: f32[8,32,256], index: 0, kind: input, shape index: {}]   ;;  %s8899_s1 = inlined_call_operand.vmem [shape: f32[16,32], index: 1, kind: input, shape index: {}]   ;;  %s8900_s2 = inlined_call_operand.vmem [shape: f32[16,1], index: 2, kind: input, shape index: {}]   ;;  %s8901_s3 = inlined_call_operand.vmem [shape: f32[64,16], index: 3, kind: input, shape index: {}]   ;;  %s8902_s4 = inlined_call_operand.vmem [shape: f32[64,1], index: 4, kind: input, shape index: {}]   ;;  %s8903_s5 = inlined_call_operand.vmem [shape: f32[64,16], index: 5, kind: input, shape index: {}]   ;;  %s8904_s6 = inlined_call_operand.vmem [shape: f32[64,1], index: 6, kind: input, shape index: {}]   ;;  %s8905_s7 = inlined_call_operand.vmem [shape: f32[64,16], index: 7, kind: input, shape index: {}]   ;;  %s8906_s8 = inlined_call_operand.vmem [shape: f32[64,16], index: 8, kind: input, shape index: {}]   ;;  %s8907_s9 = inlined_call_operand.vmem [shape: f32[4,16], index: 9, kind: input, shape index: {}]   ;;  %s8908_s10 = inlined_call_operand.vmem [shape: f32[4,16], index: 10, kind: input, shape index: {}]   ;;  %s8909_s11 = inlined_call_operand.vmem [shape: f32[4,1], index: 11, kind: input, shape index: {}]   ;;  %s8910_s12 = inlined_call_operand.hbm [shape: f32[4,256], index: 12, kind: output, shape index: {}]  }
   0x1   :  { %8923 = sst [smem:[#allocation104_spill]] %s8898_s0 }
   0x2   :  { %8924 = sst [smem:[#allocation105_spill]] %s8899_s1 }
   0x3   :  { %8925 = sst [smem:[#allocation106_spill]] %s8900_s2 }
   0x4   :  { %17 = vsyncpa [#allocation6], 0 }
   0x5   :  { %19 = vsyncpa [#allocation6 + $0x1], 0  ;;  %s7138_s21 = smov 0   ;;  %s7140_s22 = smov 0  }
   0x6   :  { %s7142_s23 = smov 0   ;;  %s7144_s24 = smov 0  }
   0x7 LB: > { %s8911_s25 = sadd.s32 4294967295, %s7067_s24   ;;  %s5502_s26 = sadd.s32 4294967294, %s7067_s24   ;;  %s7067_s24 = sphi %s7144_s24, %s9131_s24   ;;  %s7063_s23 = sphi %s7142_s23, %s9130_s23   ;;  %s7059_s22 = sphi %s7140_s22, %s9129_s22   ;;  %s7055_s21 = sphi %s7138_s21, %s9128_s21  }
   0x8   : > { %s7161_s27 = sadd.s32 1, %s7067_s24   ;;  %s32_s28 = sadd.s32 1, %s7063_s23 }
   0x9   : > { %s29_s29 = ssub.s32 %s7067_s24, %s7161_s27  ;;  %p39_p0 = scmp.ne.s32.totalorder %s7063_s23, %s7059_s22 }
   0xa   : > { %p30_p1 = scmp.eq.s32.totalorder %s29_s29, 0  ;;  %p40_p2 = scmp.eq.s32.totalorder %s7067_s24, 0 }
   0xb   : > { %p300_p3 = scmp.eq.s32.totalorder %s8911_s25, 1  ;;  %p305_p4 = scmp.ne.s32.totalorder %s7059_s22, %s7055_s21 }
   0xc   : > { %s7174_s30 = scalar_select %p30_p1, %s7063_s23, %s32_s28  }
   0xd   : > { %p41_p5 = por %p40_p2, %p39_p0  ;;  %p7176_p6 = por %p300_p3, %p39_p0 }
   0xe   : > { %p306_p7 = scmp.eq.s32.totalorder %s5502_s26, 1  ;;  %p8922_p9 = scmp.ge.s32.totalorder %s7067_s24, 2 }
  0x10   : > { %p7180_p8 = por %p306_p7, %p305_p4  ;;  %355 = sbr.rel (%p8922_p9) target bundleno = 47 (0x2f), region = 60 }
  0x15   : > { %358 = sbr.rel (!%p41_p5) target bundleno = 47 (0x2f), region = 64  ;;  %s360_s15 = sand.u32 (%p41_p5), 1, %s7063_s23  }
  0x16   : > { %s5506_s16 = sshll.u32 (%p41_p5), %s7067_s24, 3  ;;  %s5505_s17 = sshll.u32 (%p41_p5), %s360_s15, 8 }
  0x17   : > { %s8928_s0 = sld [smem:[#allocation104_spill]] (%p41_p5)  ;;  %s7197_s26 = scalar_lea.vmem (%p41_p5), [#allocation4], %s5505_s17 }
  0x1d   : > { %s7192_s20 = scalar_lea.vmem %s8928_s0, %s5506_s16 }
  0x1e   : > { %v455_v0 = vld [vmem:[%s7192_s20] sm:$0xff]  ;;  %v457_v1 = vld [vmem:[%s7192_s20 + $0x10] sm:$0xff] }
  0x1f   : > { %v459_v2 = vld [vmem:[%s7192_s20 + $0x20] sm:$0xff]  ;;  %456 = vst [vmem:[%s7197_s26] sm:$0xff] %v455_v0  ;;  %458 = vst [vmem:[%s7197_s26 + $0x8] sm:$0xff] %v457_v1  ;;  %v461_v3 = vld [vmem:[%s7192_s20 + $0x30] sm:$0xff] }
  0x20   : > { %460 = vst [vmem:[%s7197_s26 + $0x10] sm:$0xff] %v459_v2  ;;  %v463_v4 = vld [vmem:[%s7192_s20 + $0x40] sm:$0xff]  ;;  %v465_v5 = vld [vmem:[%s7192_s20 + $0x50] sm:$0xff]  ;;  %462 = vst [vmem:[%s7197_s26 + $0x18] sm:$0xff] %v461_v3 }
  0x21   : > { %464 = vst [vmem:[%s7197_s26 + $0x20] sm:$0xff] %v463_v4  ;;  %466 = vst [vmem:[%s7197_s26 + $0x28] sm:$0xff] %v465_v5  ;;  %v467_v6 = vld [vmem:[%s7192_s20 + $0x60] sm:$0xff]  ;;  %v469_v7 = vld [vmem:[%s7192_s20 + $0x70] sm:$0xff] }
  0x22   : > { %v471_v8 = vld [vmem:[%s7192_s20 + $0x80] sm:$0xff]  ;;  %468 = vst [vmem:[%s7197_s26 + $0x30] sm:$0xff] %v467_v6  ;;  %470 = vst [vmem:[%s7197_s26 + $0x38] sm:$0xff] %v469_v7  ;;  %v473_v9 = vld [vmem:[%s7192_s20 + $0x90] sm:$0xff] }
  0x23   : > { %472 = vst [vmem:[%s7197_s26 + $0x40] sm:$0xff] %v471_v8  ;;  %v475_v10 = vld [vmem:[%s7192_s20 + $0xa0] sm:$0xff]  ;;  %v477_v11 = vld [vmem:[%s7192_s20 + $0xb0] sm:$0xff]  ;;  %474 = vst [vmem:[%s7197_s26 + $0x48] sm:$0xff] %v473_v9 }
  0x24   : > { %476 = vst [vmem:[%s7197_s26 + $0x50] sm:$0xff] %v475_v10  ;;  %478 = vst [vmem:[%s7197_s26 + $0x58] sm:$0xff] %v477_v11  ;;  %v479_v12 = vld [vmem:[%s7192_s20 + $0xc0] sm:$0xff]  ;;  %v481_v13 = vld [vmem:[%s7192_s20 + $0xd0] sm:$0xff] }
  0x25   : > { %v483_v14 = vld [vmem:[%s7192_s20 + $0xe0] sm:$0xff]  ;;  %480 = vst [vmem:[%s7197_s26 + $0x60] sm:$0xff] %v479_v12  ;;  %482 = vst [vmem:[%s7197_s26 + $0x68] sm:$0xff] %v481_v13  ;;  %v485_v15 = vld [vmem:[%s7192_s20 + $0xf0] sm:$0xff] }
  0x26   : > { %484 = vst [vmem:[%s7197_s26 + $0x70] sm:$0xff] %v483_v14  ;;  %v487_v16 = vld [vmem:[%s7192_s20 + $0x100] sm:$0xff]  ;;  %v489_v17 = vld [vmem:[%s7192_s20 + $0x110] sm:$0xff]  ;;  %486 = vst [vmem:[%s7197_s26 + $0x78] sm:$0xff] %v485_v15 }
  0x27   : > { %488 = vst [vmem:[%s7197_s26 + $0x80] sm:$0xff] %v487_v16  ;;  %490 = vst [vmem:[%s7197_s26 + $0x88] sm:$0xff] %v489_v17  ;;  %v491_v18 = vld [vmem:[%s7192_s20 + $0x120] sm:$0xff]  ;;  %v493_v19 = vld [vmem:[%s7192_s20 + $0x130] sm:$0xff] }
  0x28   : > { %v495_v20 = vld [vmem:[%s7192_s20 + $0x140] sm:$0xff]  ;;  %492 = vst [vmem:[%s7197_s26 + $0x90] sm:$0xff] %v491_v18  ;;  %494 = vst [vmem:[%s7197_s26 + $0x98] sm:$0xff] %v493_v19  ;;  %v497_v21 = vld [vmem:[%s7192_s20 + $0x150] sm:$0xff] }
  0x29   : > { %496 = vst [vmem:[%s7197_s26 + $0xa0] sm:$0xff] %v495_v20  ;;  %v499_v22 = vld [vmem:[%s7192_s20 + $0x160] sm:$0xff]  ;;  %v501_v23 = vld [vmem:[%s7192_s20 + $0x170] sm:$0xff]  ;;  %498 = vst [vmem:[%s7197_s26 + $0xa8] sm:$0xff] %v497_v21 }
  0x2a   : > { %500 = vst [vmem:[%s7197_s26 + $0xb0] sm:$0xff] %v499_v22  ;;  %502 = vst [vmem:[%s7197_s26 + $0xb8] sm:$0xff] %v501_v23  ;;  %v503_v24 = vld [vmem:[%s7192_s20 + $0x180] sm:$0xff]  ;;  %v505_v25 = vld [vmem:[%s7192_s20 + $0x190] sm:$0xff] }
  0x2b   : > { %v507_v26 = vld [vmem:[%s7192_s20 + $0x1a0] sm:$0xff]  ;;  %504 = vst [vmem:[%s7197_s26 + $0xc0] sm:$0xff] %v503_v24  ;;  %506 = vst [vmem:[%s7197_s26 + $0xc8] sm:$0xff] %v505_v25  ;;  %v509_v27 = vld [vmem:[%s7192_s20 + $0x1b0] sm:$0xff] }
  0x2c   : > { %508 = vst [vmem:[%s7197_s26 + $0xd0] sm:$0xff] %v507_v26  ;;  %v511_v28 = vld [vmem:[%s7192_s20 + $0x1c0] sm:$0xff]  ;;  %v513_v29 = vld [vmem:[%s7192_s20 + $0x1d0] sm:$0xff]  ;;  %510 = vst [vmem:[%s7197_s26 + $0xd8] sm:$0xff] %v509_v27 }
  0x2d   : > { %512 = vst [vmem:[%s7197_s26 + $0xe0] sm:$0xff] %v511_v28  ;;  %514 = vst [vmem:[%s7197_s26 + $0xe8] sm:$0xff] %v513_v29  ;;  %v515_v30 = vld [vmem:[%s7192_s20 + $0x1e0] sm:$0xff]  ;;  %v517_v31 = vld [vmem:[%s7192_s20 + $0x1f0] sm:$0xff] }
  0x2e   : > { %516 = vst [vmem:[%s7197_s26 + $0xf0] sm:$0xff] %v515_v30  ;;  %518 = vst [vmem:[%s7197_s26 + $0xf8] sm:$0xff] %v517_v31 }
  0x2f PF: > { %p5507_p10 = scmp.ge.s32.totalorder %s7067_s24, 1  ;;  %p523_p11 = scmp.lt.s32.totalorder %s7067_s24, 3 }
  0x31   : > { %p524_p12 = pnand %p5507_p10, %p523_p11 }
  0x33   : > { %527 = sbr.rel (%p524_p12) target bundleno = 3503 (0xdaf), region = 102 }
  0x38   : > { %s7263_s28 = sand.u32 1, %s7059_s22   ;;  %s8929_s1 = sld [smem:[#allocation105_spill]]  ;;  %vm646_vm0 = vcmask 261120   ;;  %v7069_v34 = vmov 0   ;;  %v600_v47 = vld [vmem:[%s8904_s6 + $0x8] sm:$0xff]  ;;  %v583_v50 = vld [vmem:[%s8902_s4] sm:$0xff] }
  0x39   : > { %s8930_s2 = sld [smem:[#allocation106_spill]]  ;;  %s5508_s18 = sshll.u32 %s7263_s28, 8  ;;  %6709 = vset.pattern.permute.xlu0 %v7069_v34  ;;  %6710 = vset.pattern.permute.xlu1 %v7069_v34  ;;  %v599_v51 = vld [vmem:[%s8904_s6] sm:$0xff]  ;;  %v588_v52 = vld [vmem:[%s8902_s4 + $0x28] sm:$0xff]  ;;  %v590_v54 = vld [vmem:[%s8902_s4 + $0x38] sm:$0xff]  ;;  %vm770_vm1 = vcmask 130048  }
  0x3a   : > { %s7279_s26 = scalar_lea.vmem [#allocation4], %s5508_s18  ;;  %v587_v53 = vld [vmem:[%s8902_s4 + $0x20] sm:$0xff]  ;;  %v589_v55 = vld [vmem:[%s8902_s4 + $0x30] sm:$0xff]  ;;  %v584_v59 = vld [vmem:[%s8902_s4 + $0x8] sm:$0xff]  ;;  %vm7071_vm2 = vmmov 0   ;;  %s5509_s15 = sshll.u32 %s7263_s28, 2 }
  0x3b   : > { %v7282_v36 = vld [vmem:[%s7279_s26 + $0x38] sm:$0xff]  ;;  %v7286_v38 = vld [vmem:[%s7279_s26 + $0x30] sm:$0xff]  ;;  %v7291_v41 = vld [vmem:[%s7279_s26 + $0x28] sm:$0xff]  ;;  %737 = vperm.xlu1 %6710, %v584_v59   ;;  %s9126_s16 = sadd.s32 4294967295, %s7067_s24   ;;  %s570_s0 = scalar_lea.vmem [#allocation5], %s5509_s15 }
  0x3c   : > { %v631_v37 = vld [vmem:[%s7279_s26 + $0x18] sm:$0xff]  ;;  %v630_v40 = vld [vmem:[%s7279_s26 + $0x10] sm:$0xff]  ;;  %v629_v42 = vld [vmem:[%s7279_s26 + $0x8] sm:$0xff]  ;;  %s5803_s17 = sshll.u32 %s9126_s16, 6  ;;  %s5424_s29 = scalar_lea.sflag [#allocation6], %s7263_s28 }
  0x3d   : > { %v635_v39 = vsub.f32 %v7282_v36, %v631_v37  ;;  %v634_v43 = vsub.f32 %v7286_v38, %v630_v40  ;;  %v7296_v44 = vld [vmem:[%s7279_s26 + $0x20] sm:$0xff]  ;;  %v633_v46 = vsub.f32 %v7291_v41, %v629_v42  ;;  %v586_v60 = vld [vmem:[%s8902_s4 + $0x18] sm:$0xff]  ;;  %v585_v62 = vld [vmem:[%s8902_s4 + $0x10] sm:$0xff]  ;;  %s5435_s20 = scalar_lea.hbm %s8910_s12, %s5803_s17  ;;  %s7072_s25 = smov [#allocation5]  }
  0x3e   : > { %v7268_v32 = vld [vmem:[%s8929_s1] sm:$0xff]  ;;  %v7307_v49 = vld [vmem:[%s8929_s1 + $0x8] sm:$0xff]  ;;  %v602_v61 = vld [vmem:[%s8904_s6 + $0x18] sm:$0xff]  ;;  %s5437_s1 = sshll.u32 %s570_s0, 4  ;;  %s7011_s15 = sshll.u32 %s7072_s25, 4  ;;  %s5438_s1 = int_to_ptr.vmem [resolvable:$true] %s5437_s1  ;;  %s7012_s15 = int_to_ptr.vmem [resolvable:$false] %s7011_s15 }
  0x3f   : > { %v574_v33 = vld [vmem:[%s8930_s2 + $0x8] sm:$0xff]  ;;  %6140 = vmatprep.mubr.msk.f32.mxu0 %vm646_vm0, %v7268_v32  ;;  %v573_v35 = vld [vmem:[%s8930_s2] sm:$0xff]  ;;  %6132 = vmatprep.subr.mxu0 %v635_v39  ;;  %v7365_v6 = vld [vmem:[%s7279_s26 + $0x58] sm:$0xff]  ;;  %s7013_s16 = scalar_lea.vmem %s7012_s15, 128  ;;  %p7014_p2 = scmp.lt.s32.totalorder %s5438_s1, %s7012_s15 }
  0x40   : > { %643 = vperm.xlu0 %6709, %v574_v33   ;;  %v628_v45 = vld [vmem:[%s7279_s26] sm:$0xff]  ;;  %6133 = vmatpush3.msra.mxu0 %v635_v39  ;;  %v7368_v8 = vld [vmem:[%s7279_s26 + $0x50] sm:$0xff]  ;;  %v7373_v9 = vld [vmem:[%s8901_s3 + $0x8] sm:$0xff]  ;;  %v1098_v11 = vsub.f32 %v7365_v6, %v7282_v36 }
  0x41   : > { %6134 = vmatprep.subr.mxu0 %v634_v43  ;;  %v632_v48 = vsub.f32 %v7296_v44, %v628_v45  ;;  %v5415_v56 = vld [vmem:[%s8909_s11] sm:$0xf]  ;;  %747 = vperm.xlu1 %6710, %v586_v60   ;;  %v7378_v10 = vld [vmem:[%s8903_s5 + $0x8] sm:$0xff]  ;;  %v7385_v12 = vld [vmem:[%s8901_s3 + $0x10] sm:$0xff]  ;;  %v1097_v13 = vsub.f32 %v7368_v8, %v7286_v38 }
  0x42   : > { %6135 = vmatpush3.msra.mxu0 %v634_v43  ;;  %v7335_v57 = vld [vmem:[%s8901_s3] sm:$0xff]  ;;  %v7390_v14 = vld [vmem:[%s7279_s26 + $0x48] sm:$0xff]  ;;  %v7401_v15 = vld [vmem:[%s8901_s3 + $0x18] sm:$0xff] }
  0x43   : > { %6136 = vmatprep.subr.mxu0 %v633_v46  ;;  %v7340_v58 = vld [vmem:[%s8903_s5] sm:$0xff]  ;;  %6147 = vmatprep.mubr.msk.f32.mxu1 %vm770_vm1, %v7335_v57  ;;  %v1096_v18 = vsub.f32 %v7390_v14, %v7291_v41  ;;  %v7422_v20 = vld [vmem:[%s8901_s3 + $0x28] sm:$0xff]  ;;  %v7427_v21 = vld [vmem:[%s8901_s3 + $0x30] sm:$0xff] }
  0x44   : > { %638 = vperm.xlu0 %6709, %v573_v35   ;;  %6137 = vmatpush3.msra.mxu0 %v633_v46  ;;  %v7404_v16 = vld [vmem:[%s7279_s26 + $0x40] sm:$0xff]  ;;  %v7436_v22 = vld [vmem:[%s8901_s3 + $0x38] sm:$0xff]  ;;  %v7449_v23 = vld [vmem:[%s8903_s5 + $0x10] sm:$0xff] }
  0x45   : > { %6138 = vmatprep.subr.mxu0 %v632_v48  ;;  %917 = vperm.xlu1 %6710, %v602_v61   ;;  %v7409_v17 = vld [vmem:[%s8901_s3 + $0x20] sm:$0xff]  ;;  %v1095_v19 = vsub.f32 %v7404_v16, %v7296_v44  ;;  %v7456_v24 = vld [vmem:[%s8903_s5 + $0x18] sm:$0xff]  ;;  %v7470_v26 = vld [vmem:[%s8903_s5 + $0x28] sm:$0xff] }
  0x46   : > { %6139 = vmatpush3.msra.mxu0 %v632_v48  ;;  %v7463_v25 = vld [vmem:[%s8903_s5 + $0x20] sm:$0xff]  ;;  %v7477_v27 = vld [vmem:[%s8903_s5 + $0x30] sm:$0xff]  ;;  %v7484_v28 = vld [vmem:[%s8903_s5 + $0x38] sm:$0xff] }
  0x47   : > { %6141 = vmatmul.mubr.msk.f32.vlgmr.msra.gmra.mxu0 %vm646_vm0, %v7307_v49  ;;  %v7509_v43 = vld [vmem:[%s7279_s26 + $0x78] sm:$0xff]  ;;  %v7512_v45 = vld [vmem:[%s7279_s26 + $0x70] sm:$0xff]  ;;  %v7519_v48 = vld [vmem:[%s7279_s26 + $0x68] sm:$0xff] }
  0x48   : > { %907 = vperm.xlu0 %6709, %v600_v47   ;;  %6163 = vmatprep.mubr.msk.f32.mxu0 %vm770_vm1, %v7340_v58  ;;  %v1416_v46 = vsub.f32 %v7509_v43, %v7365_v6  ;;  %v1415_v47 = vsub.f32 %v7512_v45, %v7368_v8  ;;  %v605_v59 = vld [vmem:[%s8904_s6 + $0x30] sm:$0xff] }
  0x49   : > { %742 = vperm.xlu1 %6710, %v585_v62  }
  0x4c   : > { %732 = vperm.xlu0 %6709, %v583_v50   ;;  %v7528_v50 = vld [vmem:[%s7279_s26 + $0x60] sm:$0xff] }
  0x50   : > { %902 = vperm.xlu0 %6709, %v599_v51   ;;  %v1414_v51 = vsub.f32 %v7519_v48, %v7390_v14  ;;  %v7598_v14 = vld [vmem:[%s7279_s26 + $0x98] sm:$0xff] }
  0x54   : > { %757 = vperm.xlu0 %6709, %v588_v52   ;;  %v1413_v52 = vsub.f32 %v7528_v50, %v7404_v16 }
  0x58   : > { %752 = vperm.xlu0 %6709, %v587_v53   ;;  %v601_v53 = vld [vmem:[%s8904_s6 + $0x10] sm:$0xff] }
  0x59   : > { %912 = vperm.xlu1 %6710, %v601_v53  }
  0x5c   : > { %767 = vperm.xlu0 %6709, %v590_v54   ;;  %v604_v54 = vld [vmem:[%s8904_s6 + $0x28] sm:$0xff] }
  0x5d   : > { %927 = vperm.xlu1 %6710, %v604_v54  }
  0x60   : > { %762 = vperm.xlu0 %6709, %v589_v55   ;;  %v603_v55 = vld [vmem:[%s8904_s6 + $0x20] sm:$0xff] }
  0x61   : > { %922 = vperm.xlu1 %6710, %v603_v55  }
  0x64   : > { %5418 = vperm.xlu0 %6709, %v5415_v56   ;;  %v606_v56 = vld [vmem:[%s8904_s6 + $0x38] sm:$0xff] }
  0x65   : > { %937 = vperm.xlu1 %6710, %v606_v56  }
  0x69   : > { %932 = vperm.xlu1 %6710, %v605_v59  }
  0xbb   : > { %v7358_v63 = vpop.permute.xlu0 %643 }
  0xbf   : > { %v7361_v2 = vpop.permute.xlu0 %638 }
 0x107   : > { %v6142_v0 = vpop.f32.mrf.mxu0 }
 0x108   : > { %v725_v1 = vadd.f32 %v6142_v0, %v7358_v63 }
 0x109   : > { %v719_v3 = vpop.f32.mrf.mxu0 }
 0x10a   : > { %v729_v4 = vmax.f32 %v725_v1, 0.0  ;;  %v720_v5 = vadd.f32 %v719_v3, %v7361_v2 }
 0x10c   : > { %v728_v7 = vmax.f32 %v720_v5, 0.0  ;;  %6143 = vmatprep.subr.mxu1 %v729_v4  ;;  %6159 = vmatprep.subr.mxu0 %v729_v4 }
 0x10d   : > { %6144 = vmatpush3.msra.mxu1 %v729_v4  ;;  %6160 = vmatpush3.msra.mxu0 %v729_v4 }
 0x10e   : > { %6145 = vmatprep.subr.mxu1 %v728_v7  ;;  %6161 = vmatprep.subr.mxu0 %v728_v7 }
 0x10f   : > { %6146 = vmatpush3.msra.mxu1 %v728_v7  ;;  %6162 = vmatpush3.msra.mxu0 %v728_v7 }
 0x110   : > { %6148 = vmatmul.mubr.msk.f32.vlgmr.msra.gmra.mxu1 %vm770_vm1, %v7373_v9  ;;  %6164 = vmatmul.mubr.msk.f32.vlgmr.msra.gmra.mxu0 %vm770_vm1, %v7378_v10 }
 0x111   : > { %6150 = vmatprep.mubr.msk.f32.mxu1 %vm770_vm1, %v7385_v12  ;;  %6175 = vmatprep.subr.mxu1 %v1098_v11 }
 0x112   : > { %6176 = vmatpush3.msra.mxu1 %v1098_v11  ;;  %6166 = vmatprep.mubr.msk.f32.mxu0 %vm770_vm1, %v7449_v23 }
 0x113   : > { %6177 = vmatprep.subr.mxu1 %v1097_v13 }
 0x114   : > { %6151 = vmatmul.mubr.msk.f32.gmra.mxu1 %vm770_vm1, %v7401_v15  ;;  %6167 = vmatmul.mubr.msk.f32.gmra.mxu0 %vm770_vm1, %v7456_v24 }
 0x115   : > { %6153 = vmatprep.mubr.msk.f32.mxu1 %vm770_vm1, %v7409_v17  ;;  %6178 = vmatpush3.msra.mxu1 %v1097_v13 }
 0x116   : > { %6179 = vmatprep.subr.mxu1 %v1096_v18  ;;  %6169 = vmatprep.mubr.msk.f32.mxu0 %vm770_vm1, %v7463_v25 }
 0x117   : > { %6180 = vmatpush3.msra.mxu1 %v1096_v18  ;;  %v7601_v18 = vld [vmem:[%s7279_s26 + $0x90] sm:$0xff] }
 0x118   : > { %6154 = vmatmul.mubr.msk.f32.gmra.mxu1 %vm770_vm1, %v7422_v20  ;;  %6181 = vmatprep.subr.mxu1 %v1095_v19 }
 0x119   : > { %6156 = vmatprep.mubr.msk.f32.mxu1 %vm770_vm1, %v7427_v21  ;;  %6182 = vmatpush3.msra.mxu1 %v1095_v19  ;;  %v1734_v19 = vsub.f32 %v7598_v14, %v7509_v43 }
 0x11a   : > { %6170 = vmatmul.mubr.msk.f32.gmra.mxu0 %vm770_vm1, %v7470_v26 }
 0x11b   : > { %6172 = vmatprep.mubr.msk.f32.mxu0 %vm770_vm1, %v7477_v27 }
 0x11c   : > { %6157 = vmatmul.mubr.msk.f32.gmra.mxu1 %vm770_vm1, %v7436_v22 }
 0x11d   : > { %6183 = vmatprep.mubr.msk.f32.mxu1 %vm646_vm0, %v7268_v32 }
 0x11e   : > { %6173 = vmatmul.mubr.msk.f32.gmra.mxu0 %vm770_vm1, %v7484_v28 }
 0x11f   : > { %6206 = vmatprep.mubr.msk.f32.mxu0 %vm770_vm1, %v7340_v58 }
 0x120   : > { %6184 = vmatmul.mubr.msk.f32.vlgmr.msra.gmra.mxu1 %vm646_vm0, %v7307_v49 }
 0x121   : > { %6190 = vmatprep.mubr.msk.f32.mxu1 %vm770_vm1, %v7335_v57 }
 0x1d0   : > { %v7490_v29 = vpop.f32.mrf.mxu1  ;;  %v7653_v43 = vpop.f32.mrf.mxu0 }
 0x1d1   : > { %8936 = vst [vmem:[#allocation13_spill] sm:$0xff] %v7653_v43  ;;  %v7707_v43 = vld [vmem:[%s7279_s26 + $0xb0] sm:$0xff] }
 0x1d2   : > { %v7492_v30 = vpop.f32.mrf.mxu1 }
 0x1d4   : > { %v7494_v31 = vpop.f32.mrf.mxu1 }
 0x1d6   : > { %v7496_v33 = vpop.f32.mrf.mxu1 }
 0x1d8   : > { %v7498_v34 = vpop.f32.mrf.mxu1 }
 0x1da   : > { %v7500_v35 = vpop.f32.mrf.mxu1 }
 0x1dc   : > { %v7502_v36 = vpop.f32.mrf.mxu1 }
 0x1de   : > { %v7504_v37 = vpop.f32.mrf.mxu1 }
 0x1e0   : > { %v6185_v38 = vpop.f32.mrf.mxu1 }
 0x1e1   : > { %v1171_v39 = vadd.f32 %v6185_v38, %v7358_v63  ;;  %v1733_v38 = vsub.f32 %v7601_v18, %v7512_v45 }
 0x1e2   : > { %v1165_v40 = vpop.f32.mrf.mxu1 }
 0x1e3   : > { %v1175_v41 = vmax.f32 %v1171_v39, 0.0  ;;  %v1166_v42 = vadd.f32 %v1165_v40, %v7361_v2  ;;  %v7608_v39 = vld [vmem:[%s7279_s26 + $0x88] sm:$0xff]  ;;  %v7617_v40 = vld [vmem:[%s7279_s26 + $0x80] sm:$0xff] }
 0x1e5   : > { %v1174_v44 = vmax.f32 %v1166_v42, 0.0  ;;  %6186 = vmatprep.subr.mxu1 %v1175_v41  ;;  %6202 = vmatprep.subr.mxu0 %v1175_v41  ;;  %v1731_v42 = vsub.f32 %v7617_v40, %v7528_v50 }
 0x1e6   : > { %6187 = vmatpush3.msra.mxu1 %v1175_v41  ;;  %6203 = vmatpush3.msra.mxu0 %v1175_v41  ;;  %v1732_v41 = vsub.f32 %v7608_v39, %v7519_v48 }
 0x1e7   : > { %6188 = vmatprep.subr.mxu1 %v1174_v44  ;;  %6204 = vmatprep.subr.mxu0 %v1174_v44 }
 0x1e8   : > { %6189 = vmatpush3.msra.mxu1 %v1174_v44  ;;  %6205 = vmatpush3.msra.mxu0 %v1174_v44  ;;  %v7655_v44 = vpop.f32.mrf.mxu0 }
 0x1e9   : > { %6191 = vmatmul.mubr.msk.f32.vlgmr.msra.gmra.mxu1 %vm770_vm1, %v7373_v9  ;;  %6207 = vmatmul.mubr.msk.f32.vlgmr.msra.gmra.mxu0 %vm770_vm1, %v7378_v10  ;;  %8937 = vst [vmem:[#allocation14_spill] sm:$0xff] %v7655_v44 }
 0x1ea   : > { %6193 = vmatprep.mubr.msk.f32.mxu1 %vm770_vm1, %v7385_v12  ;;  %6218 = vmatprep.subr.mxu1 %v1416_v46  ;;  %v7657_v45 = vpop.f32.mrf.mxu0 }
 0x1eb   : > { %6219 = vmatpush3.msra.mxu1 %v1416_v46  ;;  %6209 = vmatprep.mubr.msk.f32.mxu0 %vm770_vm1, %v7449_v23  ;;  %8938 = vst [vmem:[#allocation15_spill] sm:$0xff] %v7657_v45  ;;  %v7704_v45 = vld [vmem:[%s7279_s26 + $0xb8] sm:$0xff] }
 0x1ec   : > { %6220 = vmatprep.subr.mxu1 %v1415_v47  ;;  %v7659_v46 = vpop.f32.mrf.mxu0 }
 0x1ed   : > { %6194 = vmatmul.mubr.msk.f32.gmra.mxu1 %vm770_vm1, %v7401_v15  ;;  %6210 = vmatmul.mubr.msk.f32.gmra.mxu0 %vm770_vm1, %v7456_v24  ;;  %8939 = vst [vmem:[#allocation16_spill] sm:$0xff] %v7659_v46 }
 0x1ee   : > { %6196 = vmatprep.mubr.msk.f32.mxu1 %vm770_vm1, %v7409_v17  ;;  %6221 = vmatpush3.msra.mxu1 %v1415_v47  ;;  %v7661_v47 = vpop.f32.mrf.mxu0 }
 0x1ef   : > { %6222 = vmatprep.subr.mxu1 %v1414_v51  ;;  %6212 = vmatprep.mubr.msk.f32.mxu0 %vm770_vm1, %v7463_v25  ;;  %8940 = vst [vmem:[#allocation17_spill] sm:$0xff] %v7661_v47 }
 0x1f0   : > { %6223 = vmatpush3.msra.mxu1 %v1414_v51  ;;  %v7663_v48 = vpop.f32.mrf.mxu0 }
 0x1f1   : > { %6197 = vmatmul.mubr.msk.f32.gmra.mxu1 %vm770_vm1, %v7422_v20  ;;  %6224 = vmatprep.subr.mxu1 %v1413_v52  ;;  %8941 = vst [vmem:[#allocation18_spill] sm:$0xff] %v7663_v48 }
 0x1f2   : > { %6199 = vmatprep.mubr.msk.f32.mxu1 %vm770_vm1, %v7427_v21  ;;  %6225 = vmatpush3.msra.mxu1 %v1413_v52  ;;  %v7665_v50 = vpop.f32.mrf.mxu0 }
 0x1f3   : > { %6213 = vmatmul.mubr.msk.f32.gmra.mxu0 %vm770_vm1, %v7470_v26  ;;  %8942 = vst [vmem:[#allocation19_spill] sm:$0xff] %v7665_v50 }
 0x1f4   : > { %6215 = vmatprep.mubr.msk.f32.mxu0 %vm770_vm1, %v7477_v27  ;;  %v7667_v51 = vpop.f32.mrf.mxu0 }
 0x1f5   : > { %6200 = vmatmul.mubr.msk.f32.gmra.mxu1 %vm770_vm1, %v7436_v22  ;;  %8943 = vst [vmem:[#allocation20_spill] sm:$0xff] %v7667_v51 }
 0x1f6   : > { %6226 = vmatprep.mubr.msk.f32.mxu1 %vm646_vm0, %v7268_v32 }
 0x1f7   : > { %6216 = vmatmul.mubr.msk.f32.gmra.mxu0 %vm770_vm1, %v7484_v28 }
 0x1f8   : > { %6233 = vmatprep.mubr.msk.f32.mxu0 %vm770_vm1, %v7335_v57 }
 0x1f9   : > { %6227 = vmatmul.mubr.msk.f32.vlgmr.msra.gmra.mxu1 %vm646_vm0, %v7307_v49 }
 0x1fa   : > { %6249 = vmatprep.mubr.msk.f32.mxu1 %vm770_vm1, %v7340_v58 }
 0x2a9   : > { %v7579_v60 = vpop.f32.mrf.mxu1  ;;  %v7669_v52 = vpop.f32.mrf.mxu0 }
 0x2aa   : > { %8944 = vst [vmem:[#allocation21_spill] sm:$0xff] %v7669_v52 }
 0x2ab   : > { %v7581_v61 = vpop.f32.mrf.mxu1  ;;  %v7671_v53 = vpop.f32.mrf.mxu0 }
 0x2ac   : > { %8945 = vst [vmem:[#allocation22_spill] sm:$0xff] %v7671_v53 }
 0x2ad   : > { %v7583_v62 = vpop.f32.mrf.mxu1  ;;  %v7673_v54 = vpop.f32.mrf.mxu0 }
 0x2ae   : > { %8946 = vst [vmem:[#allocation23_spill] sm:$0xff] %v7673_v54 }
 0x2af   : > { %v7585_v0 = vpop.f32.mrf.mxu1  ;;  %v7675_v55 = vpop.f32.mrf.mxu0 }
 0x2b0   : > { %8931 = vst [vmem:[#allocation8_spill] sm:$0xff] %v7585_v0  ;;  %8947 = vst [vmem:[#allocation24_spill] sm:$0xff] %v7675_v55 }
 0x2b1   : > { %v7587_v1 = vpop.f32.mrf.mxu1 }
 0x2b2   : > { %8932 = vst [vmem:[#allocation9_spill] sm:$0xff] %v7587_v1 }
 0x2b3   : > { %v7589_v3 = vpop.f32.mrf.mxu1  ;;  %v7677_v56 = vpop.f32.mrf.mxu0 }
 0x2b4   : > { %8933 = vst [vmem:[#allocation10_spill] sm:$0xff] %v7589_v3  ;;  %8948 = vst [vmem:[#allocation25_spill] sm:$0xff] %v7677_v56 }
 0x2b5   : > { %v7591_v4 = vpop.f32.mrf.mxu1  ;;  %v7679_v59 = vpop.f32.mrf.mxu0 }
 0x2b6   : > { %8934 = vst [vmem:[#allocation11_spill] sm:$0xff] %v7591_v4  ;;  %8949 = vst [vmem:[#allocation26_spill] sm:$0xff] %v7679_v59 }
 0x2b7   : > { %v7593_v5 = vpop.f32.mrf.mxu1 }
 0x2b8   : > { %8935 = vst [vmem:[#allocation12_spill] sm:$0xff] %v7593_v5 }
 0x2b9   : > { %v6228_v6 = vpop.f32.mrf.mxu1 }
 0x2ba   : > { %v1489_v7 = vadd.f32 %v6228_v6, %v7358_v63  ;;  %v7681_v6 = vpop.f32.mrf.mxu0 }
 0x2bb   : > { %v1483_v8 = vpop.f32.mrf.mxu1  ;;  %8950 = vst [vmem:[#allocation27_spill] sm:$0xff] %v7681_v6 }
 0x2bc   : > { %v1493_v11 = vmax.f32 %v1489_v7, 0.0  ;;  %v1484_v13 = vadd.f32 %v1483_v8, %v7361_v2  ;;  %v7683_v7 = vpop.f32.mrf.mxu0 }
 0x2bd   : > { %8951 = vst [vmem:[#allocation28_spill] sm:$0xff] %v7683_v7  ;;  %v2052_v7 = vsub.f32 %v7704_v45, %v7598_v14  ;;  %v7723_v14 = vld [vmem:[%s7279_s26 + $0xa0] sm:$0xff] }
 0x2be   : > { %v1492_v16 = vmax.f32 %v1484_v13, 0.0  ;;  %6229 = vmatprep.subr.mxu0 %v1493_v11  ;;  %6245 = vmatprep.subr.mxu1 %v1493_v11 }
 0x2bf   : > { %6230 = vmatpush3.msra.mxu0 %v1493_v11  ;;  %6246 = vmatpush3.msra.mxu1 %v1493_v11 }
 0x2c0   : > { %6231 = vmatprep.subr.mxu0 %v1492_v16  ;;  %6247 = vmatprep.subr.mxu1 %v1492_v16 }
 0x2c1   : > { %6232 = vmatpush3.msra.mxu0 %v1492_v16  ;;  %6248 = vmatpush3.msra.mxu1 %v1492_v16 }
 0x2c2   : > { %6234 = vmatmul.mubr.msk.f32.vlgmr.msra.gmra.mxu0 %vm770_vm1, %v7373_v9  ;;  %6250 = vmatmul.mubr.msk.f32.vlgmr.msra.gmra.mxu1 %vm770_vm1, %v7378_v10 }
 0x2c3   : > { %6236 = vmatprep.mubr.msk.f32.mxu0 %vm770_vm1, %v7385_v12  ;;  %6261 = vmatprep.subr.mxu0 %v1734_v19 }
 0x2c4   : > { %6262 = vmatpush3.msra.mxu0 %v1734_v19  ;;  %6252 = vmatprep.mubr.msk.f32.mxu1 %vm770_vm1, %v7449_v23 }
 0x2c5   : > { %6263 = vmatprep.subr.mxu0 %v1733_v38 }
 0x2c6   : > { %6237 = vmatmul.mubr.msk.f32.gmra.mxu0 %vm770_vm1, %v7401_v15  ;;  %6253 = vmatmul.mubr.msk.f32.gmra.mxu1 %vm770_vm1, %v7456_v24 }
 0x2c7   : > { %6239 = vmatprep.mubr.msk.f32.mxu0 %vm770_vm1, %v7409_v17  ;;  %6264 = vmatpush3.msra.mxu0 %v1733_v38 }
 0x2c8   : > { %6265 = vmatprep.subr.mxu0 %v1732_v41  ;;  %6255 = vmatprep.mubr.msk.f32.mxu1 %vm770_vm1, %v7463_v25 }
 0x2c9   : > { %6266 = vmatpush3.msra.mxu0 %v1732_v41 }
 0x2ca   : > { %6240 = vmatmul.mubr.msk.f32.gmra.mxu0 %vm770_vm1, %v7422_v20  ;;  %6267 = vmatprep.subr.mxu0 %v1731_v42 }
 0x2cb   : > { %6242 = vmatprep.mubr.msk.f32.mxu0 %vm770_vm1, %v7427_v21  ;;  %6268 = vmatpush3.msra.mxu0 %v1731_v42 }
 0x2cc   : > { %6256 = vmatmul.mubr.msk.f32.gmra.mxu1 %vm770_vm1, %v7470_v26 }
 0x2cd   : > { %6258 = vmatprep.mubr.msk.f32.mxu1 %vm770_vm1, %v7477_v27 }
 0x2ce   : > { %6243 = vmatmul.mubr.msk.f32.gmra.mxu0 %vm770_vm1, %v7436_v22 }
 0x2cf   : > { %6269 = vmatprep.mubr.msk.f32.mxu0 %vm646_vm0, %v7268_v32 }
 0x2d0   : > { %6259 = vmatmul.mubr.msk.f32.gmra.mxu1 %vm770_vm1, %v7484_v28 }
 0x2d1   : > { %6276 = vmatprep.mubr.msk.f32.mxu1 %vm770_vm1, %v7335_v57 }
 0x2d2   : > { %6270 = vmatmul.mubr.msk.f32.vlgmr.msra.gmra.mxu0 %vm646_vm0, %v7307_v49 }
 0x2d3   : > { %6292 = vmatprep.mubr.msk.f32.mxu0 %vm770_vm1, %v7340_v58 }
 0x382   : > { %v7685_v8 = vpop.f32.mrf.mxu0 }
 0x383   : > { %8952 = vst [vmem:[#allocation29_spill] sm:$0xff] %v7685_v8 }
 0x384   : > { %v7687_v11 = vpop.f32.mrf.mxu0 }
 0x385   : > { %8953 = vst [vmem:[#allocation30_spill] sm:$0xff] %v7687_v11 }
 0x386   : > { %v7689_v13 = vpop.f32.mrf.mxu0 }
 0x387   : > { %8954 = vst [vmem:[#allocation31_spill] sm:$0xff] %v7689_v13 }
 0x388   : > { %v7691_v16 = vpop.f32.mrf.mxu0 }
 0x389   : > { %8955 = vst [vmem:[#allocation32_spill] sm:$0xff] %v7691_v16 }
 0x38a   : > { %v7693_v19 = vpop.f32.mrf.mxu0 }
 0x38b   : > { %8956 = vst [vmem:[#allocation33_spill] sm:$0xff] %v7693_v19 }
 0x38c   : > { %v7695_v38 = vpop.f32.mrf.mxu0 }
 0x38d   : > { %8957 = vst [vmem:[#allocation34_spill] sm:$0xff] %v7695_v38 }
 0x38e   : > { %v7697_v41 = vpop.f32.mrf.mxu0 }
 0x38f   : > { %8958 = vst [vmem:[#allocation35_spill] sm:$0xff] %v7697_v41 }
 0x390   : > { %v7699_v42 = vpop.f32.mrf.mxu0 }
 0x391   : > { %8959 = vst [vmem:[#allocation36_spill] sm:$0xff] %v7699_v42 }
 0x392   : > { %v6271_v51 = vpop.f32.mrf.mxu0 }
 0x393   : > { %v1807_v50 = vadd.f32 %v6271_v51, %v7358_v63 }
 0x394   : > { %v1801_v48 = vpop.f32.mrf.mxu0 }
 0x395   : > { %v1811_v47 = vmax.f32 %v1807_v50, 0.0  ;;  %v1802_v46 = vadd.f32 %v1801_v48, %v7361_v2  ;;  %v2051_v48 = vsub.f32 %v7707_v43, %v7601_v18  ;;  %v7714_v50 = vld [vmem:[%s7279_s26 + $0xa8] sm:$0xff]  ;;  %v2049_v18 = vsub.f32 %v7723_v14, %v7617_v40 }
 0x397   : > { %v1810_v44 = vmax.f32 %v1802_v46, 0.0  ;;  %6272 = vmatprep.subr.mxu1 %v1811_v47  ;;  %6288 = vmatprep.subr.mxu0 %v1811_v47 }
 0x398   : > { %6273 = vmatpush3.msra.mxu1 %v1811_v47  ;;  %6289 = vmatpush3.msra.mxu0 %v1811_v47 }
 0x399   : > { %6274 = vmatprep.subr.mxu1 %v1810_v44  ;;  %6290 = vmatprep.subr.mxu0 %v1810_v44 }
 0x39a   : > { %6275 = vmatpush3.msra.mxu1 %v1810_v44  ;;  %6291 = vmatpush3.msra.mxu0 %v1810_v44  ;;  %v2050_v44 = vsub.f32 %v7714_v50, %v7608_v39  ;;  %v7759_v39 = vpop.f32.mrf.mxu1 }
 0x39b   : > { %6277 = vmatmul.mubr.msk.f32.vlgmr.msra.gmra.mxu1 %vm770_vm1, %v7373_v9  ;;  %6293 = vmatmul.mubr.msk.f32.vlgmr.msra.gmra.mxu0 %vm770_vm1, %v7378_v10  ;;  %8960 = vst [vmem:[#allocation37_spill] sm:$0xff] %v7759_v39  ;;  %v7797_v39 = vld [vmem:[%s7279_s26 + $0xd0] sm:$0xff] }
 0x39c   : > { %6279 = vmatprep.mubr.msk.f32.mxu1 %vm770_vm1, %v7385_v12  ;;  %6304 = vmatprep.subr.mxu1 %v2052_v7  ;;  %v7761_v40 = vpop.f32.mrf.mxu1 }
 0x39d   : > { %6305 = vmatpush3.msra.mxu1 %v2052_v7  ;;  %6295 = vmatprep.mubr.msk.f32.mxu0 %vm770_vm1, %v7449_v23  ;;  %8961 = vst [vmem:[#allocation38_spill] sm:$0xff] %v7761_v40 }
 0x39e   : > { %6306 = vmatprep.subr.mxu1 %v2051_v48  ;;  %v7763_v46 = vpop.f32.mrf.mxu1 }
 0x39f   : > { %6280 = vmatmul.mubr.msk.f32.gmra.mxu1 %vm770_vm1, %v7401_v15  ;;  %6296 = vmatmul.mubr.msk.f32.gmra.mxu0 %vm770_vm1, %v7456_v24  ;;  %8962 = vst [vmem:[#allocation39_spill] sm:$0xff] %v7763_v46  ;;  %v7794_v46 = vld [vmem:[%s7279_s26 + $0xd8] sm:$0xff] }
 0x3a0   : > { %6282 = vmatprep.mubr.msk.f32.mxu1 %vm770_vm1, %v7409_v17  ;;  %6307 = vmatpush3.msra.mxu1 %v2051_v48  ;;  %v7765_v47 = vpop.f32.mrf.mxu1 }
 0x3a1   : > { %6308 = vmatprep.subr.mxu1 %v2050_v44  ;;  %6298 = vmatprep.mubr.msk.f32.mxu0 %vm770_vm1, %v7463_v25  ;;  %8963 = vst [vmem:[#allocation40_spill] sm:$0xff] %v7765_v47 }
 0x3a2   : > { %6309 = vmatpush3.msra.mxu1 %v2050_v44  ;;  %v7767_v51 = vpop.f32.mrf.mxu1 }
 0x3a3   : > { %6283 = vmatmul.mubr.msk.f32.gmra.mxu1 %vm770_vm1, %v7422_v20  ;;  %6310 = vmatprep.subr.mxu1 %v2049_v18  ;;  %8964 = vst [vmem:[#allocation41_spill] sm:$0xff] %v7767_v51 }
 0x3a4   : > { %6285 = vmatprep.mubr.msk.f32.mxu1 %vm770_vm1, %v7427_v21  ;;  %6311 = vmatpush3.msra.mxu1 %v2049_v18  ;;  %v7769_v7 = vpop.f32.mrf.mxu1 }
 0x3a5   : > { %6299 = vmatmul.mubr.msk.f32.gmra.mxu0 %vm770_vm1, %v7470_v26  ;;  %8965 = vst [vmem:[#allocation42_spill] sm:$0xff] %v7769_v7 }
 0x3a6   : > { %6301 = vmatprep.mubr.msk.f32.mxu0 %vm770_vm1, %v7477_v27  ;;  %v7771_v48 = vpop.f32.mrf.mxu1 }
 0x3a7   : > { %6286 = vmatmul.mubr.msk.f32.gmra.mxu1 %vm770_vm1, %v7436_v22  ;;  %8966 = vst [vmem:[#allocation43_spill] sm:$0xff] %v7771_v48 }
 0x3a8   : > { %6312 = vmatprep.mubr.msk.f32.mxu1 %vm646_vm0, %v7268_v32  ;;  %v7773_v44 = vpop.f32.mrf.mxu1 }
 0x3a9   : > { %6302 = vmatmul.mubr.msk.f32.gmra.mxu0 %vm770_vm1, %v7484_v28  ;;  %8967 = vst [vmem:[#allocation44_spill] sm:$0xff] %v7773_v44 }
 0x3aa   : > { %6319 = vmatprep.mubr.msk.f32.mxu0 %vm770_vm1, %v7335_v57 }
 0x3ab   : > { %6313 = vmatmul.mubr.msk.f32.vlgmr.msra.gmra.mxu1 %vm646_vm0, %v7307_v49 }
 0x3ac   : > { %6335 = vmatprep.mubr.msk.f32.mxu1 %vm770_vm1, %v7340_v58 }
 0x45b   : > { %v7775_v18 = vpop.f32.mrf.mxu1 }
 0x45c   : > { %8968 = vst [vmem:[#allocation45_spill] sm:$0xff] %v7775_v18 }
 0x45d   : > { %v7777_v6 = vpop.f32.mrf.mxu1 }
 0x45e   : > { %8969 = vst [vmem:[#allocation46_spill] sm:$0xff] %v7777_v6 }
 0x45f   : > { %v7779_v59 = vpop.f32.mrf.mxu1 }
 0x460   : > { %8970 = vst [vmem:[#allocation47_spill] sm:$0xff] %v7779_v59  ;;  %v5665_v59 = vld [vmem:[%s7279_s26 + $0xf8] sm:$0xff] }
 0x461   : > { %v7781_v56 = vpop.f32.mrf.mxu1 }
 0x462   : > { %8971 = vst [vmem:[#allocation48_spill] sm:$0xff] %v7781_v56 }
 0x463   : > { %v7783_v55 = vpop.f32.mrf.mxu1 }
 0x464   : > { %8972 = vst [vmem:[#allocation49_spill] sm:$0xff] %v7783_v55 }
 0x465   : > { %v7785_v54 = vpop.f32.mrf.mxu1 }
 0x466   : > { %8973 = vst [vmem:[#allocation50_spill] sm:$0xff] %v7785_v54 }
 0x467   : > { %v7787_v53 = vpop.f32.mrf.mxu1 }
 0x468   : > { %8974 = vst [vmem:[#allocation51_spill] sm:$0xff] %v7787_v53 }
 0x469   : > { %v7789_v52 = vpop.f32.mrf.mxu1 }
 0x46a   : > { %8975 = vst [vmem:[#allocation52_spill] sm:$0xff] %v7789_v52  ;;  %v2370_v52 = vsub.f32 %v7794_v46, %v7704_v45  ;;  %v7813_v45 = vld [vmem:[%s7279_s26 + $0xc0] sm:$0xff] }
 0x46b   : > { %v6314_v48 = vpop.f32.mrf.mxu1 }
 0x46c   : > { %v2125_v44 = vadd.f32 %v6314_v48, %v7358_v63  ;;  %v7804_v48 = vld [vmem:[%s7279_s26 + $0xc8] sm:$0xff] }
 0x46d   : > { %v2119_v7 = vpop.f32.mrf.mxu1 }
 0x46e   : > { %v2129_v51 = vmax.f32 %v2125_v44, 0.0  ;;  %v2120_v47 = vadd.f32 %v2119_v7, %v7361_v2  ;;  %v2369_v7 = vsub.f32 %v7797_v39, %v7707_v43  ;;  %v2367_v43 = vsub.f32 %v7813_v45, %v7723_v14 }
 0x470   : > { %v2128_v40 = vmax.f32 %v2120_v47, 0.0  ;;  %6315 = vmatprep.subr.mxu0 %v2129_v51  ;;  %6331 = vmatprep.subr.mxu1 %v2129_v51 }
 0x471   : > { %6316 = vmatpush3.msra.mxu0 %v2129_v51  ;;  %6332 = vmatpush3.msra.mxu1 %v2129_v51 }
 0x472   : > { %6317 = vmatprep.subr.mxu0 %v2128_v40  ;;  %6333 = vmatprep.subr.mxu1 %v2128_v40 }
 0x473   : > { %6318 = vmatpush3.msra.mxu0 %v2128_v40  ;;  %6334 = vmatpush3.msra.mxu1 %v2128_v40  ;;  %v2368_v40 = vsub.f32 %v7804_v48, %v7714_v50 }
 0x474   : > { %6320 = vmatmul.mubr.msk.f32.vlgmr.msra.gmra.mxu0 %vm770_vm1, %v7373_v9  ;;  %6336 = vmatmul.mubr.msk.f32.vlgmr.msra.gmra.mxu1 %vm770_vm1, %v7378_v10 }
 0x475   : > { %6322 = vmatprep.mubr.msk.f32.mxu0 %vm770_vm1, %v7385_v12  ;;  %6347 = vmatprep.subr.mxu0 %v2370_v52 }
 0x476   : > { %6348 = vmatpush3.msra.mxu0 %v2370_v52  ;;  %6338 = vmatprep.mubr.msk.f32.mxu1 %vm770_vm1, %v7449_v23  ;;  %v7849_v52 = vpop.f32.mrf.mxu0 }
 0x477   : > { %6349 = vmatprep.subr.mxu0 %v2369_v7  ;;  %8976 = vst [vmem:[#allocation53_spill] sm:$0xff] %v7849_v52 }
 0x478   : > { %6323 = vmatmul.mubr.msk.f32.gmra.mxu0 %vm770_vm1, %v7401_v15  ;;  %6339 = vmatmul.mubr.msk.f32.gmra.mxu1 %vm770_vm1, %v7456_v24  ;;  %v7851_v50 = vpop.f32.mrf.mxu0 }
 0x479   : > { %6325 = vmatprep.mubr.msk.f32.mxu0 %vm770_vm1, %v7409_v17  ;;  %6350 = vmatpush3.msra.mxu0 %v2369_v7  ;;  %8977 = vst [vmem:[#allocation54_spill] sm:$0xff] %v7851_v50 }
 0x47a   : > { %6351 = vmatprep.subr.mxu0 %v2368_v40  ;;  %6341 = vmatprep.mubr.msk.f32.mxu1 %vm770_vm1, %v7463_v25  ;;  %v7853_v14 = vpop.f32.mrf.mxu0 }
 0x47b   : > { %6352 = vmatpush3.msra.mxu0 %v2368_v40  ;;  %8978 = vst [vmem:[#allocation55_spill] sm:$0xff] %v7853_v14 }
 0x47c   : > { %6326 = vmatmul.mubr.msk.f32.gmra.mxu0 %vm770_vm1, %v7422_v20  ;;  %6353 = vmatprep.subr.mxu0 %v2367_v43  ;;  %v7855_v47 = vpop.f32.mrf.mxu0 }
 0x47d   : > { %6328 = vmatprep.mubr.msk.f32.mxu0 %vm770_vm1, %v7427_v21  ;;  %6354 = vmatpush3.msra.mxu0 %v2367_v43  ;;  %8979 = vst [vmem:[#allocation56_spill] sm:$0xff] %v7855_v47 }
 0x47e   : > { %6342 = vmatmul.mubr.msk.f32.gmra.mxu1 %vm770_vm1, %v7470_v26  ;;  %v7857_v51 = vpop.f32.mrf.mxu0 }
 0x47f   : > { %6344 = vmatprep.mubr.msk.f32.mxu1 %vm770_vm1, %v7477_v27  ;;  %8980 = vst [vmem:[#allocation57_spill] sm:$0xff] %v7857_v51 }
 0x480   : > { %6329 = vmatmul.mubr.msk.f32.gmra.mxu0 %vm770_vm1, %v7436_v22  ;;  %v7859_v44 = vpop.f32.mrf.mxu0 }
 0x481   : > { %6355 = vmatprep.mubr.msk.f32.mxu0 %vm646_vm0, %v7268_v32  ;;  %8981 = vst [vmem:[#allocation58_spill] sm:$0xff] %v7859_v44 }
 0x482   : > { %6345 = vmatmul.mubr.msk.f32.gmra.mxu1 %vm770_vm1, %v7484_v28  ;;  %v7861_v7 = vpop.f32.mrf.mxu0 }
 0x483   : > { %6362 = vmatprep.mubr.msk.f32.mxu1 %vm770_vm1, %v7335_v57  ;;  %8982 = vst [vmem:[#allocation59_spill] sm:$0xff] %v7861_v7 }
 0x484   : > { %6356 = vmatmul.mubr.msk.f32.vlgmr.msra.gmra.mxu0 %vm646_vm0, %v7307_v49  ;;  %v7863_v40 = vpop.f32.mrf.mxu0 }
 0x485   : > { %6378 = vmatprep.mubr.msk.f32.mxu0 %vm770_vm1, %v7340_v58  ;;  %8983 = vst [vmem:[#allocation60_spill] sm:$0xff] %v7863_v40 }
 0x534   : > { %v7865_v43 = vpop.f32.mrf.mxu0 }
 0x535   : > { %8984 = vst [vmem:[#allocation61_spill] sm:$0xff] %v7865_v43 }
 0x536   : > { %v7867_v53 = vpop.f32.mrf.mxu0 }
 0x537   : > { %8985 = vst [vmem:[#allocation62_spill] sm:$0xff] %v7867_v53 }
 0x538   : > { %v7869_v54 = vpop.f32.mrf.mxu0 }
 0x539   : > { %8986 = vst [vmem:[#allocation63_spill] sm:$0xff] %v7869_v54 }
 0x53a   : > { %v7871_v55 = vpop.f32.mrf.mxu0 }
 0x53b   : > { %8987 = vst [vmem:[#allocation64_spill] sm:$0xff] %v7871_v55 }
 0x53c   : > { %v7873_v56 = vpop.f32.mrf.mxu0 }
 0x53d   : > { %8988 = vst [vmem:[#allocation65_spill] sm:$0xff] %v7873_v56  ;;  %v5664_v56 = vld [vmem:[%s7279_s26 + $0xf0] sm:$0xff] }
 0x53e   : > { %v7875_v47 = vpop.f32.mrf.mxu0 }
 0x53f   : > { %8989 = vst [vmem:[#allocation66_spill] sm:$0xff] %v7875_v47 }
 0x540   : > { %v7877_v51 = vpop.f32.mrf.mxu0 }
 0x541   : > { %8990 = vst [vmem:[#allocation67_spill] sm:$0xff] %v7877_v51  ;;  %v2688_v51 = vsub.f32 %v5665_v59, %v7794_v46 }
 0x542   : > { %v7879_v44 = vpop.f32.mrf.mxu0 }
 0x543   : > { %8991 = vst [vmem:[#allocation68_spill] sm:$0xff] %v7879_v44  ;;  %v5663_v44 = vld [vmem:[%s7279_s26 + $0xe8] sm:$0xff] }
 0x544   : > { %v6357_v7 = vpop.f32.mrf.mxu0  ;;  %v2686_v59 = vsub.f32 %v5663_v44, %v7804_v48 }
 0x545   : > { %v2443_v40 = vadd.f32 %v6357_v7, %v7358_v63  ;;  %v2687_v7 = vsub.f32 %v5664_v56, %v7797_v39  ;;  %v7927_v56 = vpop.f32.mrf.mxu1 }
 0x546   : > { %v2437_v14 = vpop.f32.mrf.mxu0  ;;  %8992 = vst [vmem:[#allocation69_spill] sm:$0xff] %v7927_v56 }
 0x547   : > { %v2447_v43 = vmax.f32 %v2443_v40, 0.0  ;;  %v2438_v53 = vadd.f32 %v2437_v14, %v7361_v2  ;;  %v7929_v39 = vpop.f32.mrf.mxu1 }
 0x548   : > { %8993 = vst [vmem:[#allocation70_spill] sm:$0xff] %v7929_v39 }
 0x549   : > { %v2446_v54 = vmax.f32 %v2438_v53, 0.0  ;;  %6358 = vmatprep.subr.mxu1 %v2447_v43  ;;  %6374 = vmatprep.subr.mxu0 %v2447_v43  ;;  %v5662_v53 = vld [vmem:[%s7279_s26 + $0xe0] sm:$0xff]  ;;  %v7931_v46 = vpop.f32.mrf.mxu1  ;;  %s7007_s26 = scalar_lea.vmem %s5438_s1, 64 }
 0x54a   : > { %6359 = vmatpush3.msra.mxu1 %v2447_v43  ;;  %6375 = vmatpush3.msra.mxu0 %v2447_v43  ;;  %8994 = vst [vmem:[#allocation71_spill] sm:$0xff] %v7931_v46  ;;  %p7008_p13 = scmp.ne.s32.totalorder %s5438_s1, %s7007_s26  ;;  %p7015_p3 = scmp.lt.s32.totalorder %s7013_s16, %s7007_s26 }
 0x54b   : > { %6360 = vmatprep.subr.mxu1 %v2446_v54  ;;  %6376 = vmatprep.subr.mxu0 %v2446_v54  ;;  %v7933_v48 = vpop.f32.mrf.mxu1 }
 0x54c   : > { %6361 = vmatpush3.msra.mxu1 %v2446_v54  ;;  %6377 = vmatpush3.msra.mxu0 %v2446_v54  ;;  %v2685_v54 = vsub.f32 %v5662_v53, %v7813_v45  ;;  %8995 = vst [vmem:[#allocation72_spill] sm:$0xff] %v7933_v48  ;;  %p7009_p0 = pnand %p7008_p13, %p7176_p6  ;;  %p7016_p4 = por %p7015_p3, %p7014_p2 }
 0x54d   : > { %6363 = vmatmul.mubr.msk.f32.vlgmr.msra.gmra.mxu1 %vm770_vm1, %v7373_v9  ;;  %6379 = vmatmul.mubr.msk.f32.vlgmr.msra.gmra.mxu0 %vm770_vm1, %v7378_v10 }
 0x54e   : > { %6365 = vmatprep.mubr.msk.f32.mxu1 %vm770_vm1, %v7385_v12  ;;  %6390 = vmatprep.subr.mxu1 %v2688_v51  ;;  %p7010_p1 = pneg %p7009_p0 }
 0x54f   : > { %6391 = vmatpush3.msra.mxu1 %v2688_v51  ;;  %6381 = vmatprep.mubr.msk.f32.mxu0 %vm770_vm1, %v7449_v23 }
 0x550   : > { %6392 = vmatprep.subr.mxu1 %v2687_v7  ;;  %p7017_p5 = pnand %p7016_p4, %p7010_p1 }
 0x551   : > { %6366 = vmatmul.mubr.msk.f32.gmra.mxu1 %vm770_vm1, %v7401_v15  ;;  %6382 = vmatmul.mubr.msk.f32.gmra.mxu0 %vm770_vm1, %v7456_v24 }
 0x552   : > { %6368 = vmatprep.mubr.msk.f32.mxu1 %vm770_vm1, %v7409_v17  ;;  %6393 = vmatpush3.msra.mxu1 %v2687_v7 }
 0x553   : > { %6394 = vmatprep.subr.mxu1 %v2686_v59  ;;  %6384 = vmatprep.mubr.msk.f32.mxu0 %vm770_vm1, %v7463_v25 }
 0x554   : > { %6395 = vmatpush3.msra.mxu1 %v2686_v59 }
 0x555   : > { %6369 = vmatmul.mubr.msk.f32.gmra.mxu1 %vm770_vm1, %v7422_v20  ;;  %6396 = vmatprep.subr.mxu1 %v2685_v54 }
 0x556   : > { %6371 = vmatprep.mubr.msk.f32.mxu1 %vm770_vm1, %v7427_v21  ;;  %6397 = vmatpush3.msra.mxu1 %v2685_v54 }
 0x557   : > { %6385 = vmatmul.mubr.msk.f32.gmra.mxu0 %vm770_vm1, %v7470_v26 }
 0x558   : > { %6387 = vmatprep.mubr.msk.f32.mxu0 %vm770_vm1, %v7477_v27 }
 0x559   : > { %6372 = vmatmul.mubr.msk.f32.gmra.mxu1 %vm770_vm1, %v7436_v22 }
 0x55a   : > { %6398 = vmatprep.mubr.msk.f32.mxu1 %vm646_vm0, %v7268_v32  ;;  %v7935_v32 = vpop.f32.mrf.mxu1 }
 0x55b   : > { %6388 = vmatmul.mubr.msk.f32.gmra.mxu0 %vm770_vm1, %v7484_v28  ;;  %8996 = vst [vmem:[#allocation73_spill] sm:$0xff] %v7935_v32 }
 0x55c   : > { %6405 = vmatprep.mubr.msk.f32.mxu0 %vm770_vm1, %v7335_v57  ;;  %v7937_v45 = vpop.f32.mrf.mxu1 }
 0x55d   : > { %6399 = vmatmul.mubr.msk.f32.vlgmr.msra.gmra.mxu1 %vm646_vm0, %v7307_v49  ;;  %8997 = vst [vmem:[#allocation74_spill] sm:$0xff] %v7937_v45 }
 0x55e   : > { %6421 = vmatprep.mubr.msk.f32.mxu1 %vm770_vm1, %v7340_v58  ;;  %v7939_v14 = vpop.f32.mrf.mxu1 }
 0x55f   : > { %8998 = vst [vmem:[#allocation75_spill] sm:$0xff] %v7939_v14 }
 0x560   : > { %v7941_v57 = vpop.f32.mrf.mxu1 }
 0x561   : > { %8999 = vst [vmem:[#allocation76_spill] sm:$0xff] %v7941_v57 }
 0x60d   : > { %v7943_v49 = vpop.f32.mrf.mxu1 }
 0x60e   : > { %9000 = vst [vmem:[#allocation77_spill] sm:$0xff] %v7943_v49 }
 0x60f   : > { %v7945_v51 = vpop.f32.mrf.mxu1 }
 0x610   : > { %9001 = vst [vmem:[#allocation78_spill] sm:$0xff] %v7945_v51 }
 0x611   : > { %v7947_v58 = vpop.f32.mrf.mxu1 }
 0x612   : > { %9002 = vst [vmem:[#allocation79_spill] sm:$0xff] %v7947_v58 }
 0x613   : > { %v7949_v44 = vpop.f32.mrf.mxu1 }
 0x614   : > { %9003 = vst [vmem:[#allocation80_spill] sm:$0xff] %v7949_v44 }
 0x615   : > { %v7951_v40 = vpop.f32.mrf.mxu1 }
 0x616   : > { %9004 = vst [vmem:[#allocation81_spill] sm:$0xff] %v7951_v40 }
 0x617   : > { %v7953_v43 = vpop.f32.mrf.mxu1 }
 0x618   : > { %9005 = vst [vmem:[#allocation82_spill] sm:$0xff] %v7953_v43  ;;  %v8125_v43 = vpop.permute.xlu0 %907 }
 0x619   : > { %v7955_v7 = vpop.f32.mrf.mxu1 }
 0x61a   : > { %9006 = vst [vmem:[#allocation83_spill] sm:$0xff] %v7955_v7 }
 0x61b   : > { %v7957_v53 = vpop.f32.mrf.mxu1 }
 0x61c   : > { %9007 = vst [vmem:[#allocation84_spill] sm:$0xff] %v7957_v53  ;;  %v8133_v50 = vpop.permute.xlu0 %732 }
 0x61d   : > { %v6400_v59 = vpop.f32.mrf.mxu1 }
 0x61e   : > { %v2761_v54 = vadd.f32 %v6400_v59, %v7358_v63  ;;  %v8912_v63 = vmov 0.0  }
 0x61f   : > { %v2755_v47 = vpop.f32.mrf.mxu1 }
 0x620   : > { %v2765_v55 = vmax.f32 %v2761_v54, 0.0  ;;  %v2756_v49 = vadd.f32 %v2755_v47, %v7361_v2  ;;  %v7992_v2 = vld [vmem:[%s8905_s7] sm:$0xff]  ;;  %v8109_v47 = vpop.f32.mrf.mxu0  ;;  %v8117_v54 = vpop.permute.xlu1 %737 }
 0x621   : > { %v8143_v45 = vpop.permute.xlu0 %902  ;;  %v867_v56 = vadd.f32 %v7490_v29, %v8117_v54 }
 0x622   : > { %v2764_v51 = vmax.f32 %v2756_v49, 0.0  ;;  %6401 = vmatprep.subr.mxu0 %v2765_v55  ;;  %6417 = vmatprep.subr.mxu1 %v2765_v55  ;;  %v8111_v49 = vpop.f32.mrf.mxu0 }
 0x623   : > { %6402 = vmatpush3.msra.mxu0 %v2765_v55  ;;  %6418 = vmatpush3.msra.mxu1 %v2765_v55  ;;  %v8099_v55 = vld [vmem:[%s8906_s8 + $0x38] sm:$0xff] }
 0x624   : > { %6403 = vmatprep.subr.mxu0 %v2764_v51  ;;  %6419 = vmatprep.subr.mxu1 %v2764_v51  ;;  %v8123_v7 = vpop.permute.xlu1 %747 }
 0x625   : > { %6404 = vmatpush3.msra.mxu0 %v2764_v51  ;;  %6420 = vmatpush3.msra.mxu1 %v2764_v51  ;;  %v8113_v51 = vpop.f32.mrf.mxu0 }
 0x626   : > { %6406 = vmatmul.mubr.msk.f32.vlgmr.msra.gmra.mxu0 %vm770_vm1, %v7373_v9  ;;  %6422 = vmatmul.mubr.msk.f32.vlgmr.msra.gmra.mxu1 %vm770_vm1, %v7378_v10  ;;  %v7997_v9 = vld [vmem:[%s8906_s8] sm:$0xff]  ;;  %v8010_v10 = vld [vmem:[%s8905_s7 + $0x8] sm:$0xff]  ;;  %9008 = vst [vmem:[#allocation85_spill] sm:$0xff] %v8113_v51 }
 0x627   : > { %6408 = vmatprep.mubr.msk.f32.mxu0 %vm770_vm1, %v7385_v12  ;;  %6424 = vmatprep.mubr.msk.f32.mxu1 %vm770_vm1, %v7449_v23  ;;  %v8015_v12 = vld [vmem:[%s8906_s8 + $0x8] sm:$0xff]  ;;  %v8053_v23 = vld [vmem:[%s8906_s8 + $0x20] sm:$0xff]  ;;  %v8115_v59 = vpop.f32.mrf.mxu0 }
 0x628   : > { %6433 = vmatprep.subr.mxu0 %v8912_v63  ;;  %6447 = vmatprep.subr.mxu1 %v8912_v63  ;;  %9009 = vst [vmem:[#allocation86_spill] sm:$0xff] %v8115_v59  ;;  %v8129_v44 = vpop.permute.xlu1 %917 }
 0x629   : > { %6434 = vmatpush3.msra.mxu0 %v8912_v63  ;;  %6448 = vmatpush3.msra.mxu1 %v8912_v63  ;;  %v8119_v63 = vpop.f32.mrf.mxu0 }
 0x62a   : > { %6409 = vmatmul.mubr.msk.f32.gmra.mxu0 %vm770_vm1, %v7401_v15  ;;  %6425 = vmatmul.mubr.msk.f32.gmra.mxu1 %vm770_vm1, %v7456_v24  ;;  %v8020_v15 = vld [vmem:[%s8905_s7 + $0x10] sm:$0xff]  ;;  %v8066_v24 = vld [vmem:[%s8905_s7 + $0x28] sm:$0xff]  ;;  %9010 = vst [vmem:[#allocation87_spill] sm:$0xff] %v8119_v63 }
 0x62b   : > { %6411 = vmatprep.mubr.msk.f32.mxu0 %vm770_vm1, %v7409_v17  ;;  %6427 = vmatprep.mubr.msk.f32.mxu1 %vm770_vm1, %v7463_v25  ;;  %v8025_v17 = vld [vmem:[%s8906_s8 + $0x10] sm:$0xff]  ;;  %v8071_v25 = vld [vmem:[%s8906_s8 + $0x28] sm:$0xff]  ;;  %v8121_v53 = vpop.f32.mrf.mxu0 }
 0x62c   : > { %9011 = vst [vmem:[#allocation88_spill] sm:$0xff] %v8121_v53  ;;  %v8139_v42 = vpop.permute.xlu1 %742 }
 0x62d   : > { %v8127_v40 = vpop.f32.mrf.mxu0  ;;  %v872_v0 = vadd.f32 %v7496_v33, %v8139_v42 }
 0x62e   : > { %6412 = vmatmul.mubr.msk.f32.gmra.mxu0 %vm770_vm1, %v7422_v20  ;;  %6428 = vmatmul.mubr.msk.f32.gmra.mxu1 %vm770_vm1, %v7470_v26  ;;  %v8038_v20 = vld [vmem:[%s8905_s7 + $0x18] sm:$0xff]  ;;  %v8076_v26 = vld [vmem:[%s8905_s7 + $0x30] sm:$0xff]  ;;  %9012 = vst [vmem:[#allocation89_spill] sm:$0xff] %v8127_v40 }
 0x62f   : > { %6414 = vmatprep.mubr.msk.f32.mxu0 %vm770_vm1, %v7427_v21  ;;  %6430 = vmatprep.mubr.msk.f32.mxu1 %vm770_vm1, %v7477_v27  ;;  %v8043_v21 = vld [vmem:[%s8906_s8 + $0x18] sm:$0xff]  ;;  %v8081_v27 = vld [vmem:[%s8906_s8 + $0x30] sm:$0xff]  ;;  %v8131_v58 = vpop.f32.mrf.mxu0 }
 0x630   : > { %9013 = vst [vmem:[#allocation90_spill] sm:$0xff] %v8131_v58  ;;  %v8147_v19 = vpop.permute.xlu1 %912 }
 0x632   : > { %6415 = vmatmul.mubr.msk.f32.gmra.mxu0 %vm770_vm1, %v7436_v22  ;;  %6431 = vmatmul.mubr.msk.f32.gmra.mxu1 %vm770_vm1, %v7484_v28  ;;  %v8048_v22 = vld [vmem:[%s8905_s7 + $0x20] sm:$0xff]  ;;  %v8094_v28 = vld [vmem:[%s8905_s7 + $0x38] sm:$0xff] }
 0x633   : > { %6435 = vmatprep.mubr.msk.f32.mxu0 %vm770_vm1, %v7992_v2  ;;  %6449 = vmatprep.mubr.msk.f32.mxu1 %vm770_vm1, %v7997_v9 }
 0x636   : > { %6436 = vmatmul.mubr.msk.f32.vlgmr.msra.gmra.mxu0 %vm770_vm1, %v8010_v10  ;;  %6450 = vmatmul.mubr.msk.f32.vlgmr.msra.gmra.mxu1 %vm770_vm1, %v8015_v12 }
 0x637   : > { %6438 = vmatprep.mubr.msk.f32.mxu0 %vm770_vm1, %v8020_v15  ;;  %6452 = vmatprep.mubr.msk.f32.mxu1 %vm770_vm1, %v8025_v17 }
 0x63a   : > { %6439 = vmatmul.mubr.msk.f32.gmra.mxu0 %vm770_vm1, %v8038_v20  ;;  %6453 = vmatmul.mubr.msk.f32.gmra.mxu1 %vm770_vm1, %v8043_v21 }
 0x63b   : > { %6441 = vmatprep.mubr.msk.f32.mxu0 %vm770_vm1, %v8048_v22  ;;  %6455 = vmatprep.mubr.msk.f32.mxu1 %vm770_vm1, %v8053_v23 }
 0x63e   : > { %6442 = vmatmul.mubr.msk.f32.gmra.mxu0 %vm770_vm1, %v8066_v24  ;;  %6456 = vmatmul.mubr.msk.f32.gmra.mxu1 %vm770_vm1, %v8071_v25 }
 0x63f   : > { %6444 = vmatprep.mubr.msk.f32.mxu0 %vm770_vm1, %v8076_v26  ;;  %6458 = vmatprep.mubr.msk.f32.mxu1 %vm770_vm1, %v8081_v27 }
 0x642   : > { %6445 = vmatmul.mubr.msk.f32.gmra.mxu0 %vm770_vm1, %v8094_v28  ;;  %6459 = vmatmul.mubr.msk.f32.gmra.mxu1 %vm770_vm1, %v8099_v55 }
 0x643   : > { %6465 = vmatprep.mubr.msk.f32.mxu0 %vm770_vm1, %v7992_v2  ;;  %6481 = vmatprep.mubr.msk.f32.mxu1 %vm770_vm1, %v7997_v9 }
 0x6e6   : > { %v8135_v6 = vpop.f32.mrf.mxu0  ;;  %v6423_v52 = vpop.f32.mrf.mxu1 }
 0x6e7   : > { %9014 = vst [vmem:[#allocation91_spill] sm:$0xff] %v8135_v6 }
 0x6e8   : > { %v8137_v18 = vpop.f32.mrf.mxu0  ;;  %v2937_v57 = vpop.f32.mrf.mxu1 }
 0x6e9   : > { %9015 = vst [vmem:[#allocation92_spill] sm:$0xff] %v8137_v18  ;;  %v8153_v18 = vpop.permute.xlu0 %757  ;;  %v2938_v5 = vadd.f32 %v2937_v57, %v8143_v45 }
 0x6ea   : > { %v8141_v14 = vpop.f32.mrf.mxu0  ;;  %v6426_v41 = vpop.f32.mrf.mxu1  ;;  %v887_v51 = vadd.f32 %v7498_v34, %v8153_v18 }
 0x6eb   : > { %9016 = vst [vmem:[#allocation93_spill] sm:$0xff] %v8141_v14  ;;  %v8159_v14 = vpop.permute.xlu1 %927 }
 0x6ec   : > { %v8145_v38 = vpop.f32.mrf.mxu0  ;;  %v2947_v32 = vpop.f32.mrf.mxu1 }
 0x6ed   : > { %9017 = vst [vmem:[#allocation94_spill] sm:$0xff] %v8145_v38  ;;  %v8168_v58 = vpop.permute.xlu0 %752  ;;  %v2948_v57 = vadd.f32 %v2947_v32, %v8147_v19 }
 0x6ee   : > { %v8149_v48 = vpop.f32.mrf.mxu0  ;;  %v6429_v16 = vpop.f32.mrf.mxu1  ;;  %v882_v32 = vadd.f32 %v7500_v35, %v8168_v58 }
 0x6ef   : > { %9018 = vst [vmem:[#allocation95_spill] sm:$0xff] %v8149_v48  ;;  %v2943_v48 = vadd.f32 %v6423_v52, %v8125_v43  ;;  %v8175_v63 = vpop.permute.xlu1 %922 }
 0x6f0   : > { %v8151_v6 = vpop.f32.mrf.mxu0  ;;  %v2957_v46 = vpop.f32.mrf.mxu1 }
 0x6f1   : > { %9019 = vst [vmem:[#allocation96_spill] sm:$0xff] %v8151_v6 }
 0x6f2   : > { %v8155_v13 = vpop.f32.mrf.mxu0  ;;  %v8157_v39 = vpop.f32.mrf.mxu1 }
 0x6f3   : > { %9020 = vst [vmem:[#allocation97_spill] sm:$0xff] %v8155_v13  ;;  %v862_v13 = vadd.f32 %v7492_v30, %v8133_v50  ;;  %v2953_v30 = vadd.f32 %v6426_v41, %v8129_v44  ;;  %v8188_v34 = vpop.permute.xlu1 %937 }
 0x6f4   : > { %v8161_v11 = vpop.f32.mrf.mxu0  ;;  %v8163_v38 = vpop.f32.mrf.mxu1  ;;  %9022 = vst [vmem:[#allocation99_spill] sm:$0xff] %v8188_v34 }
 0x6f5   : > { %9021 = vst [vmem:[#allocation98_spill] sm:$0xff] %v8161_v11  ;;  %v877_v11 = vadd.f32 %v7494_v31, %v8123_v7 }
 0x6f6   : > { %v6437_v8 = vpop.f32.mrf.mxu0  ;;  %v6451_v6 = vpop.f32.mrf.mxu1 }
 0x6f7   : > { %v3131_v40 = vadd.f32 %v6437_v8, %v867_v56  ;;  %v3276_v4 = vadd.f32 %v6451_v6, %v2943_v48 }
 0x6f8   : > { %v3091_v53 = vpop.f32.mrf.mxu0  ;;  %v3236_v3 = vpop.f32.mrf.mxu1 }
 0x6f9   : > { %v3284_v29 = vmul.f32 0.5, %v3131_v40  ;;  %v3322_v52 = vmul.f32 0.5, %v3276_v4  ;;  %v3130_v1 = vadd.f32 %v3091_v53, %v862_v13  ;;  %v3275_v59 = vadd.f32 %v3236_v3, %v2938_v5  ;;  %v8183_v5 = vpop.permute.xlu0 %767 }
 0x6fa   : > { %v6440_v8 = vpop.f32.mrf.mxu0  ;;  %v6454_v6 = vpop.f32.mrf.mxu1 }
 0x6fb   : > { %6711 = vtanh.f32 %v3284_v29  ;;  %v3283_v56 = vmul.f32 0.5, %v3130_v1  ;;  %v3321_v31 = vmul.f32 0.5, %v3275_v59  ;;  %v3133_v48 = vadd.f32 %v6440_v8, %v877_v11 }
 0x6fc   : > { %6713 = vtanh.f32 %v3322_v52  ;;  %v3278_v4 = vadd.f32 %v6454_v6, %v2953_v30  ;;  %v3101_v13 = vpop.f32.mrf.mxu0  ;;  %v3246_v3 = vpop.f32.mrf.mxu1  ;;  %v2963_v1 = vadd.f32 %v6429_v16, %v8159_v14  ;;  %v2958_v8 = vadd.f32 %v2957_v46, %v8175_v63 }
 0x6fd   : > { %6715 = vtanh.f32 %v3283_v56  ;;  %v3292_v33 = vmul.f32 0.5, %v3133_v48  ;;  %v3132_v41 = vadd.f32 %v3101_v13, %v872_v0  ;;  %v3277_v40 = vadd.f32 %v3246_v3, %v2948_v57  ;;  %v8199_v3 = vpop.permute.xlu1 %932 }
 0x6fe   : > { %6717 = vtanh.f32 %v3321_v31  ;;  %v3330_v11 = vmul.f32 0.5, %v3278_v4  ;;  %v6443_v53 = vpop.f32.mrf.mxu0  ;;  %v6457_v59 = vpop.f32.mrf.mxu1  ;;  %v897_v48 = vadd.f32 %v7502_v36, %v8183_v5  ;;  %9024 = vst [vmem:[#allocation101_spill] sm:$0xff] %v8199_v3 }
 0x6ff   : > { %6719 = vtanh.f32 %v3292_v33  ;;  %v3291_v29 = vmul.f32 0.5, %v3132_v41  ;;  %v3329_v52 = vmul.f32 0.5, %v3277_v40  ;;  %v3135_v30 = vadd.f32 %v6443_v53, %v887_v51  ;;  %v8193_v4 = vpop.permute.xlu0 %762 }
 0x700   : > { %6721 = vtanh.f32 %v3330_v11  ;;  %v3280_v0 = vadd.f32 %v6457_v59, %v2963_v1  ;;  %v3111_v57 = vpop.f32.mrf.mxu0  ;;  %v3256_v6 = vpop.f32.mrf.mxu1  ;;  %9023 = vst [vmem:[#allocation100_spill] sm:$0xff] %v8193_v4  ;;  %v2973_v51 = vadd.f32 %v8157_v39, %v8188_v34  ;;  %v892_v13 = vadd.f32 %v7504_v37, %v8193_v4 }
 0x701   : > { %6723 = vtanh.f32 %v3291_v29  ;;  %v3134_v35 = vadd.f32 %v3111_v57, %v882_v32  ;;  %v3279_v16 = vadd.f32 %v3256_v6, %v2958_v8  ;;  %v2968_v40 = vadd.f32 %v8163_v38, %v8199_v3 }
 0x702   : > { %6725 = vtanh.f32 %v3329_v52  ;;  %v6446_v56 = vpop.f32.mrf.mxu0  ;;  %v6460_v31 = vpop.f32.mrf.mxu1 }
 0x703   : > { %6727 = vtanh.f32 %v3135_v30  ;;  %v3137_v33 = vadd.f32 %v6446_v56, %v897_v48  ;;  %v3282_v36 = vadd.f32 %v6460_v31, %v2973_v51 }
 0x704   : > { %6729 = vtanh.f32 %v3280_v0  ;;  %v3121_v46 = vpop.f32.mrf.mxu0  ;;  %v3266_v41 = vpop.f32.mrf.mxu1 }
 0x705   : > { %6731 = vtanh.f32 %v3134_v35  ;;  %v3136_v32 = vadd.f32 %v3121_v46, %v892_v13  ;;  %v3281_v11 = vadd.f32 %v3266_v41, %v2968_v40  ;;  %v3302_v39 = vmul.f32 0.5, %v3137_v33 }
 0x706   : > { %6733 = vtanh.f32 %v3279_v16  ;;  %v3340_v29 = vmul.f32 0.5, %v3282_v36 }
 0x707   : > { %v3301_v37 = vmul.f32 0.5, %v3136_v32  ;;  %v3339_v57 = vmul.f32 0.5, %v3281_v11  ;;  %6735 = vtanh.f32 %v3302_v39 }
 0x708   : > { %v6712_v1 = vpop.eup %6711  ;;  %6737 = vtanh.f32 %v3340_v29 }
 0x709   : > { %v6714_v53 = vpop.eup %6713  ;;  %v3288_v30 = vadd.f32 1.0, %v6712_v1  ;;  %6739 = vtanh.f32 %v3301_v37 }
 0x70a   : > { %v6716_v59 = vpop.eup %6715  ;;  %v3326_v0 = vadd.f32 1.0, %v6714_v53  ;;  %6741 = vtanh.f32 %v3339_v57 }
 0x70b   : > { %v6718_v52 = vpop.eup %6717  ;;  %v3287_v35 = vadd.f32 1.0, %v6716_v59  ;;  %v3290_v51 = vmul.f32 0.5, %v3288_v30 }
 0x70c   : > { %v6720_v8 = vpop.eup %6719  ;;  %v3325_v16 = vadd.f32 1.0, %v6718_v52  ;;  %v3328_v41 = vmul.f32 0.5, %v3326_v0 }
 0x70d   : > { %v6722_v6 = vpop.eup %6721  ;;  %v3296_v56 = vadd.f32 1.0, %v6720_v8  ;;  %v3289_v1 = vmul.f32 0.5, %v3287_v35 }
 0x70e   : > { %v6724_v38 = vpop.eup %6723  ;;  %v3334_v31 = vadd.f32 1.0, %v6722_v6  ;;  %v3327_v8 = vmul.f32 0.5, %v3325_v16 }
 0x70f   : > { %v6726_v48 = vpop.eup %6725  ;;  %v3298_v46 = vmul.f32 0.5, %v3296_v56  ;;  %v3295_v13 = vadd.f32 1.0, %v6724_v38 }
 0x710   : > { %v6728_v33 = vpop.eup %6727  ;;  %v3336_v40 = vmul.f32 0.5, %v3334_v31  ;;  %v3333_v36 = vadd.f32 1.0, %v6726_v48 }
 0x711   : > { %v6730_v32 = vpop.eup %6729  ;;  %v3310_v11 = vmul.f32 0.0, %v3298_v46  ;;  %v3297_v53 = vmul.f32 0.5, %v3295_v13  ;;  %v3312_v59 = vmul.f32 %v6728_v33, %v3290_v51 }
 0x712   : > { %v6732_v39 = vpop.eup %6731  ;;  %v3348_v52 = vmul.f32 0.0, %v3336_v40  ;;  %v3335_v6 = vmul.f32 0.5, %v3333_v36  ;;  %v3350_v29 = vmul.f32 %v6730_v32, %v3328_v41 }
 0x713   : > { %v6734_v3 = vpop.eup %6733  ;;  %v3309_v30 = vmul.f32 0.0, %v3297_v53  ;;  %v8203_v56 = vadd.f32 %v3312_v59, %v3310_v11  ;;  %v3311_v37 = vmul.f32 %v6732_v39, %v3289_v1 }
 0x714   : > { %v3347_v38 = vmul.f32 0.0, %v3335_v6  ;;  %v8205_v0 = vadd.f32 %v3350_v29, %v3348_v52  ;;  %v3349_v31 = vmul.f32 %v6734_v3, %v3327_v8  ;;  %v6736_v16 = vpop.eup %6735 }
 0x715   : > { %v8207_v57 = vadd.f32 %v3311_v37, %v3309_v30  ;;  %6743 = vtanh.f32 %v8203_v56  ;;  %v6738_v48 = vpop.eup %6737  ;;  %v3306_v13 = vadd.f32 1.0, %v6736_v16  ;;  %v1248_v30 = vadd.f32 %v7579_v60, %v8117_v54 }
 0x716   : > { %v8210_v35 = vadd.f32 %v3349_v31, %v3347_v38  ;;  %6745 = vtanh.f32 %v8205_v0  ;;  %v6740_v51 = vpop.eup %6739  ;;  %v3344_v33 = vadd.f32 1.0, %v6738_v48  ;;  %v2625_v37 = vadd.f32 %v8109_v47, %v8125_v43 }
 0x717   : > { %6747 = vtanh.f32 %v8207_v57  ;;  %v6742_v46 = vpop.eup %6741  ;;  %v3305_v41 = vadd.f32 1.0, %v6740_v51  ;;  %v3308_v40 = vmul.f32 0.5, %v3306_v13  ;;  %v1243_v31 = vadd.f32 %v7581_v61, %v8133_v50  ;;  %v9028_v61 = vld [vmem:[#allocation8_spill] sm:$0xff] }
 0x718   : > { %6749 = vtanh.f32 %v8210_v35  ;;  %v3343_v3 = vadd.f32 1.0, %v6742_v46  ;;  %v3346_v32 = vmul.f32 0.5, %v3344_v33  ;;  %v2620_v51 = vadd.f32 %v8111_v49, %v8143_v45 }
 0x719   : > { %v3307_v11 = vmul.f32 0.5, %v3305_v41  ;;  %v1258_v33 = vadd.f32 %v7583_v62, %v8123_v7 }
 0x71a   : > { %v3345_v39 = vmul.f32 0.5, %v3343_v3 }
 0x722   : > { %v6744_v36 = vpop.eup %6743 }
 0x723   : > { %v6746_v1 = vpop.eup %6745  ;;  %v8215_v53 = vmul.f32 %v6744_v36, %v3308_v40  ;;  %v9027_v40 = vld [vmem:[#allocation85_spill] sm:$0xff] }
 0x724   : > { %v6748_v59 = vpop.eup %6747  ;;  %v8217_v8 = vmul.f32 %v6746_v1, %v3346_v32  ;;  %v2635_v47 = vadd.f32 %v9027_v40, %v8129_v44  ;;  %v9032_v40 = vld [vmem:[#allocation10_spill] sm:$0xff] }
 0x725   : > { %v6750_v52 = vpop.eup %6749  ;;  %6461 = vmatprep.subr.mxu0 %v8215_v53  ;;  %v8220_v6 = vmul.f32 %v6748_v59, %v3307_v11  ;;  %v1253_v11 = vadd.f32 %v9028_v61, %v8139_v42  ;;  %v9033_v61 = vld [vmem:[#allocation88_spill] sm:$0xff] }
 0x726   : > { %6477 = vmatprep.subr.mxu1 %v8217_v8  ;;  %6462 = vmatpush3.msra.mxu0 %v8215_v53  ;;  %v8224_v29 = vmul.f32 %v6750_v52, %v3345_v39  ;;  %v9029_v52 = vld [vmem:[#allocation86_spill] sm:$0xff] }
 0x727   : > { %9025 = vst [vmem:[#allocation102_spill] sm:$0xff] %v8220_v6  ;;  %6478 = vmatpush3.msra.mxu1 %v8217_v8  ;;  %6463 = vmatprep.subr.mxu0 %v8220_v6 }
 0x728   : > { %9026 = vst [vmem:[#allocation103_spill] sm:$0xff] %v8224_v29  ;;  %6479 = vmatprep.subr.mxu1 %v8224_v29  ;;  %6464 = vmatpush3.msra.mxu0 %v8220_v6 }
 0x729   : > { %6480 = vmatpush3.msra.mxu1 %v8224_v29  ;;  %6466 = vmatmul.mubr.msk.f32.vlgmr.msra.gmra.mxu0 %vm770_vm1, %v8010_v10 }
 0x72a   : > { %6482 = vmatmul.mubr.msk.f32.vlgmr.msra.gmra.mxu1 %vm770_vm1, %v8015_v12  ;;  %6468 = vmatprep.mubr.msk.f32.mxu0 %vm770_vm1, %v8020_v15 }
 0x72b   : > { %6484 = vmatprep.mubr.msk.f32.mxu1 %vm770_vm1, %v8025_v17 }
 0x72d   : > { %6469 = vmatmul.mubr.msk.f32.gmra.mxu0 %vm770_vm1, %v8038_v20 }
 0x72e   : > { %6485 = vmatmul.mubr.msk.f32.gmra.mxu1 %vm770_vm1, %v8043_v21  ;;  %6471 = vmatprep.mubr.msk.f32.mxu0 %vm770_vm1, %v8048_v22 }
 0x72f   : > { %6487 = vmatprep.mubr.msk.f32.mxu1 %vm770_vm1, %v8053_v23 }
 0x731   : > { %6472 = vmatmul.mubr.msk.f32.gmra.mxu0 %vm770_vm1, %v8066_v24 }
 0x732   : > { %6488 = vmatmul.mubr.msk.f32.gmra.mxu1 %vm770_vm1, %v8071_v25  ;;  %6474 = vmatprep.mubr.msk.f32.mxu0 %vm770_vm1, %v8076_v26 }
 0x733   : > { %6490 = vmatprep.mubr.msk.f32.mxu1 %vm770_vm1, %v8081_v27 }
 0x735   : > { %6475 = vmatmul.mubr.msk.f32.gmra.mxu0 %vm770_vm1, %v8094_v28 }
 0x736   : > { %6491 = vmatmul.mubr.msk.f32.gmra.mxu1 %vm770_vm1, %v8099_v55  ;;  %6497 = vmatprep.mubr.msk.f32.mxu0 %vm770_vm1, %v7992_v2 }
 0x737   : > { %6513 = vmatprep.mubr.msk.f32.mxu1 %vm770_vm1, %v7997_v9 }
 0x7e9   : > { %v6467_v38 = vpop.f32.mrf.mxu0 }
 0x7ea   : > { %v3473_v16 = vadd.f32 %v6467_v38, %v1248_v30  ;;  %v6483_v48 = vpop.f32.mrf.mxu1  ;;  %v2630_v30 = vadd.f32 %v9029_v52, %v8147_v19 }
 0x7eb   : > { %v3594_v46 = vadd.f32 %v6483_v48, %v2625_v37  ;;  %v3433_v13 = vpop.f32.mrf.mxu0 }
 0x7ec   : > { %v3602_v41 = vmul.f32 0.5, %v3473_v16  ;;  %v3472_v3 = vadd.f32 %v3433_v13, %v1243_v31  ;;  %v3554_v60 = vpop.f32.mrf.mxu1  ;;  %v9030_v31 = vld [vmem:[#allocation9_spill] sm:$0xff]  ;;  %v9031_v13 = vld [vmem:[#allocation87_spill] sm:$0xff] }
 0x7ed   : > { %v3640_v36 = vmul.f32 0.5, %v3594_v46  ;;  %v3593_v32 = vadd.f32 %v3554_v60, %v2620_v51  ;;  %v6470_v1 = vpop.f32.mrf.mxu0  ;;  %v1268_v16 = vadd.f32 %v9030_v31, %v8153_v18 }
 0x7ee   : > { %6751 = vtanh.f32 %v3602_v41  ;;  %v3601_v59 = vmul.f32 0.5, %v3472_v3  ;;  %v3475_v49 = vadd.f32 %v6470_v1, %v1258_v33  ;;  %v6486_v39 = vpop.f32.mrf.mxu1  ;;  %v2645_v41 = vadd.f32 %v9031_v13, %v8159_v14  ;;  %v9036_v13 = vld [vmem:[#allocation12_spill] sm:$0xff] }
 0x7ef   : > { %6753 = vtanh.f32 %v3640_v36  ;;  %v3639_v62 = vmul.f32 0.5, %v3593_v32  ;;  %v3596_v37 = vadd.f32 %v6486_v39, %v2635_v47  ;;  %v3443_v38 = vpop.f32.mrf.mxu0  ;;  %v1263_v36 = vadd.f32 %v9032_v40, %v8168_v58  ;;  %v9038_v40 = vld [vmem:[#allocation90_spill] sm:$0xff] }
 0x7f0   : > { %6755 = vtanh.f32 %v3601_v59  ;;  %v3610_v48 = vmul.f32 0.5, %v3475_v49  ;;  %v3474_v51 = vadd.f32 %v3443_v38, %v1253_v11  ;;  %v3564_v46 = vpop.f32.mrf.mxu1  ;;  %v2640_v59 = vadd.f32 %v9033_v61, %v8175_v63  ;;  %v9034_v38 = vld [vmem:[#allocation11_spill] sm:$0xff] }
 0x7f1   : > { %6757 = vtanh.f32 %v3639_v62  ;;  %v3648_v33 = vmul.f32 0.5, %v3596_v37  ;;  %v3595_v3 = vadd.f32 %v3564_v46, %v2630_v30  ;;  %v6473_v60 = vpop.f32.mrf.mxu0  ;;  %v1278_v31 = vadd.f32 %v9034_v38, %v8183_v5 }
 0x7f2   : > { %6759 = vtanh.f32 %v3610_v48  ;;  %v3609_v47 = vmul.f32 0.5, %v3474_v51  ;;  %v3477_v32 = vadd.f32 %v6473_v60, %v1268_v16  ;;  %v6489_v1 = vpop.f32.mrf.mxu1  ;;  %v9035_v16 = vld [vmem:[#allocation89_spill] sm:$0xff] }
 0x7f3   : > { %6761 = vtanh.f32 %v3648_v33  ;;  %v3647_v11 = vmul.f32 0.5, %v3595_v3  ;;  %v3598_v49 = vadd.f32 %v6489_v1, %v2645_v41  ;;  %v3453_v39 = vpop.f32.mrf.mxu0  ;;  %v2655_v51 = vadd.f32 %v9035_v16, %v8188_v34  ;;  %v9037_v60 = vld [vmem:[#allocation101_spill] sm:$0xff] }
 0x7f4   : > { %6763 = vtanh.f32 %v3609_v47  ;;  %v3476_v52 = vadd.f32 %v3453_v39, %v1263_v36  ;;  %v3574_v62 = vpop.f32.mrf.mxu1  ;;  %v1273_v41 = vadd.f32 %v9036_v13, %v8193_v4  ;;  %v2650_v36 = vadd.f32 %v9038_v40, %v9037_v60 }
 0x7f5   : > { %6765 = vtanh.f32 %v3647_v11  ;;  %v3597_v30 = vadd.f32 %v3574_v62, %v2640_v59  ;;  %v6476_v37 = vpop.f32.mrf.mxu0 }
 0x7f6   : > { %6767 = vtanh.f32 %v3477_v32  ;;  %v6492_v48 = vpop.f32.mrf.mxu1  ;;  %v3479_v33 = vadd.f32 %v6476_v37, %v1278_v31 }
 0x7f7   : > { %6769 = vtanh.f32 %v3598_v49  ;;  %v3463_v46 = vpop.f32.mrf.mxu0  ;;  %v3600_v47 = vadd.f32 %v6492_v48, %v2655_v51 }
 0x7f8   : > { %6771 = vtanh.f32 %v3476_v52  ;;  %v3584_v3 = vpop.f32.mrf.mxu1  ;;  %v3478_v1 = vadd.f32 %v3463_v46, %v1273_v41  ;;  %v3620_v11 = vmul.f32 0.5, %v3479_v33 }
 0x7f9   : > { %6773 = vtanh.f32 %v3597_v30  ;;  %v3599_v32 = vadd.f32 %v3584_v3, %v2650_v36  ;;  %v3658_v62 = vmul.f32 0.5, %v3600_v47 }
 0x7fa   : > { %v3619_v16 = vmul.f32 0.5, %v3478_v1  ;;  %6775 = vtanh.f32 %v3620_v11 }
 0x7fb   : > { %v6752_v61 = vpop.eup %6751  ;;  %v3657_v52 = vmul.f32 0.5, %v3599_v32  ;;  %6777 = vtanh.f32 %v3658_v62 }
 0x7fc   : > { %v6754_v59 = vpop.eup %6753  ;;  %v3606_v38 = vadd.f32 1.0, %v6752_v61  ;;  %6779 = vtanh.f32 %v3619_v16 }
 0x7fd   : > { %v6756_v39 = vpop.eup %6755  ;;  %v3644_v13 = vadd.f32 1.0, %v6754_v59  ;;  %6781 = vtanh.f32 %v3657_v52 }
 0x7fe   : > { %v6758_v49 = vpop.eup %6757  ;;  %v3605_v31 = vadd.f32 1.0, %v6756_v39  ;;  %v3608_v46 = vmul.f32 0.5, %v3606_v38 }
 0x7ff   : > { %v6760_v29 = vpop.eup %6759  ;;  %v3643_v30 = vadd.f32 1.0, %v6758_v49  ;;  %v3646_v36 = vmul.f32 0.5, %v3644_v13 }
 0x800   : > { %v6762_v37 = vpop.eup %6761  ;;  %v3614_v6 = vadd.f32 1.0, %v6760_v29  ;;  %v3607_v32 = vmul.f32 0.5, %v3605_v31 }
 0x801   : > { %v6764_v40 = vpop.eup %6763  ;;  %v3652_v48 = vadd.f32 1.0, %v6762_v37  ;;  %v3645_v49 = vmul.f32 0.5, %v3643_v30 }
 0x802   : > { %v6766_v51 = vpop.eup %6765  ;;  %v3616_v41 = vmul.f32 0.5, %v3614_v6  ;;  %v3613_v33 = vadd.f32 1.0, %v6764_v40 }
 0x803   : > { %v6768_v3 = vpop.eup %6767  ;;  %v3654_v47 = vmul.f32 0.5, %v3652_v48  ;;  %v3651_v1 = vadd.f32 1.0, %v6766_v51 }
 0x804   : > { %v6770_v61 = vpop.eup %6769  ;;  %v3628_v59 = vmul.f32 %v3616_v41, %v8203_v56  ;;  %v3615_v29 = vmul.f32 0.5, %v3613_v33  ;;  %v3630_v11 = vmul.f32 %v6768_v3, %v3608_v46 }
 0x805   : > { %v6772_v39 = vpop.eup %6771  ;;  %v3666_v62 = vmul.f32 %v3654_v47, %v8205_v0  ;;  %v3653_v37 = vmul.f32 0.5, %v3651_v1  ;;  %v3668_v38 = vmul.f32 %v6770_v61, %v3646_v36 }
 0x806   : > { %v6774_v6 = vpop.eup %6773  ;;  %v3627_v16 = vmul.f32 %v3615_v29, %v8207_v57  ;;  %v8298_v40 = vadd.f32 %v3630_v11, %v3628_v59  ;;  %v3629_v13 = vmul.f32 %v6772_v39, %v3607_v32 }
 0x807   : > { %v3665_v52 = vmul.f32 %v3653_v37, %v8210_v35  ;;  %v8301_v48 = vadd.f32 %v3668_v38, %v3666_v62  ;;  %v3667_v31 = vmul.f32 %v6774_v6, %v3645_v49  ;;  %v6776_v0 = vpop.eup %6775 }
 0x808   : > { %v8303_v56 = vadd.f32 %v3629_v13, %v3627_v16  ;;  %6783 = vtanh.f32 %v8298_v40  ;;  %v6778_v57 = vpop.eup %6777  ;;  %v3624_v35 = vadd.f32 1.0, %v6776_v0  ;;  %v9044_v16 = vld [vmem:[#allocation71_spill] sm:$0xff] }
 0x809   : > { %v8306_v30 = vadd.f32 %v3667_v31, %v3665_v52  ;;  %6785 = vtanh.f32 %v8301_v48  ;;  %v6780_v51 = vpop.eup %6779  ;;  %v3662_v41 = vadd.f32 1.0, %v6778_v57  ;;  %v2317_v13 = vadd.f32 %v9044_v16, %v8129_v44  ;;  %v9045_v57 = vld [vmem:[#allocation32_spill] sm:$0xff] }
 0x80a   : > { %6787 = vtanh.f32 %v8303_v56  ;;  %v6782_v46 = vpop.eup %6781  ;;  %v3623_v33 = vadd.f32 1.0, %v6780_v51  ;;  %v3626_v36 = vmul.f32 0.5, %v3624_v35  ;;  %v1571_v51 = vadd.f32 %v9045_v57, %v8139_v42 }
 0x80b   : > { %6789 = vtanh.f32 %v8306_v30  ;;  %v3661_v3 = vadd.f32 1.0, %v6782_v46  ;;  %v3664_v1 = vmul.f32 0.5, %v3662_v41 }
 0x80c   : > { %v3625_v32 = vmul.f32 0.5, %v3623_v33  ;;  %v9046_v33 = vld [vmem:[#allocation72_spill] sm:$0xff] }
 0x80d   : > { %v3663_v11 = vmul.f32 0.5, %v3661_v3  ;;  %v2312_v3 = vadd.f32 %v9046_v33, %v8147_v19 }
 0x815   : > { %v6784_v47 = vpop.eup %6783 }
 0x816   : > { %v6786_v61 = vpop.eup %6785  ;;  %v8311_v59 = vmul.f32 %v6784_v47, %v3626_v36 }
 0x817   : > { %v6788_v29 = vpop.eup %6787  ;;  %v8313_v39 = vmul.f32 %v6786_v61, %v3664_v1  ;;  %v9047_v61 = vld [vmem:[#allocation33_spill] sm:$0xff] }
 0x818   : > { %v6790_v49 = vpop.eup %6789  ;;  %6493 = vmatprep.subr.mxu0 %v8311_v59  ;;  %v8316_v62 = vmul.f32 %v6788_v29, %v3625_v32  ;;  %v1586_v32 = vadd.f32 %v9047_v61, %v8153_v18 }
 0x819   : > { %6509 = vmatprep.subr.mxu1 %v8313_v39  ;;  %6494 = vmatpush3.msra.mxu0 %v8311_v59  ;;  %v8320_v37 = vmul.f32 %v6790_v49, %v3663_v11 }
 0x81a   : > { %6510 = vmatpush3.msra.mxu1 %v8313_v39  ;;  %6495 = vmatprep.subr.mxu0 %v8316_v62 }
 0x81b   : > { %6511 = vmatprep.subr.mxu1 %v8320_v37  ;;  %6496 = vmatpush3.msra.mxu0 %v8316_v62 }
 0x81c   : > { %6512 = vmatpush3.msra.mxu1 %v8320_v37  ;;  %6498 = vmatmul.mubr.msk.f32.vlgmr.msra.gmra.mxu0 %vm770_vm1, %v8010_v10  ;;  %v9039_v10 = vld [vmem:[#allocation29_spill] sm:$0xff] }
 0x81d   : > { %6514 = vmatmul.mubr.msk.f32.vlgmr.msra.gmra.mxu1 %vm770_vm1, %v8015_v12  ;;  %6500 = vmatprep.mubr.msk.f32.mxu0 %vm770_vm1, %v8020_v15  ;;  %v1566_v12 = vadd.f32 %v9039_v10, %v8117_v54  ;;  %v9040_v15 = vld [vmem:[#allocation69_spill] sm:$0xff] }
 0x81e   : > { %6516 = vmatprep.mubr.msk.f32.mxu1 %vm770_vm1, %v8025_v17  ;;  %v2307_v17 = vadd.f32 %v9040_v15, %v8125_v43  ;;  %v9048_v10 = vld [vmem:[#allocation73_spill] sm:$0xff] }
 0x820   : > { %6501 = vmatmul.mubr.msk.f32.gmra.mxu0 %vm770_vm1, %v8038_v20 }
 0x821   : > { %6517 = vmatmul.mubr.msk.f32.gmra.mxu1 %vm770_vm1, %v8043_v21  ;;  %6503 = vmatprep.mubr.msk.f32.mxu0 %vm770_vm1, %v8048_v22  ;;  %v9041_v21 = vld [vmem:[#allocation30_spill] sm:$0xff] }
 0x822   : > { %6519 = vmatprep.mubr.msk.f32.mxu1 %vm770_vm1, %v8053_v23  ;;  %v1561_v22 = vadd.f32 %v9041_v21, %v8133_v50  ;;  %v9049_v21 = vld [vmem:[#allocation34_spill] sm:$0xff] }
 0x824   : > { %6504 = vmatmul.mubr.msk.f32.gmra.mxu0 %vm770_vm1, %v8066_v24 }
 0x825   : > { %6520 = vmatmul.mubr.msk.f32.gmra.mxu1 %vm770_vm1, %v8071_v25  ;;  %6506 = vmatprep.mubr.msk.f32.mxu0 %vm770_vm1, %v8076_v26  ;;  %v9042_v25 = vld [vmem:[#allocation70_spill] sm:$0xff] }
 0x826   : > { %6522 = vmatprep.mubr.msk.f32.mxu1 %vm770_vm1, %v8081_v27  ;;  %v2302_v26 = vadd.f32 %v9042_v25, %v8143_v45 }
 0x828   : > { %6507 = vmatmul.mubr.msk.f32.gmra.mxu0 %vm770_vm1, %v8094_v28  ;;  %v9043_v28 = vld [vmem:[#allocation31_spill] sm:$0xff] }
 0x829   : > { %6523 = vmatmul.mubr.msk.f32.gmra.mxu1 %vm770_vm1, %v8099_v55  ;;  %6529 = vmatprep.mubr.msk.f32.mxu0 %vm770_vm1, %v7992_v2 }
 0x82a   : > { %6545 = vmatprep.mubr.msk.f32.mxu1 %vm770_vm1, %v7997_v9  ;;  %v1576_v9 = vadd.f32 %v9043_v28, %v8123_v7 }
 0x8dc   : > { %v6499_v20 = vpop.f32.mrf.mxu0 }
 0x8dd   : > { %v3791_v23 = vadd.f32 %v6499_v20, %v1566_v12  ;;  %v6515_v24 = vpop.f32.mrf.mxu1  ;;  %v2327_v12 = vadd.f32 %v9048_v10, %v8159_v14 }
 0x8de   : > { %v3912_v27 = vadd.f32 %v6515_v24, %v2307_v17  ;;  %v3751_v2 = vpop.f32.mrf.mxu0 }
 0x8df   : > { %v3920_v55 = vmul.f32 0.5, %v3791_v23  ;;  %v3790_v38 = vadd.f32 %v3751_v2, %v1561_v22  ;;  %v3872_v6 = vpop.f32.mrf.mxu1  ;;  %v1581_v22 = vadd.f32 %v9049_v21, %v8168_v58 }
 0x8e0   : > { %v3958_v52 = vmul.f32 0.5, %v3912_v27  ;;  %v3911_v31 = vadd.f32 %v3872_v6, %v2302_v26  ;;  %v6502_v0 = vpop.f32.mrf.mxu0  ;;  %v9050_v26 = vld [vmem:[#allocation74_spill] sm:$0xff] }
 0x8e1   : > { %6791 = vtanh.f32 %v3920_v55  ;;  %v3919_v46 = vmul.f32 0.5, %v3790_v38  ;;  %v3793_v35 = vadd.f32 %v6502_v0, %v1576_v9  ;;  %v6518_v41 = vpop.f32.mrf.mxu1  ;;  %v2322_v27 = vadd.f32 %v9050_v26, %v8175_v63  ;;  %v9052_v0 = vld [vmem:[#allocation75_spill] sm:$0xff] }
 0x8e2   : > { %6793 = vtanh.f32 %v3958_v52  ;;  %v3957_v36 = vmul.f32 0.5, %v3911_v31  ;;  %v3914_v47 = vadd.f32 %v6518_v41, %v2317_v13  ;;  %v3761_v1 = vpop.f32.mrf.mxu0  ;;  %v9051_v13 = vld [vmem:[#allocation35_spill] sm:$0xff]  ;;  %v2337_v57 = vadd.f32 %v9052_v0, %v8188_v34 }
 0x8e3   : > { %6795 = vtanh.f32 %v3919_v46  ;;  %v3928_v29 = vmul.f32 0.5, %v3793_v35  ;;  %v3792_v11 = vadd.f32 %v3761_v1, %v1571_v51  ;;  %v3882_v49 = vpop.f32.mrf.mxu1  ;;  %v1596_v52 = vadd.f32 %v9051_v13, %v8183_v5  ;;  %v9053_v46 = vld [vmem:[#allocation36_spill] sm:$0xff] }
 0x8e4   : > { %6797 = vtanh.f32 %v3957_v36  ;;  %v3966_v15 = vmul.f32 0.5, %v3914_v47  ;;  %v3913_v17 = vadd.f32 %v3882_v49, %v2312_v3  ;;  %v6505_v20 = vpop.f32.mrf.mxu0  ;;  %v1591_v35 = vadd.f32 %v9053_v46, %v8193_v4  ;;  %v9054_v3 = vld [vmem:[#allocation76_spill] sm:$0xff] }
 0x8e5   : > { %6799 = vtanh.f32 %v3928_v29  ;;  %v3927_v23 = vmul.f32 0.5, %v3792_v11  ;;  %v3795_v24 = vadd.f32 %v6505_v20, %v1586_v32  ;;  %v6521_v25 = vpop.f32.mrf.mxu1  ;;  %v2332_v36 = vadd.f32 %v9054_v3, %v9037_v60 }
 0x8e6   : > { %6801 = vtanh.f32 %v3966_v15  ;;  %v3965_v2 = vmul.f32 0.5, %v3913_v17  ;;  %v3916_v28 = vadd.f32 %v6521_v25, %v2327_v12  ;;  %v3771_v9 = vpop.f32.mrf.mxu0 }
 0x8e7   : > { %6803 = vtanh.f32 %v3927_v23  ;;  %v3794_v55 = vadd.f32 %v3771_v9, %v1581_v22  ;;  %v3892_v38 = vpop.f32.mrf.mxu1 }
 0x8e8   : > { %6805 = vtanh.f32 %v3965_v2  ;;  %v3915_v6 = vadd.f32 %v3892_v38, %v2322_v27  ;;  %v6508_v16 = vpop.f32.mrf.mxu0 }
 0x8e9   : > { %6807 = vtanh.f32 %v3795_v24  ;;  %v6524_v31 = vpop.f32.mrf.mxu1  ;;  %v3797_v41 = vadd.f32 %v6508_v16, %v1596_v52 }
 0x8ea   : > { %6809 = vtanh.f32 %v3916_v28  ;;  %v3781_v51 = vpop.f32.mrf.mxu0  ;;  %v3918_v47 = vadd.f32 %v6524_v31, %v2337_v57 }
 0x8eb   : > { %6811 = vtanh.f32 %v3794_v55  ;;  %v3902_v33 = vpop.f32.mrf.mxu1  ;;  %v3796_v1 = vadd.f32 %v3781_v51, %v1591_v35  ;;  %v3938_v11 = vmul.f32 0.5, %v3797_v41 }
 0x8ec   : > { %6813 = vtanh.f32 %v3915_v6  ;;  %v3917_v32 = vadd.f32 %v3902_v33, %v2332_v36  ;;  %v3976_v10 = vmul.f32 0.5, %v3918_v47 }
 0x8ed   : > { %v3937_v17 = vmul.f32 0.5, %v3796_v1  ;;  %6815 = vtanh.f32 %v3938_v11 }
 0x8ee   : > { %v6792_v61 = vpop.eup %6791  ;;  %v3975_v22 = vmul.f32 0.5, %v3917_v32  ;;  %6817 = vtanh.f32 %v3976_v10 }
 0x8ef   : > { %v6794_v29 = vpop.eup %6793  ;;  %v3924_v15 = vadd.f32 1.0, %v6792_v61  ;;  %6819 = vtanh.f32 %v3937_v17 }
 0x8f0   : > { %v6796_v49 = vpop.eup %6795  ;;  %v3962_v21 = vadd.f32 1.0, %v6794_v29  ;;  %6821 = vtanh.f32 %v3975_v22 }
 0x8f1   : > { %v6798_v12 = vpop.eup %6797  ;;  %v3923_v24 = vadd.f32 1.0, %v6796_v49  ;;  %v3926_v9 = vmul.f32 0.5, %v3924_v15 }
 0x8f2   : > { %v6800_v20 = vpop.eup %6799  ;;  %v3961_v27 = vadd.f32 1.0, %v6798_v12  ;;  %v3964_v16 = vmul.f32 0.5, %v3962_v21 }
 0x8f3   : > { %v6802_v23 = vpop.eup %6801  ;;  %v3932_v25 = vadd.f32 1.0, %v6800_v20  ;;  %v3925_v0 = vmul.f32 0.5, %v3923_v24 }
 0x8f4   : > { %v6804_v26 = vpop.eup %6803  ;;  %v3970_v2 = vadd.f32 1.0, %v6802_v23  ;;  %v3963_v41 = vmul.f32 0.5, %v3961_v27 }
 0x8f5   : > { %v6806_v28 = vpop.eup %6805  ;;  %v3934_v55 = vmul.f32 0.5, %v3932_v25  ;;  %v3931_v38 = vadd.f32 1.0, %v6804_v26  ;;  %v3638_v26 = vadd.f32 %v8311_v59, %v8215_v53 }
 0x8f6   : > { %v6808_v6 = vpop.eup %6807  ;;  %v3972_v13 = vmul.f32 0.5, %v3970_v2  ;;  %v3969_v52 = vadd.f32 1.0, %v6806_v28 }
 0x8f7   : > { %v6810_v31 = vpop.eup %6809  ;;  %v3946_v57 = vmul.f32 %v3934_v55, %v8298_v40  ;;  %v3933_v51 = vmul.f32 0.5, %v3931_v38  ;;  %v3948_v46 = vmul.f32 %v6808_v6, %v3926_v9  ;;  %v3676_v9 = vadd.f32 %v8313_v39, %v8217_v8 }
 0x8f8   : > { %v6812_v35 = vpop.eup %6811  ;;  %v3984_v33 = vmul.f32 %v3972_v13, %v8301_v48  ;;  %v3971_v3 = vmul.f32 0.5, %v3969_v52  ;;  %v3986_v36 = vmul.f32 %v6810_v31, %v3964_v16  ;;  %v9055_v16 = vld [vmem:[#allocation102_spill] sm:$0xff] }
 0x8f9   : > { %v6814_v47 = vpop.eup %6813  ;;  %v3945_v1 = vmul.f32 %v3933_v51, %v8303_v56  ;;  %v8394_v61 = vadd.f32 %v3948_v46, %v3946_v57  ;;  %v3947_v32 = vmul.f32 %v6812_v35, %v3925_v0  ;;  %v3637_v13 = vadd.f32 %v8316_v62, %v9055_v16  ;;  %v9056_v0 = vld [vmem:[#allocation103_spill] sm:$0xff]  ;;  %v8426_v62 = vld [vmem:[%s8905_s7 + $0x8] sm:$0xff]  ;;  %v8440_v51 = vld [vmem:[%s8905_s7 + $0x10] sm:$0xff] }
 0x8fa   : > { %v3983_v29 = vmul.f32 %v3971_v3, %v8306_v30  ;;  %v8397_v11 = vadd.f32 %v3986_v36, %v3984_v33  ;;  %v3985_v49 = vmul.f32 %v6814_v47, %v3963_v41  ;;  %v6816_v48 = vpop.eup %6815  ;;  %v3675_v57 = vadd.f32 %v8320_v37, %v9056_v0  ;;  %v8433_v37 = vld [vmem:[%s8906_s8 + $0x8] sm:$0xff]  ;;  %v8447_v46 = vld [vmem:[%s8906_s8 + $0x10] sm:$0xff]  ;;  %v8454_v35 = vld [vmem:[%s8905_s7 + $0x18] sm:$0xff] }
 0x8fb   : > { %v8399_v40 = vadd.f32 %v3947_v32, %v3945_v1  ;;  %6823 = vtanh.f32 %v8394_v61  ;;  %v6818_v56 = vpop.eup %6817  ;;  %v3942_v30 = vadd.f32 1.0, %v6816_v48  ;;  %v8461_v41 = vld [vmem:[%s8906_s8 + $0x18] sm:$0xff]  ;;  %v8468_v33 = vld [vmem:[%s8905_s7 + $0x20] sm:$0xff]  ;;  %v8482_v36 = vld [vmem:[%s8905_s7 + $0x28] sm:$0xff] }
 0x8fc   : > { %v8402_v10 = vadd.f32 %v3985_v49, %v3983_v29  ;;  %6825 = vtanh.f32 %v8397_v11  ;;  %v6820_v12 = vpop.eup %6819  ;;  %v3980_v17 = vadd.f32 1.0, %v6818_v56  ;;  %v8475_v3 = vld [vmem:[%s8906_s8 + $0x20] sm:$0xff]  ;;  %v8489_v47 = vld [vmem:[%s8906_s8 + $0x28] sm:$0xff]  ;;  %v8496_v1 = vld [vmem:[%s8905_s7 + $0x30] sm:$0xff] }
 0x8fd   : > { %6827 = vtanh.f32 %v8399_v40  ;;  %v6822_v15 = vpop.eup %6821  ;;  %v3941_v20 = vadd.f32 1.0, %v6820_v12  ;;  %v3944_v22 = vmul.f32 0.5, %v3942_v30  ;;  %v8503_v32 = vld [vmem:[%s8906_s8 + $0x30] sm:$0xff]  ;;  %v8510_v29 = vld [vmem:[%s8905_s7 + $0x38] sm:$0xff]  ;;  %v8524_v48 = vld [vmem:[%s8905_s7] sm:$0xff] }
 0x8fe   : > { %6829 = vtanh.f32 %v8402_v10  ;;  %v3979_v21 = vadd.f32 1.0, %v6822_v15  ;;  %v3982_v24 = vmul.f32 0.5, %v3980_v17  ;;  %v8517_v49 = vld [vmem:[%s8906_s8 + $0x38] sm:$0xff]  ;;  %v8531_v56 = vld [vmem:[%s8906_s8] sm:$0xff]  ;;  %v9057_v12 = vld [vmem:[#allocation45_spill] sm:$0xff] }
 0x8ff   : > { %v3943_v27 = vmul.f32 0.5, %v3941_v20  ;;  %v1884_v15 = vadd.f32 %v9057_v12, %v8117_v54  ;;  %v9058_v30 = vld [vmem:[#allocation53_spill] sm:$0xff]  ;;  %v9062_v16 = vld [vmem:[#allocation55_spill] sm:$0xff] }
 0x900   : > { %v3981_v55 = vmul.f32 0.5, %v3979_v21  ;;  %v1989_v17 = vadd.f32 %v9058_v30, %v8125_v43  ;;  %v9059_v21 = vld [vmem:[#allocation46_spill] sm:$0xff] }
 0x908   : > { %v6824_v23 = vpop.eup %6823 }
 0x909   : > { %v6826_v25 = vpop.eup %6825  ;;  %v3954_v2 = vmul.f32 %v6824_v23, %v3944_v22  ;;  %v1879_v22 = vadd.f32 %v9059_v21, %v8133_v50 }
 0x90a   : > { %v6828_v28 = vpop.eup %6827  ;;  %v3992_v38 = vmul.f32 %v6826_v25, %v3982_v24  ;;  %v9060_v25 = vld [vmem:[#allocation54_spill] sm:$0xff] }
 0x90b   : > { %v6830_v6 = vpop.eup %6829  ;;  %v8413_v52 = vadd.f32 %v3954_v2, %v3638_v26  ;;  %6525 = vmatprep.subr.mxu0 %v3954_v2  ;;  %v3953_v31 = vmul.f32 %v6828_v28, %v3943_v27  ;;  %v1984_v26 = vadd.f32 %v9060_v25, %v8143_v45  ;;  %v9061_v28 = vld [vmem:[#allocation47_spill] sm:$0xff]  ;;  %v9065_v25 = vld [vmem:[#allocation49_spill] sm:$0xff] }
 0x90c   : > { %v8417_v53 = vadd.f32 %v3992_v38, %v3676_v9  ;;  %6541 = vmatprep.subr.mxu1 %v3992_v38  ;;  %6526 = vmatpush3.msra.mxu0 %v3954_v2  ;;  %v3991_v59 = vmul.f32 %v6830_v6, %v3981_v55  ;;  %v1894_v9 = vadd.f32 %v9061_v28, %v8123_v7 }
 0x90d   : > { %6542 = vmatpush3.msra.mxu1 %v3992_v38  ;;  %v8419_v8 = vadd.f32 %v3953_v31, %v3637_v13  ;;  %6527 = vmatprep.subr.mxu0 %v3953_v31  ;;  %v1999_v13 = vadd.f32 %v9062_v16, %v8129_v44 }
 0x90e   : > { %v8421_v39 = vadd.f32 %v3991_v59, %v3675_v57  ;;  %6543 = vmatprep.subr.mxu1 %v3991_v59  ;;  %6528 = vmatpush3.msra.mxu0 %v3953_v31 }
 0x90f   : > { %6544 = vmatpush3.msra.mxu1 %v3991_v59  ;;  %6530 = vmatmul.mubr.msk.f32.vlgmr.msra.gmra.mxu0 %vm770_vm1, %v8426_v62  ;;  %v9063_v59 = vld [vmem:[#allocation48_spill] sm:$0xff] }
 0x910   : > { %6546 = vmatmul.mubr.msk.f32.vlgmr.msra.gmra.mxu1 %vm770_vm1, %v8433_v37  ;;  %6532 = vmatprep.mubr.msk.f32.mxu0 %vm770_vm1, %v8440_v51  ;;  %v1889_v12 = vadd.f32 %v9063_v59, %v8139_v42 }
 0x911   : > { %6548 = vmatprep.mubr.msk.f32.mxu1 %vm770_vm1, %v8447_v46 }
 0x913   : > { %6533 = vmatmul.mubr.msk.f32.gmra.mxu0 %vm770_vm1, %v8454_v35 }
 0x914   : > { %6549 = vmatmul.mubr.msk.f32.gmra.mxu1 %vm770_vm1, %v8461_v41  ;;  %6535 = vmatprep.mubr.msk.f32.mxu0 %vm770_vm1, %v8468_v33 }
 0x915   : > { %6551 = vmatprep.mubr.msk.f32.mxu1 %vm770_vm1, %v8475_v3 }
 0x917   : > { %6536 = vmatmul.mubr.msk.f32.gmra.mxu0 %vm770_vm1, %v8482_v36 }
 0x918   : > { %6552 = vmatmul.mubr.msk.f32.gmra.mxu1 %vm770_vm1, %v8489_v47  ;;  %6538 = vmatprep.mubr.msk.f32.mxu0 %vm770_vm1, %v8496_v1 }
 0x919   : > { %6554 = vmatprep.mubr.msk.f32.mxu1 %vm770_vm1, %v8503_v32 }
 0x91b   : > { %6539 = vmatmul.mubr.msk.f32.gmra.mxu0 %vm770_vm1, %v8510_v29 }
 0x91c   : > { %6555 = vmatmul.mubr.msk.f32.gmra.mxu1 %vm770_vm1, %v8517_v49  ;;  %6561 = vmatprep.mubr.msk.f32.mxu0 %vm770_vm1, %v8524_v48 }
 0x91d   : > { %6577 = vmatprep.mubr.msk.f32.mxu1 %vm770_vm1, %v8531_v56 }
 0x9cf   : > { %v6531_v20 = vpop.f32.mrf.mxu0 }
 0x9d0   : > { %v4109_v23 = vadd.f32 %v6531_v20, %v1884_v15  ;;  %v6547_v24 = vpop.f32.mrf.mxu1  ;;  %v9064_v20 = vld [vmem:[#allocation56_spill] sm:$0xff] }
 0x9d1   : > { %v4230_v27 = vadd.f32 %v6547_v24, %v1989_v17  ;;  %v4069_v2 = vpop.f32.mrf.mxu0  ;;  %v1994_v21 = vadd.f32 %v9064_v20, %v8147_v19 }
 0x9d2   : > { %v4238_v55 = vmul.f32 0.5, %v4109_v23  ;;  %v4108_v38 = vadd.f32 %v4069_v2, %v1879_v22  ;;  %v4190_v6 = vpop.f32.mrf.mxu1  ;;  %v1904_v2 = vadd.f32 %v9065_v25, %v8153_v18  ;;  %v9069_v25 = vld [vmem:[#allocation51_spill] sm:$0xff] }
 0x9d3   : > { %v4276_v31 = vmul.f32 0.5, %v4230_v27  ;;  %v4229_v0 = vadd.f32 %v4190_v6, %v1984_v26  ;;  %v6534_v57 = vpop.f32.mrf.mxu0  ;;  %v9066_v6 = vld [vmem:[#allocation57_spill] sm:$0xff] }
 0x9d4   : > { %6831 = vtanh.f32 %v4238_v55  ;;  %v4237_v15 = vmul.f32 0.5, %v4108_v38  ;;  %v4111_v30 = vadd.f32 %v6534_v57, %v1894_v9  ;;  %v6550_v17 = vpop.f32.mrf.mxu1  ;;  %v2009_v55 = vadd.f32 %v9066_v6, %v8159_v14  ;;  %v9067_v57 = vld [vmem:[#allocation50_spill] sm:$0xff] }
 0x9d5   : > { %6833 = vtanh.f32 %v4276_v31  ;;  %v4275_v23 = vmul.f32 0.5, %v4229_v0  ;;  %v4232_v22 = vadd.f32 %v6550_v17, %v1999_v13  ;;  %v4079_v24 = vpop.f32.mrf.mxu0  ;;  %v1899_v31 = vadd.f32 %v9067_v57, %v8168_v58  ;;  %v9068_v17 = vld [vmem:[#allocation58_spill] sm:$0xff]  ;;  %v9072_v57 = vld [vmem:[#allocation60_spill] sm:$0xff] }
 0x9d6   : > { %6835 = vtanh.f32 %v4237_v15  ;;  %v4246_v26 = vmul.f32 0.5, %v4111_v30  ;;  %v4110_v27 = vadd.f32 %v4079_v24, %v1889_v12  ;;  %v4200_v28 = vpop.f32.mrf.mxu1  ;;  %v2004_v15 = vadd.f32 %v9068_v17, %v8175_v63 }
 0x9d7   : > { %6837 = vtanh.f32 %v4275_v23  ;;  %v4284_v9 = vmul.f32 0.5, %v4232_v22  ;;  %v4231_v38 = vadd.f32 %v4200_v28, %v1994_v21  ;;  %v6537_v16 = vpop.f32.mrf.mxu0  ;;  %v1914_v28 = vadd.f32 %v9069_v25, %v8183_v5 }
 0x9d8   : > { %6839 = vtanh.f32 %v4246_v26  ;;  %v4245_v13 = vmul.f32 0.5, %v4110_v27  ;;  %v4113_v0 = vadd.f32 %v6537_v16, %v1904_v2  ;;  %v6553_v59 = vpop.f32.mrf.mxu1  ;;  %v9070_v2 = vld [vmem:[#allocation59_spill] sm:$0xff] }
 0x9d9   : > { %6841 = vtanh.f32 %v4284_v9  ;;  %v4283_v12 = vmul.f32 0.5, %v4231_v38  ;;  %v4234_v30 = vadd.f32 %v6553_v59, %v2009_v55  ;;  %v4089_v20 = vpop.f32.mrf.mxu0  ;;  %v2019_v27 = vadd.f32 %v9070_v2, %v8188_v34  ;;  %v9071_v9 = vld [vmem:[#allocation52_spill] sm:$0xff] }
 0x9da   : > { %6843 = vtanh.f32 %v4245_v13  ;;  %v4112_v24 = vadd.f32 %v4089_v20, %v1899_v31  ;;  %v4210_v23 = vpop.f32.mrf.mxu1  ;;  %v1909_v55 = vadd.f32 %v9071_v9, %v8193_v4  ;;  %v2014_v31 = vadd.f32 %v9072_v57, %v9037_v60 }
 0x9db   : > { %6845 = vtanh.f32 %v4283_v12  ;;  %v4233_v21 = vadd.f32 %v4210_v23, %v2004_v15  ;;  %v6540_v22 = vpop.f32.mrf.mxu0 }
 0x9dc   : > { %6847 = vtanh.f32 %v4113_v0  ;;  %v6556_v26 = vpop.f32.mrf.mxu1  ;;  %v4115_v38 = vadd.f32 %v6540_v22, %v1914_v28 }
 0x9dd   : > { %6849 = vtanh.f32 %v4234_v30  ;;  %v4099_v6 = vpop.f32.mrf.mxu0  ;;  %v4236_v13 = vadd.f32 %v6556_v26, %v2019_v27 }
 0x9de   : > { %6851 = vtanh.f32 %v4112_v24  ;;  %v4220_v16 = vpop.f32.mrf.mxu1  ;;  %v4114_v59 = vadd.f32 %v4099_v6, %v1909_v55  ;;  %v4256_v12 = vmul.f32 0.5, %v4115_v38 }
 0x9df   : > { %6853 = vtanh.f32 %v4233_v21  ;;  %v4235_v0 = vadd.f32 %v4220_v16, %v2014_v31  ;;  %v4294_v23 = vmul.f32 0.5, %v4236_v13 }
 0x9e0   : > { %v4255_v2 = vmul.f32 0.5, %v4114_v59  ;;  %6855 = vtanh.f32 %v4256_v12 }
 0x9e1   : > { %v6832_v17 = vpop.eup %6831  ;;  %v4293_v24 = vmul.f32 0.5, %v4235_v0  ;;  %6857 = vtanh.f32 %v4294_v23 }
 0x9e2   : > { %v6834_v15 = vpop.eup %6833  ;;  %v4242_v25 = vadd.f32 1.0, %v6832_v17  ;;  %6859 = vtanh.f32 %v4255_v2 }
 0x9e3   : > { %v6836_v20 = vpop.eup %6835  ;;  %v4280_v9 = vadd.f32 1.0, %v6834_v15  ;;  %6861 = vtanh.f32 %v4293_v24 }
 0x9e4   : > { %v6838_v30 = vpop.eup %6837  ;;  %v4241_v28 = vadd.f32 1.0, %v6836_v20  ;;  %v4244_v6 = vmul.f32 0.5, %v4242_v25 }
 0x9e5   : > { %v6840_v34 = vpop.eup %6839  ;;  %v4279_v21 = vadd.f32 1.0, %v6838_v30  ;;  %v4282_v31 = vmul.f32 0.5, %v4280_v9 }
 0x9e6   : > { %v6842_v22 = vpop.eup %6841  ;;  %v4250_v4 = vadd.f32 1.0, %v6840_v34  ;;  %v4243_v0 = vmul.f32 0.5, %v4241_v28 }
 0x9e7   : > { %v6844_v57 = vpop.eup %6843  ;;  %v4288_v26 = vadd.f32 1.0, %v6842_v22  ;;  %v4281_v30 = vmul.f32 0.5, %v4279_v21 }
 0x9e8   : > { %v6846_v27 = vpop.eup %6845  ;;  %v4252_v55 = vmul.f32 0.5, %v4250_v4  ;;  %v4249_v38 = vadd.f32 1.0, %v6844_v57 }
 0x9e9   : > { %v6848_v16 = vpop.eup %6847  ;;  %v4290_v13 = vmul.f32 0.5, %v4288_v26  ;;  %v4287_v59 = vadd.f32 1.0, %v6846_v27 }
 0x9ea   : > { %v6850_v17 = vpop.eup %6849  ;;  %v4264_v15 = vmul.f32 %v4252_v55, %v8394_v61  ;;  %v4251_v34 = vmul.f32 0.5, %v4249_v38  ;;  %v4266_v12 = vmul.f32 %v6848_v16, %v4244_v6 }
 0x9eb   : > { %v6852_v20 = vpop.eup %6851  ;;  %v4302_v23 = vmul.f32 %v4290_v13, %v8397_v11  ;;  %v4289_v22 = vmul.f32 0.5, %v4287_v59  ;;  %v4304_v25 = vmul.f32 %v6850_v17, %v4282_v31 }
 0x9ec   : > { %v6854_v4 = vpop.eup %6853  ;;  %v4263_v2 = vmul.f32 %v4251_v34, %v8399_v40  ;;  %v8570_v57 = vadd.f32 %v4266_v12, %v4264_v15  ;;  %v4265_v9 = vmul.f32 %v6852_v20, %v4243_v0 }
 0x9ed   : > { %v4301_v24 = vmul.f32 %v4289_v22, %v8402_v10  ;;  %v8573_v26 = vadd.f32 %v4304_v25, %v4302_v23  ;;  %v4303_v28 = vmul.f32 %v6854_v4, %v4281_v30  ;;  %v6856_v11 = vpop.eup %6855 }
 0x9ee   : > { %v8575_v61 = vadd.f32 %v4265_v9, %v4263_v2  ;;  %6863 = vtanh.f32 %v8570_v57  ;;  %v6858_v40 = vpop.eup %6857  ;;  %v4260_v10 = vadd.f32 1.0, %v6856_v11 }
 0x9ef   : > { %v8578_v21 = vadd.f32 %v4303_v28, %v4301_v24  ;;  %6865 = vtanh.f32 %v8573_v26  ;;  %v6860_v27 = vpop.eup %6859  ;;  %v4298_v55 = vadd.f32 1.0, %v6858_v40  ;;  %v9075_v28 = vld [vmem:[#allocation62_spill] sm:$0xff] }
 0x9f0   : > { %6867 = vtanh.f32 %v8575_v61  ;;  %v6862_v6 = vpop.eup %6861  ;;  %v4259_v38 = vadd.f32 1.0, %v6860_v27  ;;  %v4262_v31 = vmul.f32 0.5, %v4260_v10  ;;  %v2197_v11 = vadd.f32 %v9075_v28, %v8133_v50 }
 0x9f1   : > { %6869 = vtanh.f32 %v8578_v21  ;;  %v4297_v16 = vadd.f32 1.0, %v6862_v6  ;;  %v4300_v59 = vmul.f32 0.5, %v4298_v55  ;;  %v9076_v6 = vld [vmem:[#allocation38_spill] sm:$0xff] }
 0x9f2   : > { %v4261_v0 = vmul.f32 0.5, %v4259_v38  ;;  %v1666_v10 = vadd.f32 %v9076_v6, %v8143_v45 }
 0x9f3   : > { %v4299_v12 = vmul.f32 0.5, %v4297_v16  ;;  %v9077_v16 = vld [vmem:[#allocation63_spill] sm:$0xff] }
 0x9fb   : > { %v6864_v13 = vpop.eup %6863 }
 0x9fc   : > { %v6866_v17 = vpop.eup %6865  ;;  %v4272_v15 = vmul.f32 %v6864_v13, %v4262_v31  ;;  %v2212_v31 = vadd.f32 %v9077_v16, %v8123_v7 }
 0x9fd   : > { %v6868_v34 = vpop.eup %6867  ;;  %v4310_v20 = vmul.f32 %v6866_v17, %v4300_v59 }
 0x9fe   : > { %v6870_v30 = vpop.eup %6869  ;;  %v8584_v23 = vadd.f32 %v4272_v15, %v8413_v52  ;;  %6557 = vmatprep.subr.mxu0 %v4272_v15  ;;  %v4271_v22 = vmul.f32 %v6868_v34, %v4261_v0  ;;  %v9073_v52 = vld [vmem:[#allocation61_spill] sm:$0xff]  ;;  %v9078_v0 = vld [vmem:[#allocation39_spill] sm:$0xff] }
 0x9ff   : > { %v8587_v25 = vadd.f32 %v4310_v20, %v8417_v53  ;;  %6573 = vmatprep.subr.mxu1 %v4310_v20  ;;  %6558 = vmatpush3.msra.mxu0 %v4272_v15  ;;  %v4309_v4 = vmul.f32 %v6870_v30, %v4299_v12  ;;  %v2202_v53 = vadd.f32 %v9073_v52, %v8117_v54  ;;  %v9079_v30 = vld [vmem:[#allocation64_spill] sm:$0xff] }
 0xa00   : > { %6574 = vmatpush3.msra.mxu1 %v4310_v20  ;;  %v8590_v2 = vadd.f32 %v4271_v22, %v8419_v8  ;;  %6559 = vmatprep.subr.mxu0 %v4271_v22  ;;  %v9074_v8 = vld [vmem:[#allocation37_spill] sm:$0xff]  ;;  %v1681_v15 = vadd.f32 %v9078_v0, %v8129_v44 }
 0xa01   : > { %v8593_v9 = vadd.f32 %v4309_v4, %v8421_v39  ;;  %6575 = vmatprep.subr.mxu1 %v4309_v4  ;;  %6560 = vmatpush3.msra.mxu0 %v4271_v22  ;;  %v1671_v39 = vadd.f32 %v9074_v8, %v8125_v43  ;;  %v2207_v22 = vadd.f32 %v9079_v30, %v8139_v42  ;;  %v9080_v8 = vld [vmem:[#allocation40_spill] sm:$0xff] }
 0xa02   : > { %6576 = vmatpush3.msra.mxu1 %v4309_v4  ;;  %6562 = vmatmul.mubr.msk.f32.vlgmr.msra.gmra.mxu0 %vm770_vm1, %v8426_v62 }
 0xa03   : > { %6578 = vmatmul.mubr.msk.f32.vlgmr.msra.gmra.mxu1 %vm770_vm1, %v8433_v37  ;;  %6564 = vmatprep.mubr.msk.f32.mxu0 %vm770_vm1, %v8440_v51 }
 0xa04   : > { %6580 = vmatprep.mubr.msk.f32.mxu1 %vm770_vm1, %v8447_v46 }
 0xa06   : > { %6565 = vmatmul.mubr.msk.f32.gmra.mxu0 %vm770_vm1, %v8454_v35 }
 0xa07   : > { %6581 = vmatmul.mubr.msk.f32.gmra.mxu1 %vm770_vm1, %v8461_v41  ;;  %6567 = vmatprep.mubr.msk.f32.mxu0 %vm770_vm1, %v8468_v33 }
 0xa08   : > { %6583 = vmatprep.mubr.msk.f32.mxu1 %vm770_vm1, %v8475_v3 }
 0xa0a   : > { %6568 = vmatmul.mubr.msk.f32.gmra.mxu0 %vm770_vm1, %v8482_v36 }
 0xa0b   : > { %6584 = vmatmul.mubr.msk.f32.gmra.mxu1 %vm770_vm1, %v8489_v47  ;;  %6570 = vmatprep.mubr.msk.f32.mxu0 %vm770_vm1, %v8496_v1 }
 0xa0c   : > { %6586 = vmatprep.mubr.msk.f32.mxu1 %vm770_vm1, %v8503_v32 }
 0xa0e   : > { %6571 = vmatmul.mubr.msk.f32.gmra.mxu0 %vm770_vm1, %v8510_v29 }
 0xa0f   : > { %6587 = vmatmul.mubr.msk.f32.gmra.mxu1 %vm770_vm1, %v8517_v49  ;;  %6593 = vmatprep.mubr.msk.f32.mxu0 %vm770_vm1, %v8524_v48 }
 0xa10   : > { %6609 = vmatprep.mubr.msk.f32.mxu1 %vm770_vm1, %v8531_v56 }
 0xac2   : > { %v6563_v24 = vpop.f32.mrf.mxu0 }
 0xac3   : > { %v4427_v40 = vadd.f32 %v6563_v24, %v2202_v53  ;;  %v6579_v27 = vpop.f32.mrf.mxu1 }
 0xac4   : > { %v4548_v55 = vadd.f32 %v6579_v27, %v1671_v39  ;;  %v4387_v38 = vpop.f32.mrf.mxu0  ;;  %v1676_v39 = vadd.f32 %v9080_v8, %v8147_v19 }
 0xac5   : > { %v4556_v13 = vmul.f32 0.5, %v4427_v40  ;;  %v4426_v59 = vadd.f32 %v4387_v38, %v2197_v11  ;;  %v4508_v17 = vpop.f32.mrf.mxu1  ;;  %v9081_v40 = vld [vmem:[#allocation65_spill] sm:$0xff] }
 0xac6   : > { %v4594_v34 = vmul.f32 0.5, %v4548_v55  ;;  %v4547_v12 = vadd.f32 %v4508_v17, %v1666_v10  ;;  %v6566_v20 = vpop.f32.mrf.mxu0  ;;  %v2222_v27 = vadd.f32 %v9081_v40, %v8153_v18  ;;  %v9082_v38 = vld [vmem:[#allocation41_spill] sm:$0xff]  ;;  %v9083_v17 = vld [vmem:[#allocation66_spill] sm:$0xff] }
 0xac7   : > { %6871 = vtanh.f32 %v4556_v13  ;;  %v4555_v4 = vmul.f32 0.5, %v4426_v59  ;;  %v4429_v52 = vadd.f32 %v6566_v20, %v2212_v31  ;;  %v6582_v53 = vpop.f32.mrf.mxu1  ;;  %v1691_v16 = vadd.f32 %v9082_v38, %v8159_v14  ;;  %v9084_v20 = vld [vmem:[#allocation42_spill] sm:$0xff]  ;;  %v9088_v38 = vld [vmem:[#allocation100_spill] sm:$0xff] }
 0xac8   : > { %6873 = vtanh.f32 %v4594_v34  ;;  %v4593_v24 = vmul.f32 0.5, %v4547_v12  ;;  %v4550_v28 = vadd.f32 %v6582_v53, %v1681_v15  ;;  %v4397_v11 = vpop.f32.mrf.mxu0  ;;  %v2217_v0 = vadd.f32 %v9083_v17, %v8168_v58  ;;  %v9090_v17 = vld [vmem:[#allocation44_spill] sm:$0xff] }
 0xac9   : > { %6875 = vtanh.f32 %v4555_v4  ;;  %v4564_v6 = vmul.f32 0.5, %v4429_v52  ;;  %v4428_v10 = vadd.f32 %v4397_v11, %v2207_v22  ;;  %v4518_v55 = vpop.f32.mrf.mxu1  ;;  %v1686_v30 = vadd.f32 %v9084_v20, %v8175_v63 }
 0xaca   : > { %6877 = vtanh.f32 %v4593_v24  ;;  %v4602_v31 = vmul.f32 0.5, %v4550_v28  ;;  %v4549_v13 = vadd.f32 %v4518_v55, %v1676_v39  ;;  %v6569_v59 = vpop.f32.mrf.mxu0  ;;  %v9085_v28 = vld [vmem:[#allocation67_spill] sm:$0xff] }
 0xacb   : > { %6879 = vtanh.f32 %v4564_v6  ;;  %v4563_v15 = vmul.f32 0.5, %v4428_v10  ;;  %v4431_v34 = vadd.f32 %v6569_v59, %v2222_v27  ;;  %v6585_v12 = vpop.f32.mrf.mxu1  ;;  %v2232_v11 = vadd.f32 %v9085_v28, %v8183_v5  ;;  %v9086_v27 = vld [vmem:[#allocation99_spill] sm:$0xff] }
 0xacc   : > { %6881 = vtanh.f32 %v4602_v31  ;;  %v4601_v22 = vmul.f32 0.5, %v4549_v13  ;;  %v4552_v4 = vadd.f32 %v6585_v12, %v1691_v16  ;;  %v4407_v52 = vpop.f32.mrf.mxu0  ;;  %v9087_v6 = vld [vmem:[#allocation43_spill] sm:$0xff]  ;;  %v9089_v31 = vld [vmem:[#allocation68_spill] sm:$0xff] }
 0xacd   : > { %6883 = vtanh.f32 %v4563_v15  ;;  %v4430_v53 = vadd.f32 %v4407_v52, %v2217_v0  ;;  %v4528_v8 = vpop.f32.mrf.mxu1  ;;  %v1701_v10 = vadd.f32 %v9087_v6, %v9086_v27  ;;  %v2227_v16 = vadd.f32 %v9089_v31, %v9088_v38 }
 0xace   : > { %6885 = vtanh.f32 %v4601_v22  ;;  %v4551_v39 = vadd.f32 %v4528_v8, %v1686_v30  ;;  %v6572_v24 = vpop.f32.mrf.mxu0  ;;  %v1696_v0 = vadd.f32 %v9090_v17, %v9037_v60 }
 0xacf   : > { %6887 = vtanh.f32 %v4431_v34  ;;  %v6588_v40 = vpop.f32.mrf.mxu1  ;;  %v4433_v13 = vadd.f32 %v6572_v24, %v2232_v11 }
 0xad0   : > { %6889 = vtanh.f32 %v4552_v4  ;;  %v4417_v55 = vpop.f32.mrf.mxu0  ;;  %v4554_v15 = vadd.f32 %v6588_v40, %v1701_v10 }
 0xad1   : > { %6891 = vtanh.f32 %v4430_v53  ;;  %v4538_v59 = vpop.f32.mrf.mxu1  ;;  %v4432_v12 = vadd.f32 %v4417_v55, %v2227_v16  ;;  %v4574_v22 = vmul.f32 0.5, %v4433_v13 }
 0xad2   : > { %6893 = vtanh.f32 %v4551_v39  ;;  %v4553_v34 = vadd.f32 %v4538_v59, %v1696_v0  ;;  %v4612_v8 = vmul.f32 0.5, %v4554_v15 }
 0xad3   : > { %v4573_v6 = vmul.f32 0.5, %v4432_v12  ;;  %6895 = vtanh.f32 %v4574_v22 }
 0xad4   : > { %v6872_v20 = vpop.eup %6871  ;;  %v4611_v53 = vmul.f32 0.5, %v4553_v34  ;;  %6897 = vtanh.f32 %v4612_v8 }
 0xad5   : > { %v6874_v30 = vpop.eup %6873  ;;  %v4560_v28 = vadd.f32 1.0, %v6872_v20  ;;  %6899 = vtanh.f32 %v4573_v6 }
 0xad6   : > { %v6876_v52 = vpop.eup %6875  ;;  %v4598_v31 = vadd.f32 1.0, %v6874_v30  ;;  %6901 = vtanh.f32 %v4611_v53 }
 0xad7   : > { %v6878_v4 = vpop.eup %6877  ;;  %v4559_v11 = vadd.f32 1.0, %v6876_v52  ;;  %v4562_v55 = vmul.f32 0.5, %v4560_v28 }
 0xad8   : > { %v6880_v27 = vpop.eup %6879  ;;  %v4597_v39 = vadd.f32 1.0, %v6878_v4  ;;  %v4600_v0 = vmul.f32 0.5, %v4598_v31 }
 0xad9   : > { %v6882_v24 = vpop.eup %6881  ;;  %v4568_v38 = vadd.f32 1.0, %v6880_v27  ;;  %v4561_v34 = vmul.f32 0.5, %v4559_v11 }
 0xada   : > { %v6884_v17 = vpop.eup %6883  ;;  %v4606_v40 = vadd.f32 1.0, %v6882_v24  ;;  %v4599_v4 = vmul.f32 0.5, %v4597_v39 }
 0xadb   : > { %v6886_v10 = vpop.eup %6885  ;;  %v4570_v16 = vmul.f32 0.5, %v4568_v38  ;;  %v4567_v13 = vadd.f32 1.0, %v6884_v17 }
 0xadc   : > { %v6888_v59 = vpop.eup %6887  ;;  %v4608_v15 = vmul.f32 0.5, %v4606_v40  ;;  %v4605_v12 = vadd.f32 1.0, %v6886_v10 }
 0xadd   : > { %v6890_v20 = vpop.eup %6889  ;;  %v4582_v30 = vmul.f32 %v4570_v16, %v8570_v57  ;;  %v4569_v27 = vmul.f32 0.5, %v4567_v13  ;;  %v4584_v22 = vmul.f32 %v6888_v59, %v4562_v55 }
 0xade   : > { %v6892_v52 = vpop.eup %6891  ;;  %v4620_v8 = vmul.f32 %v4608_v15, %v8573_v26  ;;  %v4607_v24 = vmul.f32 0.5, %v4605_v12  ;;  %v4622_v28 = vmul.f32 %v6890_v20, %v4600_v0 }
 0xadf   : > { %v6894_v38 = vpop.eup %6893  ;;  %v4581_v6 = vmul.f32 %v4569_v27, %v8575_v61  ;;  %v8662_v17 = vadd.f32 %v4584_v22, %v4582_v30  ;;  %v4583_v31 = vmul.f32 %v6892_v52, %v4561_v34 }
 0xae0   : > { %v4619_v53 = vmul.f32 %v4607_v24, %v8578_v21  ;;  %v8665_v40 = vadd.f32 %v4622_v28, %v4620_v8  ;;  %v4621_v11 = vmul.f32 %v6894_v38, %v4599_v4  ;;  %v6896_v26 = vpop.eup %6895 }
 0xae1   : > { %v8667_v57 = vadd.f32 %v4583_v31, %v4581_v6  ;;  %6903 = vtanh.f32 %v8662_v17  ;;  %v6898_v61 = vpop.eup %6897  ;;  %v4578_v21 = vadd.f32 1.0, %v6896_v26 }
 0xae2   : > { %v8670_v39 = vadd.f32 %v4621_v11, %v4619_v53  ;;  %6905 = vtanh.f32 %v8665_v40  ;;  %v6900_v10 = vpop.eup %6899  ;;  %v4616_v16 = vadd.f32 1.0, %v6898_v61  ;;  %v9093_v11 = vld [vmem:[#allocation78_spill] sm:$0xff] }
 0xae3   : > { %6907 = vtanh.f32 %v8667_v57  ;;  %v6902_v55 = vpop.eup %6901  ;;  %v4577_v13 = vadd.f32 1.0, %v6900_v10  ;;  %v4580_v0 = vmul.f32 0.5, %v4578_v21  ;;  %v2515_v26 = vadd.f32 %v9093_v11, %v8133_v50  ;;  %v9099_v11 = vld [vmem:[#allocation81_spill] sm:$0xff] }
 0xae4   : > { %6909 = vtanh.f32 %v8670_v39  ;;  %v4615_v59 = vadd.f32 1.0, %v6902_v55  ;;  %v4618_v12 = vmul.f32 0.5, %v4616_v16  ;;  %v9094_v55 = vld [vmem:[#allocation22_spill] sm:$0xff] }
 0xae5   : > { %v4579_v34 = vmul.f32 0.5, %v4577_v13  ;;  %v1348_v21 = vadd.f32 %v9094_v55, %v8143_v45  ;;  %v9095_v13 = vld [vmem:[#allocation79_spill] sm:$0xff] }
 0xae6   : > { %v4617_v22 = vmul.f32 0.5, %v4615_v59 }
 0xaee   : > { %v6904_v15 = vpop.eup %6903 }
 0xaef   : > { %v6906_v20 = vpop.eup %6905  ;;  %v4590_v30 = vmul.f32 %v6904_v15, %v4580_v0 }
 0xaf0   : > { %v6908_v27 = vpop.eup %6907  ;;  %v4628_v52 = vmul.f32 %v6906_v20, %v4618_v12  ;;  %v9096_v12 = vld [vmem:[#allocation23_spill] sm:$0xff] }
 0xaf1   : > { %v6910_v4 = vpop.eup %6909  ;;  %v8676_v8 = vadd.f32 %v4590_v30, %v8584_v23  ;;  %6589 = vmatprep.subr.mxu0 %v4590_v30  ;;  %v4589_v24 = vmul.f32 %v6908_v27, %v4579_v34  ;;  %v9091_v23 = vld [vmem:[#allocation77_spill] sm:$0xff]  ;;  %v1363_v20 = vadd.f32 %v9096_v12, %v8129_v44 }
 0xaf2   : > { %v8679_v28 = vadd.f32 %v4628_v52, %v8587_v25  ;;  %6605 = vmatprep.subr.mxu1 %v4628_v52  ;;  %6590 = vmatpush3.msra.mxu0 %v4590_v30  ;;  %v4627_v38 = vmul.f32 %v6910_v4, %v4617_v22  ;;  %v2520_v25 = vadd.f32 %v9091_v23, %v8117_v54  ;;  %v9097_v22 = vld [vmem:[#allocation80_spill] sm:$0xff] }
 0xaf3   : > { %6606 = vmatpush3.msra.mxu1 %v4628_v52  ;;  %v8682_v6 = vadd.f32 %v4589_v24, %v8590_v2  ;;  %6591 = vmatprep.subr.mxu0 %v4589_v24  ;;  %v9092_v2 = vld [vmem:[#allocation21_spill] sm:$0xff]  ;;  %v2525_v52 = vadd.f32 %v9097_v22, %v8139_v42  ;;  %v9098_v23 = vld [vmem:[#allocation24_spill] sm:$0xff] }
 0xaf4   : > { %v8685_v31 = vadd.f32 %v4627_v38, %v8593_v9  ;;  %6607 = vmatprep.subr.mxu1 %v4627_v38  ;;  %6592 = vmatpush3.msra.mxu0 %v4589_v24  ;;  %v1353_v9 = vadd.f32 %v9092_v2, %v8125_v43 }
 0xaf5   : > { %6608 = vmatpush3.msra.mxu1 %v4627_v38  ;;  %6594 = vmatmul.mubr.msk.f32.vlgmr.msra.gmra.mxu0 %vm770_vm1, %v8426_v62 }
 0xaf6   : > { %6610 = vmatmul.mubr.msk.f32.vlgmr.msra.gmra.mxu1 %vm770_vm1, %v8433_v37  ;;  %6596 = vmatprep.mubr.msk.f32.mxu0 %vm770_vm1, %v8440_v51 }
 0xaf7   : > { %6612 = vmatprep.mubr.msk.f32.mxu1 %vm770_vm1, %v8447_v46 }
 0xaf9   : > { %6597 = vmatmul.mubr.msk.f32.gmra.mxu0 %vm770_vm1, %v8454_v35 }
 0xafa   : > { %6613 = vmatmul.mubr.msk.f32.gmra.mxu1 %vm770_vm1, %v8461_v41  ;;  %6599 = vmatprep.mubr.msk.f32.mxu0 %vm770_vm1, %v8468_v33 }
 0xafb   : > { %6615 = vmatprep.mubr.msk.f32.mxu1 %vm770_vm1, %v8475_v3 }
 0xafd   : > { %6600 = vmatmul.mubr.msk.f32.gmra.mxu0 %vm770_vm1, %v8482_v36 }
 0xafe   : > { %6616 = vmatmul.mubr.msk.f32.gmra.mxu1 %vm770_vm1, %v8489_v47  ;;  %6602 = vmatprep.mubr.msk.f32.mxu0 %vm770_vm1, %v8496_v1 }
 0xaff   : > { %6618 = vmatprep.mubr.msk.f32.mxu1 %vm770_vm1, %v8503_v32 }
 0xb01   : > { %6603 = vmatmul.mubr.msk.f32.gmra.mxu0 %vm770_vm1, %v8510_v29 }
 0xb02   : > { %6619 = vmatmul.mubr.msk.f32.gmra.mxu1 %vm770_vm1, %v8517_v49  ;;  %6625 = vmatprep.mubr.msk.f32.mxu0 %vm770_vm1, %v8524_v48 }
 0xb03   : > { %6641 = vmatprep.mubr.msk.f32.mxu1 %vm770_vm1, %v8531_v56  ;;  %v2530_v56 = vadd.f32 %v9095_v13, %v8123_v7 }
 0xbb5   : > { %v6595_v53 = vpop.f32.mrf.mxu0 }
 0xbb6   : > { %v4745_v61 = vadd.f32 %v6595_v53, %v2520_v25  ;;  %v6611_v10 = vpop.f32.mrf.mxu1  ;;  %v1358_v25 = vadd.f32 %v9098_v23, %v8147_v19 }
 0xbb7   : > { %v4866_v16 = vadd.f32 %v6611_v10, %v1353_v9  ;;  %v4705_v48 = vpop.f32.mrf.mxu0 }
 0xbb8   : > { %v4874_v59 = vmul.f32 0.5, %v4745_v61  ;;  %v4744_v0 = vadd.f32 %v4705_v48, %v2515_v26  ;;  %v4826_v15 = vpop.f32.mrf.mxu1  ;;  %v2540_v26 = vadd.f32 %v9099_v11, %v8153_v18  ;;  %v9105_v11 = vld [vmem:[#allocation27_spill] sm:$0xff] }
 0xbb9   : > { %v4912_v34 = vmul.f32 0.5, %v4866_v16  ;;  %v4865_v30 = vadd.f32 %v4826_v15, %v1348_v21  ;;  %v6598_v27 = vpop.f32.mrf.mxu0  ;;  %v9100_v21 = vld [vmem:[#allocation25_spill] sm:$0xff] }
 0xbba   : > { %6911 = vtanh.f32 %v4874_v59  ;;  %v4873_v4 = vmul.f32 0.5, %v4744_v0  ;;  %v4747_v24 = vadd.f32 %v6598_v27, %v2530_v56  ;;  %v6614_v38 = vpop.f32.mrf.mxu1  ;;  %v1373_v16 = vadd.f32 %v9100_v21, %v8159_v14  ;;  %v9101_v59 = vld [vmem:[#allocation82_spill] sm:$0xff] }
 0xbbb   : > { %6913 = vtanh.f32 %v4912_v34  ;;  %v4911_v2 = vmul.f32 0.5, %v4865_v30  ;;  %v4868_v9 = vadd.f32 %v6614_v38, %v1363_v20  ;;  %v4715_v53 = vpop.f32.mrf.mxu0  ;;  %v2535_v0 = vadd.f32 %v9101_v59, %v8168_v58  ;;  %v9102_v34 = vld [vmem:[#allocation26_spill] sm:$0xff] }
 0xbbc   : > { %6915 = vtanh.f32 %v4873_v4  ;;  %v4882_v61 = vmul.f32 0.5, %v4747_v24  ;;  %v4746_v10 = vadd.f32 %v4715_v53, %v2525_v52  ;;  %v4836_v55 = vpop.f32.mrf.mxu1  ;;  %v1368_v30 = vadd.f32 %v9102_v34, %v8175_v63  ;;  %v9104_v53 = vld [vmem:[#allocation99_spill] sm:$0xff] }
 0xbbd   : > { %6917 = vtanh.f32 %v4911_v2  ;;  %v4920_v48 = vmul.f32 0.5, %v4868_v9  ;;  %v4867_v13 = vadd.f32 %v4836_v55, %v1358_v25  ;;  %v6601_v56 = vpop.f32.mrf.mxu0  ;;  %v9103_v25 = vld [vmem:[#allocation83_spill] sm:$0xff]  ;;  %v9107_v55 = vld [vmem:[#allocation84_spill] sm:$0xff] }
 0xbbe   : > { %6919 = vtanh.f32 %v4882_v61  ;;  %v4881_v15 = vmul.f32 0.5, %v4746_v10  ;;  %v4749_v12 = vadd.f32 %v6601_v56, %v2540_v26  ;;  %v6617_v20 = vpop.f32.mrf.mxu1  ;;  %v2550_v2 = vadd.f32 %v9103_v25, %v8183_v5  ;;  %v9106_v10 = vld [vmem:[#allocation100_spill] sm:$0xff] }
 0xbbf   : > { %6921 = vtanh.f32 %v4920_v48  ;;  %v4919_v27 = vmul.f32 0.5, %v4867_v13  ;;  %v4870_v22 = vadd.f32 %v6617_v20, %v1373_v16  ;;  %v4725_v52 = vpop.f32.mrf.mxu0  ;;  %v1383_v26 = vadd.f32 %v9105_v11, %v9104_v53  ;;  %v9108_v13 = vld [vmem:[#allocation28_spill] sm:$0xff] }
 0xbc0   : > { %6923 = vtanh.f32 %v4881_v15  ;;  %v4748_v4 = vadd.f32 %v4725_v52, %v2535_v0  ;;  %v4846_v24 = vpop.f32.mrf.mxu1  ;;  %v2545_v21 = vadd.f32 %v9107_v55, %v9106_v10  ;;  %v1378_v56 = vadd.f32 %v9108_v13, %v9037_v60 }
 0xbc1   : > { %6925 = vtanh.f32 %v4919_v27  ;;  %v4869_v38 = vadd.f32 %v4846_v24, %v1368_v30  ;;  %v6604_v23 = vpop.f32.mrf.mxu0 }
 0xbc2   : > { %6927 = vtanh.f32 %v4749_v12  ;;  %v6620_v9 = vpop.f32.mrf.mxu1  ;;  %v4751_v16 = vadd.f32 %v6604_v23, %v2550_v2 }
 0xbc3   : > { %6929 = vtanh.f32 %v4870_v22  ;;  %v4735_v61 = vpop.f32.mrf.mxu0  ;;  %v4872_v59 = vadd.f32 %v6620_v9, %v1383_v26 }
 0xbc4   : > { %6931 = vtanh.f32 %v4748_v4  ;;  %v4856_v48 = vpop.f32.mrf.mxu1  ;;  %v4750_v0 = vadd.f32 %v4735_v61, %v2545_v21  ;;  %v4892_v34 = vmul.f32 0.5, %v4751_v16 }
 0xbc5   : > { %6933 = vtanh.f32 %v4869_v38  ;;  %v4871_v12 = vadd.f32 %v4856_v48, %v1378_v56  ;;  %v4930_v27 = vmul.f32 0.5, %v4872_v59 }
 0xbc6   : > { %v4891_v24 = vmul.f32 0.5, %v4750_v0  ;;  %6935 = vtanh.f32 %v4892_v34 }
 0xbc7   : > { %v6912_v15 = vpop.eup %6911  ;;  %v4929_v4 = vmul.f32 0.5, %v4871_v12  ;;  %6937 = vtanh.f32 %v4930_v27 }
 0xbc8   : > { %v6914_v20 = vpop.eup %6913  ;;  %v4878_v52 = vadd.f32 1.0, %v6912_v15  ;;  %6939 = vtanh.f32 %v4891_v24 }
 0xbc9   : > { %v6916_v30 = vpop.eup %6915  ;;  %v4916_v11 = vadd.f32 1.0, %v6914_v20  ;;  %6941 = vtanh.f32 %v4929_v4 }
 0xbca   : > { %v6918_v22 = vpop.eup %6917  ;;  %v4877_v2 = vadd.f32 1.0, %v6916_v30  ;;  %v4880_v61 = vmul.f32 0.5, %v4878_v52 }
 0xbcb   : > { %v6920_v25 = vpop.eup %6919  ;;  %v4915_v38 = vadd.f32 1.0, %v6918_v22  ;;  %v4918_v56 = vmul.f32 0.5, %v4916_v11 }
 0xbcc   : > { %v6922_v23 = vpop.eup %6921  ;;  %v4886_v55 = vadd.f32 1.0, %v6920_v25  ;;  %v4879_v12 = vmul.f32 0.5, %v4877_v2 }
 0xbcd   : > { %v6924_v13 = vpop.eup %6923  ;;  %v4924_v9 = vadd.f32 1.0, %v6922_v23  ;;  %v4917_v22 = vmul.f32 0.5, %v4915_v38 }
 0xbce   : > { %v6926_v26 = vpop.eup %6925  ;;  %v4888_v21 = vmul.f32 0.5, %v4886_v55  ;;  %v4885_v16 = vadd.f32 1.0, %v6924_v13 }
 0xbcf   : > { %v6928_v48 = vpop.eup %6927  ;;  %v4926_v59 = vmul.f32 0.5, %v4924_v9  ;;  %v4923_v0 = vadd.f32 1.0, %v6926_v26 }
 0xbd0   : > { %v6930_v15 = vpop.eup %6929  ;;  %v4900_v20 = vmul.f32 %v4888_v21, %v8662_v17  ;;  %v4887_v30 = vmul.f32 0.5, %v4885_v16  ;;  %v4902_v34 = vmul.f32 %v6928_v48, %v4880_v61 }
 0xbd1   : > { %v6932_v25 = vpop.eup %6931  ;;  %v4938_v27 = vmul.f32 %v4926_v59, %v8665_v40  ;;  %v4925_v23 = vmul.f32 0.5, %v4923_v0  ;;  %v4940_v52 = vmul.f32 %v6930_v15, %v4918_v56 }
 0xbd2   : > { %v6934_v55 = vpop.eup %6933  ;;  %v4899_v24 = vmul.f32 %v4887_v30, %v8667_v57  ;;  %v8754_v13 = vadd.f32 %v4902_v34, %v4900_v20  ;;  %v4901_v11 = vmul.f32 %v6932_v25, %v4879_v12 }
 0xbd3   : > { %v4937_v4 = vmul.f32 %v4925_v23, %v8670_v39  ;;  %v8757_v9 = vadd.f32 %v4940_v52, %v4938_v27  ;;  %v4939_v2 = vmul.f32 %v6934_v55, %v4917_v22  ;;  %v6936_v40 = vpop.eup %6935 }
 0xbd4   : > { %v8759_v17 = vadd.f32 %v4901_v11, %v4899_v24  ;;  %6943 = vtanh.f32 %v8754_v13  ;;  %v6938_v57 = vpop.eup %6937  ;;  %v4896_v39 = vadd.f32 1.0, %v6936_v40 }
 0xbd5   : > { %v8762_v38 = vadd.f32 %v4939_v2, %v4937_v4  ;;  %6945 = vtanh.f32 %v8757_v9  ;;  %v6940_v26 = vpop.eup %6939  ;;  %v4934_v21 = vadd.f32 1.0, %v6938_v57  ;;  %v9115_v4 = vld [vmem:[#allocation15_spill] sm:$0xff] }
 0xbd6   : > { %6947 = vtanh.f32 %v8759_v17  ;;  %v6942_v61 = vpop.eup %6941  ;;  %v4895_v16 = vadd.f32 1.0, %v6940_v26  ;;  %v4898_v56 = vmul.f32 0.5, %v4896_v39 }
 0xbd7   : > { %6949 = vtanh.f32 %v8762_v38  ;;  %v4933_v48 = vadd.f32 1.0, %v6942_v61  ;;  %v4936_v0 = vmul.f32 0.5, %v4934_v21 }
 0xbd8   : > { %v4897_v12 = vmul.f32 0.5, %v4895_v16 }
 0xbd9   : > { %v4935_v34 = vmul.f32 0.5, %v4933_v48  ;;  %v9117_v48 = vld [vmem:[#allocation16_spill] sm:$0xff] }
 0xbe1   : > { %v6944_v59 = vpop.eup %6943 }
 0xbe2   : > { %v6946_v15 = vpop.eup %6945  ;;  %v4908_v20 = vmul.f32 %v6944_v59, %v4898_v56  ;;  %v1041_v56 = vadd.f32 %v9117_v48, %v8147_v19  ;;  %v9118_v59 = vld [vmem:[#allocation95_spill] sm:$0xff] }
 0xbe3   : > { %v6948_v30 = vpop.eup %6947  ;;  %v4946_v25 = vmul.f32 %v6946_v15, %v4936_v0 }
 0xbe4   : > { %v6950_v22 = vpop.eup %6949  ;;  %v8768_v27 = vadd.f32 %v4908_v20, %v8676_v8  ;;  %6621 = vmatprep.subr.mxu0 %v4908_v20  ;;  %v4907_v23 = vmul.f32 %v6948_v30, %v4897_v12  ;;  %v9109_v8 = vmov 0.0  }
 0xbe5   : > { %v8771_v52 = vadd.f32 %v4946_v25, %v8679_v28  ;;  %6637 = vmatprep.subr.mxu1 %v4946_v25  ;;  %6622 = vmatpush3.msra.mxu0 %v4908_v20  ;;  %v4945_v55 = vmul.f32 %v6950_v22, %v4935_v34  ;;  %v9119_v34 = vld [vmem:[#allocation17_spill] sm:$0xff]  ;;  %v9120_v22 = vld [vmem:[#allocation96_spill] sm:$0xff] }
 0xbe6   : > { %6638 = vmatpush3.msra.mxu1 %v4946_v25  ;;  %v8774_v24 = vadd.f32 %v4907_v23, %v8682_v6  ;;  %6623 = vmatprep.subr.mxu0 %v4907_v23  ;;  %v1056_v25 = vadd.f32 %v9119_v34, %v8159_v14 }
 0xbe7   : > { %v8777_v11 = vadd.f32 %v4945_v55, %v8685_v31  ;;  %6639 = vmatprep.subr.mxu1 %v4945_v55  ;;  %6624 = vmatpush3.msra.mxu0 %v4907_v23  ;;  %v2853_v23 = vadd.f32 %v9120_v22, %v8168_v58 }
 0xbe8   : > { %6640 = vmatpush3.msra.mxu1 %v4945_v55  ;;  %6626 = vmatmul.mubr.msk.f32.vlgmr.msra.gmra.mxu0 %vm770_vm1, %v8426_v62  ;;  %v9110_v62 = vld [vmem:[#allocation91_spill] sm:$0xff] }
 0xbe9   : > { %6642 = vmatmul.mubr.msk.f32.vlgmr.msra.gmra.mxu1 %vm770_vm1, %v8433_v37  ;;  %6628 = vmatprep.mubr.msk.f32.mxu0 %vm770_vm1, %v8440_v51  ;;  %v2838_v37 = vadd.f32 %v9110_v62, %v8117_v54  ;;  %v9111_v51 = vld [vmem:[#allocation13_spill] sm:$0xff] }
 0xbea   : > { %6644 = vmatprep.mubr.msk.f32.mxu1 %vm770_vm1, %v8447_v46  ;;  %6653 = vmatprep.subr.mxu0 %v9109_v8  ;;  %v1036_v46 = vadd.f32 %v9111_v51, %v8125_v43  ;;  %v1046_v43 = vadd.f32 %v9115_v4, %v8129_v44  ;;  %v2858_v44 = vadd.f32 %v9118_v59, %v8153_v18 }
 0xbeb   : > { %6660 = vmatprep.subr.mxu1 %v9109_v8 }
 0xbec   : > { %6629 = vmatmul.mubr.msk.f32.gmra.mxu0 %vm770_vm1, %v8454_v35 }
 0xbed   : > { %6645 = vmatmul.mubr.msk.f32.gmra.mxu1 %vm770_vm1, %v8461_v41  ;;  %6631 = vmatprep.mubr.msk.f32.mxu0 %vm770_vm1, %v8468_v33  ;;  %v9112_v41 = vld [vmem:[#allocation92_spill] sm:$0xff] }
 0xbee   : > { %6647 = vmatprep.mubr.msk.f32.mxu1 %vm770_vm1, %v8475_v3  ;;  %v2833_v33 = vadd.f32 %v9112_v41, %v8133_v50  ;;  %v9116_v50 = vld [vmem:[#allocation94_spill] sm:$0xff] }
 0xbef   : > { %v2843_v26 = vadd.f32 %v9116_v50, %v8139_v42 }
 0xbf0   : > { %6632 = vmatmul.mubr.msk.f32.gmra.mxu0 %vm770_vm1, %v8482_v36 }
 0xbf1   : > { %6648 = vmatmul.mubr.msk.f32.gmra.mxu1 %vm770_vm1, %v8489_v47  ;;  %6634 = vmatprep.mubr.msk.f32.mxu0 %vm770_vm1, %v8496_v1  ;;  %v9113_v47 = vld [vmem:[#allocation14_spill] sm:$0xff] }
 0xbf2   : > { %6650 = vmatprep.mubr.msk.f32.mxu1 %vm770_vm1, %v8503_v32  ;;  %v1031_v1 = vadd.f32 %v9113_v47, %v8143_v45 }
 0xbf4   : > { %6635 = vmatmul.mubr.msk.f32.gmra.mxu0 %vm770_vm1, %v8510_v29 }
 0xbf5   : > { %6651 = vmatmul.mubr.msk.f32.gmra.mxu1 %vm770_vm1, %v8517_v49  ;;  %6657 = vmatprep.mubr.msk.f32.mxu0 %vm7071_vm2, %v9109_v8  ;;  %v9114_v49 = vld [vmem:[#allocation93_spill] sm:$0xff] }
 0xbf6   : > { %6664 = vmatprep.mubr.msk.f32.mxu1 %vm7071_vm2, %v9109_v8  ;;  %v2848_v28 = vadd.f32 %v9114_v49, %v8123_v7  ;;  %v9124_v49 = vld [vmem:[#allocation98_spill] sm:$0xff] }
 0xca8   : > { %v6627_v35 = vpop.f32.mrf.mxu0 }
 0xca9   : > { %v5063_v3 = vadd.f32 %v6627_v35, %v2838_v37  ;;  %v6643_v36 = vpop.f32.mrf.mxu1 }
 0xcaa   : > { %v5184_v32 = vadd.f32 %v6643_v36, %v1036_v46  ;;  %v5023_v29 = vpop.f32.mrf.mxu0  ;;  %v9121_v46 = vld [vmem:[#allocation18_spill] sm:$0xff]  ;;  %v9122_v36 = vld [vmem:[#allocation97_spill] sm:$0xff] }
 0xcab   : > { %v5192_v6 = vmul.f32 0.5, %v5063_v3  ;;  %v5062_v31 = vadd.f32 %v5023_v29, %v2833_v33  ;;  %v5144_v54 = vpop.f32.mrf.mxu1  ;;  %v1051_v35 = vadd.f32 %v9121_v46, %v8175_v63  ;;  %v2868_v58 = vadd.f32 %v9122_v36, %v8183_v5 }
 0xcac   : > { %v5230_v2 = vmul.f32 0.5, %v5184_v32  ;;  %v5183_v40 = vadd.f32 %v5144_v54, %v1031_v1  ;;  %v6630_v57 = vpop.f32.mrf.mxu0  ;;  %v9123_v1 = vld [vmem:[#allocation19_spill] sm:$0xff]  ;;  %v9125_v54 = vld [vmem:[#allocation20_spill] sm:$0xff] }
 0xcad   : > { %6951 = vtanh.f32 %v5192_v6  ;;  %v5191_v61 = vmul.f32 0.5, %v5062_v31  ;;  %v5065_v45 = vadd.f32 %v6630_v57, %v2848_v28  ;;  %v6646_v39 = vpop.f32.mrf.mxu1  ;;  %v1066_v32 = vadd.f32 %v9123_v1, %v9104_v53 }
 0xcae   : > { %6953 = vtanh.f32 %v5230_v2  ;;  %v5229_v21 = vmul.f32 0.5, %v5183_v40  ;;  %v5186_v16 = vadd.f32 %v6646_v39, %v1046_v43  ;;  %v5033_v7 = vpop.f32.mrf.mxu0  ;;  %v2863_v28 = vadd.f32 %v9124_v49, %v9106_v10 }
 0xcaf   : > { %6955 = vtanh.f32 %v5191_v61  ;;  %v5200_v0 = vmul.f32 0.5, %v5065_v45  ;;  %v5064_v15 = vadd.f32 %v5033_v7, %v2843_v26  ;;  %v5154_v12 = vpop.f32.mrf.mxu1  ;;  %v1061_v4 = vadd.f32 %v9125_v54, %v9037_v60 }
 0xcb0   : > { %6957 = vtanh.f32 %v5229_v21  ;;  %v5238_v42 = vmul.f32 0.5, %v5186_v16  ;;  %v5185_v20 = vadd.f32 %v5154_v12, %v1041_v56  ;;  %v6633_v30 = vpop.f32.mrf.mxu0 }
 0xcb1   : > { %6959 = vtanh.f32 %v5200_v0  ;;  %v5199_v55 = vmul.f32 0.5, %v5064_v15  ;;  %v5067_v19 = vadd.f32 %v6633_v30, %v2858_v44  ;;  %v6649_v62 = vpop.f32.mrf.mxu1 }
 0xcb2   : > { %6961 = vtanh.f32 %v5238_v42  ;;  %v5237_v18 = vmul.f32 0.5, %v5185_v20  ;;  %v5188_v37 = vadd.f32 %v6649_v62, %v1056_v25  ;;  %v5043_v51 = vpop.f32.mrf.mxu0 }
 0xcb3   : > { %6963 = vtanh.f32 %v5199_v55  ;;  %v5066_v41 = vadd.f32 %v5043_v51, %v2853_v23  ;;  %v5164_v33 = vpop.f32.mrf.mxu1 }
 0xcb4   : > { %6965 = vtanh.f32 %v5237_v18  ;;  %v5187_v3 = vadd.f32 %v5164_v33, %v1051_v35  ;;  %v6636_v14 = vpop.f32.mrf.mxu0 }
 0xcb5   : > { %6967 = vtanh.f32 %v5067_v19  ;;  %v6652_v47 = vpop.f32.mrf.mxu1  ;;  %v5069_v63 = vadd.f32 %v6636_v14, %v2868_v58 }
 0xcb6   : > { %6969 = vtanh.f32 %v5188_v37  ;;  %v5053_v29 = vpop.f32.mrf.mxu0  ;;  %v5190_v31 = vadd.f32 %v6652_v47, %v1066_v32 }
 0xcb7   : > { %6971 = vtanh.f32 %v5066_v41  ;;  %v5174_v6 = vpop.f32.mrf.mxu1  ;;  %v5068_v43 = vadd.f32 %v5053_v29, %v2863_v28  ;;  %v5210_v57 = vmul.f32 0.5, %v5069_v63 }
 0xcb8   : > { %6973 = vtanh.f32 %v5187_v3  ;;  %v5189_v2 = vadd.f32 %v5174_v6, %v1061_v4  ;;  %v5248_v26 = vmul.f32 0.5, %v5190_v31 }
 0xcb9   : > { %v5209_v45 = vmul.f32 0.5, %v5068_v43  ;;  %6975 = vtanh.f32 %v5210_v57 }
 0xcba   : > { %v6952_v5 = vpop.eup %6951  ;;  %v5247_v21 = vmul.f32 0.5, %v5189_v2  ;;  %6977 = vtanh.f32 %v5248_v26 }
 0xcbb   : > { %v6954_v40 = vpop.eup %6953  ;;  %v5196_v61 = vadd.f32 1.0, %v6952_v5  ;;  %6979 = vtanh.f32 %v5209_v45 }
 0xcbc   : > { %v6956_v50 = vpop.eup %6955  ;;  %v5234_v10 = vadd.f32 1.0, %v6954_v40  ;;  %6981 = vtanh.f32 %v5247_v21 }
 0xcbd   : > { %v6958_v53 = vpop.eup %6957  ;;  %v5195_v7 = vadd.f32 1.0, %v6956_v50  ;;  %v5198_v0 = vmul.f32 0.5, %v5196_v61 }
 0xcbe   : > { %v6960_v39 = vpop.eup %6959  ;;  %v5233_v59 = vadd.f32 1.0, %v6958_v53  ;;  %v5236_v20 = vmul.f32 0.5, %v5234_v10 }
 0xcbf   : > { %v6962_v16 = vpop.eup %6961  ;;  %v5204_v48 = vadd.f32 1.0, %v6960_v39  ;;  %v5197_v22 = vmul.f32 0.5, %v5195_v7  ;;  %v5267_v39 = vld [vmem:[%s8907_s9] sm:$0xf] }
 0xcc0   : > { %v6964_v56 = vpop.eup %6963  ;;  %v5242_v60 = vadd.f32 1.0, %v6962_v16  ;;  %v5235_v18 = vmul.f32 0.5, %v5233_v59  ;;  %v5419_v16 = vpop.permute.xlu0 %5418 }
 0xcc1   : > { %v6966_v44 = vpop.eup %6965  ;;  %v5206_v15 = vmul.f32 0.5, %v5204_v48  ;;  %v5203_v12 = vadd.f32 1.0, %v6964_v56 }
 0xcc2   : > { %v6968_v42 = vpop.eup %6967  ;;  %v5244_v30 = vmul.f32 0.5, %v5242_v60  ;;  %v5241_v34 = vadd.f32 1.0, %v6966_v44 }
 0xcc3   : > { %v6970_v25 = vpop.eup %6969  ;;  %v5218_v23 = vmul.f32 %v5206_v15, %v8754_v13  ;;  %v5205_v55 = vmul.f32 0.5, %v5203_v12  ;;  %v5220_v19 = vmul.f32 %v6968_v42, %v5198_v0 }
 0xcc4   : > { %v6972_v62 = vpop.eup %6971  ;;  %v5256_v37 = vmul.f32 %v5244_v30, %v8757_v9  ;;  %v5243_v51 = vmul.f32 0.5, %v5241_v34  ;;  %v5258_v46 = vmul.f32 %v6970_v25, %v5236_v20 }
 0xcc5   : > { %v6974_v35 = vpop.eup %6973  ;;  %v5217_v41 = vmul.f32 %v5205_v55, %v8759_v17  ;;  %v5222_v33 = vadd.f32 %v5220_v19, %v5218_v23  ;;  %v5219_v3 = vmul.f32 %v6972_v62, %v5197_v22 }
 0xcc6   : > { %v5255_v14 = vmul.f32 %v5243_v51, %v8762_v38  ;;  %v5260_v36 = vadd.f32 %v5258_v46, %v5256_v37  ;;  %v5257_v58 = vmul.f32 %v6974_v35, %v5235_v18  ;;  %v6976_v1 = vpop.eup %6975 }
 0xcc7   : > { %6983 = vtanh.f32 %v5222_v33  ;;  %v5221_v47 = vadd.f32 %v5219_v3, %v5217_v41  ;;  %v6978_v32 = vpop.eup %6977  ;;  %v5214_v49 = vadd.f32 1.0, %v6976_v1 }
 0xcc8   : > { %6985 = vtanh.f32 %v5260_v36  ;;  %v5259_v13 = vadd.f32 %v5257_v58, %v5255_v14  ;;  %v6980_v9 = vpop.eup %6979  ;;  %v5252_v28 = vadd.f32 1.0, %v6978_v32 }
 0xcc9   : > { %6987 = vtanh.f32 %v5221_v47  ;;  %v6982_v29 = vpop.eup %6981  ;;  %v5213_v63 = vadd.f32 1.0, %v6980_v9  ;;  %v5216_v6 = vmul.f32 0.5, %v5214_v49 }
 0xcca   : > { %6989 = vtanh.f32 %v5259_v13  ;;  %v5251_v17 = vadd.f32 1.0, %v6982_v29  ;;  %v5254_v54 = vmul.f32 0.5, %v5252_v28 }
 0xccb   : > { %v5215_v43 = vmul.f32 0.5, %v5213_v63 }
 0xccc   : > { %v5253_v40 = vmul.f32 0.5, %v5251_v17 }
 0xcd4   : > { %v6984_v31 = vpop.eup %6983 }
 0xcd5   : > { %v6986_v38 = vpop.eup %6985  ;;  %v5226_v4 = vmul.f32 %v6984_v31, %v5216_v6 }
 0xcd6   : > { %v6988_v5 = vpop.eup %6987  ;;  %v5264_v2 = vmul.f32 %v6986_v38, %v5254_v54 }
 0xcd7   : > { %v6990_v57 = vpop.eup %6989  ;;  %v5225_v50 = vmul.f32 %v6988_v5, %v5215_v43  ;;  %v5228_v26 = vadd.f32 %v5226_v4, %v8768_v27  ;;  %v5268_v27 = vld [vmem:[%s8908_s10] sm:$0xf] }
 0xcd8   : > { %v5263_v53 = vmul.f32 %v6990_v57, %v5253_v40  ;;  %v5266_v61 = vadd.f32 %v5264_v2, %v8771_v52 }
 0xcd9   : > { %6661 = vmatpush3.msra.mxu1 %v5228_v26  ;;  %v5227_v45 = vadd.f32 %v5225_v50, %v8774_v24 }
 0xcda   : > { %6654 = vmatpush3.msra.mxu0 %v5266_v61  ;;  %6662 = vmatprep.subr.mxu1 %v9109_v8  ;;  %v5265_v10 = vadd.f32 %v5263_v53, %v8777_v11 }
 0xcdb   : > { %6655 = vmatprep.subr.mxu0 %v9109_v8  ;;  %6663 = vmatpush3.msra.mxu1 %v5227_v45 }
 0xcdc   : > { %6656 = vmatpush3.msra.mxu0 %v5265_v10  ;;  %6665 = vmatmul.mubr.msk.f32.vlgmr.msra.gmra.mxu1 %vm770_vm1, %v5267_v39 }
 0xcdd   : > { %6658 = vmatmul.mubr.msk.f32.vlgmr.msra.gmra.mxu0 %vm770_vm1, %v5268_v27 }
 0xd9c   : > { %v5411_v52 = vpop.f32.mrf.mxu1 }
 0xd9d   : > { %v5338_v24 = vpop.f32.mrf.mxu0 }
 0xd9e   : > { %v5412_v11 = vadd.f32 %v5411_v52, %v5338_v24  ;;  %v6666_v21 = vpop.f32.mrf.mxu1 }
 0xd9f   : > { %v6659_v7 = vpop.f32.mrf.mxu0 }
 0xda0   : > { %v5421_v8 = vadd.f32 %v5419_v16, %v5412_v11 }
 0xda2   : > { %5422 = vst [vmem:[%s570_s0] sm:$0xf] %v5421_v8 }
 0xda3   : > { %7020 = shalt.err (!%p7017_p5)
}
 0xda4   : > { %s7021_s2 = scalar_lea.hbm %s5435_s20, 64  ;;  %s7025_s0 = scalar_lea.hbm %s8910_s12, 128 }
 0xda5   : > { %p7022_p7 = scmp.ne.s32.totalorder %s5435_s20, %s7021_s2  ;;  %p7026_p12 = scmp.lt.s32.totalorder %s5435_s20, %s8910_s12 }
 0xda6   : > { %p7027_p13 = scmp.lt.s32.totalorder %s7025_s0, %s7021_s2 }
 0xda7   : > { %p7023_p10 = pnand %p7022_p7, %p7176_p6 }
 0xda8   : > { %p7028_p0 = por %p7027_p13, %p7026_p12 }
 0xda9   : > { %p7024_p11 = pneg %p7023_p10 }
 0xdab   : > { %p7029_p9 = pnand %p7028_p0, %p7024_p11 }
 0xdad   : > { %7032 = shalt.err (!%p7029_p9)
}
 0xdae   : > { %6667 = dma.vmem_to_hbm [thread:$0]  (%p7176_p6), %s5438_s1, 64, %s5435_s20, %s5424_s29  }
 0xdaf PF: > { %s5449_s26 = sand.u32 1, %s7055_s21   ;;  %p9127_p1 = scmp.ge.s32.totalorder %s7067_s24, 2 }
 0xdb0   : > { %s5450_s25 = scalar_lea.sflag [#allocation6], %s5449_s26 }
 0xdb1   : > { %p6670_p2 = pnand %p9127_p1, %p7180_p8 }
 0xdb3   : > { %p6671_p3 = pneg %p6670_p2 }
 0xdb5   : > { %7050 = dma.done.wait (%p6671_p3), %s5450_s25, 64  }
 0xdb6   : > { %7052 = vsyncadd (%p6671_p3), %s5450_s25, 4294967232  ;;  %p22_p9 = scmp.ge.s32.totalorder %s7161_s27, 4   ;;  %s9128_s21 = smov %s7059_s22 }
 0xdb7   : > { %s9129_s22 = smov %s7063_s23  ;;  %s9130_s23 = smov %s7174_s30 }
 0xdb8   : > { %s9131_s24 = smov %s7161_s27  ;;  %24 = sbr.rel (!%p22_p9) target bundleno = 7 (0x7), region = 165 }
 0xdbd   :  { %5455 = vsyncpa [#allocation6], 1 }
 0xdbe   :  { %5457 = vsyncpa [#allocation6 + $0x1], 1 }

</bundles_post_ra>
